<compile_context>
chip_gen: v5e
topology: v5e:2x2
jax: 0.10.0
libtpu: 0.0.40
codegen_flags: <defaults>
</compile_context>

<pallas_src>
import jax
import jax.numpy as jnp
from jax import lax
from jax.experimental import pallas as pl
from jax.experimental.pallas import tpu as pltpu

# ----------------------------- model config ---------------------------------
BATCH = 2
SEQ = 8            # max_length (small stand-in for max_length=50)
HIDDEN = 128       # lane-dense hidden size (CLIP-L uses 768; 128 keeps vregs full)
HEADS = 4
HEAD_DIM = HIDDEN // HEADS
INTER = 4 * HIDDEN
LAYERS = 2
VOCAB = 128
NEG_INF = -1e9

assert HEADS * HEAD_DIM == HIDDEN


# ----------------------------- kernel ---------------------------------------
def _layernorm(x, gamma, beta, eps=1e-5):
    """f32 LayerNorm over the last axis.  gamma/beta broadcast as (1, D)."""
    mu = jnp.mean(x, axis=-1, keepdims=True)
    xc = x - mu
    var = jnp.mean(xc * xc, axis=-1, keepdims=True)
    inv = lax.rsqrt(var + eps)
    return xc * inv * gamma + beta


def clip_text_kernel(tok_ref, tok_emb_ref, pos_ref, ln_ref,
                     wqkv_ref, bqkv_ref, wo_ref, bo_ref,
                     w1_ref, b1_ref, w2_ref, b2_ref, fin_ref,
                     out_ref):
    """Full CLIP text-transformer forward for the whole batch in one shot.

    Shapes (all resident in VMEM):
      tok     : (B*S, 1)   int32
      tok_emb : (V, D)     bf16
      pos     : (S, D)     f32  (tiled over batch inside the kernel)
      ln      : (L, 4, D)  f32  rows = [ln1_g, ln1_b, ln2_g, ln2_b]
      wqkv    : (L, D, 3D) bf16   bqkv: (L, 1, 3D) f32
      wo      : (L, D, D)  bf16   bo  : (L, 1, D)  f32
      w1      : (L, D, I)  bf16   b1  : (L, 1, I)  f32
      w2      : (L, I, D)  bf16   b2  : (L, 1, D)  f32
      fin     : (2, D)     f32  rows = [final_g, final_b]
      out     : (B*S, D)   f32
    """
    N = BATCH * SEQ
    D = HIDDEN

    # ---- token embedding: one-hot bf16 matmul (avoids gather) + pos emb ----
    tok = tok_ref[...]                                          # (N, 1) int32
    vocab_iota = lax.broadcasted_iota(jnp.int32, (N, VOCAB), 1)
    onehot = jnp.where(vocab_iota == tok, 1.0, 0.0).astype(jnp.bfloat16)
    x = jnp.dot(onehot, tok_emb_ref[...],
                preferred_element_type=jnp.float32)             # (N, D) f32
    pos = pos_ref[...]                                          # (S, D) f32
    x = x + jnp.concatenate([pos] * BATCH, axis=0)              # sublane concat

    # ---- causal mask: built once, reused by every layer ----
    row = lax.broadcasted_iota(jnp.int32, (SEQ, SEQ), 0)
    col = lax.broadcasted_iota(jnp.int32, (SEQ, SEQ), 1)
    mask = jnp.where(col <= row, 0.0, NEG_INF).astype(jnp.float32)   # (S, S)

    scale = jnp.float32(HEAD_DIM) ** -0.5

    def split_heads(t):
        """(N, D) -> (B*H, S, HEAD_DIM) via static lane slices + leading stack."""
        parts = []
        for b in range(BATCH):
            rows = t[b * SEQ:(b + 1) * SEQ, :]
            for h in range(HEADS):
                parts.append(rows[:, h * HEAD_DIM:(h + 1) * HEAD_DIM])
        return jnp.stack(parts, axis=0)

    for l in range(LAYERS):                 # static unroll; weights VMEM-resident
        ln = ln_ref[l]                      # (4, D) f32

        # ---------------- causal multi-head self-attention (pre-LN) ----------
        h1 = _layernorm(x, ln[0:1, :], ln[1:2, :])
        qkv = jnp.dot(h1.astype(jnp.bfloat16), wqkv_ref[l],
                      preferred_element_type=jnp.float32) + bqkv_ref[l]   # (N, 3D)

        q = split_heads(qkv[:, 0:D] * scale).astype(jnp.bfloat16)   # (G, S, Dh)
        k = split_heads(qkv[:, D:2 * D]).astype(jnp.bfloat16)
        v = split_heads(qkv[:, 2 * D:3 * D]).astype(jnp.bfloat16)

        s = jnp.einsum("gqd,gkd->gqk", q, k,
                       preferred_element_type=jnp.float32)           # (G, S, S)
        s = s + mask[None, :, :]
        m = jnp.max(s, axis=-1, keepdims=True)
        p = jnp.exp(s - m)                                           # f32 softmax
        p = p * pl.reciprocal(jnp.sum(p, axis=-1, keepdims=True), approx=True)
        o = jnp.einsum("gqk,gkd->gqd", p.astype(jnp.bfloat16), v,
                       preferred_element_type=jnp.float32)           # (G, S, Dh)

        # reassemble (B*H, S, Dh) -> (N, D)
        attn = jnp.concatenate(
            [jnp.concatenate([o[b * HEADS + h] for h in range(HEADS)], axis=-1)
             for b in range(BATCH)], axis=0)

        attn = jnp.dot(attn.astype(jnp.bfloat16), wo_ref[l],
                       preferred_element_type=jnp.float32) + bo_ref[l]
        x = x + attn

        # ---------------- MLP with quick-GELU (pre-LN) -----------------------
        h2 = _layernorm(x, ln[2:3, :], ln[3:4, :])
        z = jnp.dot(h2.astype(jnp.bfloat16), w1_ref[l],
                    preferred_element_type=jnp.float32) + b1_ref[l]
        z = z * jax.nn.sigmoid(1.702 * z)                            # quick_gelu, f32
        z = jnp.dot(z.astype(jnp.bfloat16), w2_ref[l],
                    preferred_element_type=jnp.float32) + b2_ref[l]
        x = x + z

    # ---- final LayerNorm -> last_hidden_state ----
    fin = fin_ref[...]
    out_ref[...] = _layernorm(x, fin[0:1, :], fin[1:2, :])


# ----------------------------- wrapper ---------------------------------------
@jax.jit
def clip_text_embedder_forward(tokens, params):
    """tokens: (B, S) int32 token ids -> last_hidden_state (B, S, D) float32."""
    N = BATCH * SEQ
    tok2d = tokens.reshape(N, 1).astype(jnp.int32)

    vmem = pl.BlockSpec(memory_space=pltpu.MemorySpace.VMEM)
    args = (tok2d, params["tok_emb"], params["pos_emb"], params["ln"],
            params["wqkv"], params["bqkv"], params["wo"], params["bo"],
            params["w1"], params["b1"], params["w2"], params["b2"],
            params["final_ln"])

    out = pl.pallas_call(
        clip_text_kernel,
        out_shape=jax.ShapeDtypeStruct((N, HIDDEN), jnp.float32),
        in_specs=[vmem] * len(args),
        out_specs=vmem,
    )(*args)
    return out.reshape(BATCH, SEQ, HIDDEN)


# ----------------------------- pure-JAX reference ----------------------------
def clip_text_reference(tokens, params):
    """Numerically-equivalent pure-JAX forward (same bf16 casts) for checking."""
    B, S, D, H, Dh = BATCH, SEQ, HIDDEN, HEADS, HEAD_DIM
    tok = tokens.reshape(-1)
    onehot = jax.nn.one_hot(tok, VOCAB, dtype=jnp.bfloat16)
    x = jnp.dot(onehot, params["tok_emb"], preferred_element_type=jnp.float32)
    x = x + jnp.tile(params["pos_emb"], (B, 1))

    row = jnp.arange(S)[:, None]
    col = jnp.arange(S)[None, :]
    mask = jnp.where(col <= row, 0.0, NEG_INF).astype(jnp.float32)
    scale = jnp.float32(Dh) ** -0.5

    def ln_fn(v, g, b, eps=1e-5):
        mu = v.mean(-1, keepdims=True)
        vc = v - mu
        var = (vc * vc).mean(-1, keepdims=True)
        return vc * lax.rsqrt(var + eps) * g + b

    for l in range(LAYERS):
        ln = params["ln"][l]
        h1 = ln_fn(x, ln[0], ln[1])
        qkv = jnp.dot(h1.astype(jnp.bfloat16), params["wqkv"][l],
                      preferred_element_type=jnp.float32) + params["bqkv"][l]
        q = (qkv[:, :D] * scale).reshape(B, S, H, Dh).transpose(0, 2, 1, 3)
        k = qkv[:, D:2 * D].reshape(B, S, H, Dh).transpose(0, 2, 1, 3)
        v = qkv[:, 2 * D:].reshape(B, S, H, Dh).transpose(0, 2, 1, 3)
        s = jnp.einsum("bhqd,bhkd->bhqk", q.astype(jnp.bfloat16),
                       k.astype(jnp.bfloat16),
                       preferred_element_type=jnp.float32) + mask
        p = jax.nn.softmax(s, axis=-1)
        o = jnp.einsum("bhqk,bhkd->bhqd", p.astype(jnp.bfloat16),
                       v.astype(jnp.bfloat16),
                       preferred_element_type=jnp.float32)
        o = o.transpose(0, 2, 1, 3).reshape(B * S, D)
        attn = jnp.dot(o.astype(jnp.bfloat16), params["wo"][l],
                       preferred_element_type=jnp.float32) + params["bo"][l]
        x = x + attn

        h2 = ln_fn(x, ln[2], ln[3])
        z = jnp.dot(h2.astype(jnp.bfloat16), params["w1"][l],
                    preferred_element_type=jnp.float32) + params["b1"][l]
        z = z * jax.nn.sigmoid(1.702 * z)
        z = jnp.dot(z.astype(jnp.bfloat16), params["w2"][l],
                    preferred_element_type=jnp.float32) + params["b2"][l]
        x = x + z

    fin = params["final_ln"]
    return ln_fn(x, fin[0], fin[1]).reshape(B, S, D)


# ----------------------------- parameters ------------------------------------
def init_params(key):
    L, D, I, V, S = LAYERS, HIDDEN, INTER, VOCAB, SEQ
    keys = jax.random.split(key, 2 + 4 * L)     # exact count; indexed explicitly

    def nrm(k, shape, scale=0.02, dtype=jnp.float32):
        return (scale * jax.random.normal(k, shape)).astype(dtype)

    wqkv = jnp.stack([nrm(keys[2 + 4 * l + 0], (D, 3 * D), dtype=jnp.bfloat16)
                      for l in range(L)])
    wo = jnp.stack([nrm(keys[2 + 4 * l + 1], (D, D), dtype=jnp.bfloat16)
                    for l in range(L)])
    w1 = jnp.stack([nrm(keys[2 + 4 * l + 2], (D, I), dtype=jnp.bfloat16)
                    for l in range(L)])
    w2 = jnp.stack([nrm(keys[2 + 4 * l + 3], (I, D), dtype=jnp.bfloat16)
                    for l in range(L)])

    ln_layer = jnp.stack([jnp.ones(D), jnp.zeros(D), jnp.ones(D), jnp.zeros(D)])
    ln = jnp.broadcast_to(ln_layer[None], (L, 4, D)).astype(jnp.float32)

    return {
        "tok_emb": nrm(keys[0], (V, D), dtype=jnp.bfloat16),
        "pos_emb": nrm(keys[1], (S, D), dtype=jnp.float32),
        "ln": ln,
        "wqkv": wqkv, "bqkv": jnp.zeros((L, 1, 3 * D), jnp.float32),
        "wo": wo, "bo": jnp.zeros((L, 1, D), jnp.float32),
        "w1": w1, "b1": jnp.zeros((L, 1, I), jnp.float32),
        "w2": w2, "b2": jnp.zeros((L, 1, D), jnp.float32),
        "final_ln": jnp.stack([jnp.ones(D), jnp.zeros(D)]).astype(jnp.float32),
    }


# ----------------------------- main -------------------------------------------
if __name__ == "__main__":
    key = jax.random.PRNGKey(0)
    pkey, tkey = jax.random.split(key)
    params = init_params(pkey)
    # TODO(synk): tokenizer (string -> token ids) has no tensor compute; we feed ids.
    tokens = jax.random.randint(tkey, (BATCH, SEQ), 0, VOCAB, dtype=jnp.int32)

    out = jax.block_until_ready(clip_text_embedder_forward(tokens, params))
    ref = jax.block_until_ready(clip_text_reference(tokens, params))

    assert out.shape == (BATCH, SEQ, HIDDEN)
    assert out.dtype == jnp.float32
    assert bool(jnp.all(jnp.isfinite(out)))
    # generous tolerance: kernel uses EUP approx reciprocal in softmax
    assert bool(jnp.allclose(out, ref, atol=5e-2, rtol=5e-2)), \
        float(jnp.max(jnp.abs(out - ref)))
    print("KERNEL_OK")
</pallas_src>

<mosaic_0001>
module attributes {stable_mosaic.version = 11 : i64} {
  func.func @clip_text_kernel(%arg0: memref<16x1xi32, #tpu.memory_space<vmem>>, %arg1: memref<128x128xbf16, #tpu.memory_space<vmem>>, %arg2: memref<8x128xf32, #tpu.memory_space<vmem>>, %arg3: memref<2x4x128xf32, #tpu.memory_space<vmem>>, %arg4: memref<2x128x384xbf16, #tpu.memory_space<vmem>>, %arg5: memref<2x1x384xf32, #tpu.memory_space<vmem>>, %arg6: memref<2x128x128xbf16, #tpu.memory_space<vmem>>, %arg7: memref<2x1x128xf32, #tpu.memory_space<vmem>>, %arg8: memref<2x128x512xbf16, #tpu.memory_space<vmem>>, %arg9: memref<2x1x512xf32, #tpu.memory_space<vmem>>, %arg10: memref<2x512x128xbf16, #tpu.memory_space<vmem>>, %arg11: memref<2x1x128xf32, #tpu.memory_space<vmem>>, %arg12: memref<2x128xf32, #tpu.memory_space<vmem>>, %arg13: memref<16x128xf32, #tpu.memory_space<vmem>>) attributes {dimension_semantics = [], scalar_prefetch = 0 : i64, scratch_operands = 0 : i64, tpu.core_type = #tpu.core_type<tc>} {
    %c0 = arith.constant 0 : index
    %c0_0 = arith.constant 0 : index
    %0 = vector.load %arg0[%c0, %c0_0] : memref<16x1xi32, #tpu.memory_space<vmem>>, vector<16x1xi32>
    %1 = tpu.iota {dimensions = array<i32: 1>} : vector<16x128xi32>
    %2 = vector.broadcast %0 : vector<16x1xi32> to vector<16x128xi32>
    %3 = arith.cmpi eq, %1, %2 : vector<16x128xi32>
    %cst = arith.constant 1.000000e+00 : f32
    %cst_1 = arith.constant 0.000000e+00 : f32
    %4 = vector.broadcast %cst : f32 to vector<16x128xf32>
    %5 = vector.broadcast %cst_1 : f32 to vector<16x128xf32>
    %6 = arith.select %3, %4, %5 : vector<16x128xi1>, vector<16x128xf32>
    %7 = arith.truncf %6 : vector<16x128xf32> to vector<16x128xbf16>
    %c0_2 = arith.constant 0 : index
    %c0_3 = arith.constant 0 : index
    %8 = vector.load %arg1[%c0_2, %c0_3] : memref<128x128xbf16, #tpu.memory_space<vmem>>, vector<128x128xbf16>
    %cst_4 = arith.constant dense<0.000000e+00> : vector<16x128xf32>
    %9 = tpu.matmul %7, %8, %cst_4 {dimension_numbers = #tpu.dot_dimension_numbers<[1], [0], [0], [1], [0, 0, 1, 1], [], []>} : vector<16x128xbf16>, vector<128x128xbf16>, vector<16x128xf32> -> vector<16x128xf32>
    %c0_5 = arith.constant 0 : index
    %c0_6 = arith.constant 0 : index
    %10 = vector.load %arg2[%c0_5, %c0_6] : memref<8x128xf32, #tpu.memory_space<vmem>>, vector<8x128xf32>
    %11 = tpu.concatenate %10, %10 in 0 : vector<8x128xf32>, vector<8x128xf32> -> vector<16x128xf32>
    %12 = arith.addf %9, %11 : vector<16x128xf32>
    %13 = tpu.iota {dimensions = array<i32: 0>} : vector<8x8xi32>
    %14 = tpu.iota {dimensions = array<i32: 1>} : vector<8x8xi32>
    %15 = arith.cmpi sle, %14, %13 : vector<8x8xi32>
    %cst_7 = arith.constant 0.000000e+00 : f32
    %cst_8 = arith.constant -1.000000e+09 : f32
    %16 = vector.broadcast %cst_7 : f32 to vector<8x8xf32>
    %17 = vector.broadcast %cst_8 : f32 to vector<8x8xf32>
    %18 = arith.select %15, %16, %17 : vector<8x8xi1>, vector<8x8xf32>
    %cst_9 = arith.constant 3.200000e+01 : f32
    %cst_10 = arith.constant -5.000000e-01 : f32
    %19 = math.powf %cst_9, %cst_10 : f32
    %c0_11 = arith.constant 0 : index
    %c0_12 = arith.constant 0 : index
    %c0_13 = arith.constant 0 : index
    %20 = vector.load %arg3[%c0_11, %c0_12, %c0_13] : memref<2x4x128xf32, #tpu.memory_space<vmem>>, vector<1x4x128xf32>
    %21 = vector.shape_cast %20 : vector<1x4x128xf32> to vector<4x128xf32>
    %22 = vector.extract_strided_slice %21 {offsets = [0, 0], sizes = [1, 128], strides = [1, 1]} : vector<4x128xf32> to vector<1x128xf32>
    %23 = vector.extract_strided_slice %21 {offsets = [1, 0], sizes = [1, 128], strides = [1, 1]} : vector<4x128xf32> to vector<1x128xf32>
    %cst_14 = arith.constant dense<0.000000e+00> : vector<16xf32>
    %24 = vector.multi_reduction <add>, %12, %cst_14 [1] : vector<16x128xf32> to vector<16xf32>
    %25 = vector.shape_cast %24 : vector<16xf32> to vector<16x1xf32>
    %cst_15 = arith.constant 1.280000e+02 : f32
    %26 = vector.broadcast %cst_15 : f32 to vector<16x1xf32>
    %27 = arith.divf %25, %26 : vector<16x1xf32>
    %28 = vector.broadcast %27 : vector<16x1xf32> to vector<16x128xf32>
    %29 = arith.subf %12, %28 : vector<16x128xf32>
    %30 = arith.mulf %29, %29 : vector<16x128xf32>
    %cst_16 = arith.constant dense<0.000000e+00> : vector<16xf32>
    %31 = vector.multi_reduction <add>, %30, %cst_16 [1] : vector<16x128xf32> to vector<16xf32>
    %32 = vector.shape_cast %31 : vector<16xf32> to vector<16x1xf32>
    %cst_17 = arith.constant 1.280000e+02 : f32
    %33 = vector.broadcast %cst_17 : f32 to vector<16x1xf32>
    %34 = arith.divf %32, %33 : vector<16x1xf32>
    %cst_18 = arith.constant 9.99999974E-6 : f32
    %35 = vector.broadcast %cst_18 : f32 to vector<16x1xf32>
    %36 = arith.addf %34, %35 : vector<16x1xf32>
    %37 = math.rsqrt %36 : vector<16x1xf32>
    %38 = vector.broadcast %37 : vector<16x1xf32> to vector<16x128xf32>
    %39 = arith.mulf %29, %38 : vector<16x128xf32>
    %40 = vector.broadcast %22 : vector<1x128xf32> to vector<16x128xf32>
    %41 = arith.mulf %39, %40 : vector<16x128xf32>
    %42 = vector.broadcast %23 : vector<1x128xf32> to vector<16x128xf32>
    %43 = arith.addf %41, %42 : vector<16x128xf32>
    %44 = arith.truncf %43 : vector<16x128xf32> to vector<16x128xbf16>
    %c0_19 = arith.constant 0 : index
    %c0_20 = arith.constant 0 : index
    %c0_21 = arith.constant 0 : index
    %45 = vector.load %arg4[%c0_19, %c0_20, %c0_21] : memref<2x128x384xbf16, #tpu.memory_space<vmem>>, vector<1x128x384xbf16>
    %46 = vector.shape_cast %45 : vector<1x128x384xbf16> to vector<128x384xbf16>
    %cst_22 = arith.constant dense<0.000000e+00> : vector<16x384xf32>
    %47 = tpu.matmul %44, %46, %cst_22 {dimension_numbers = #tpu.dot_dimension_numbers<[1], [0], [0], [1], [0, 0, 1, 1], [], []>} : vector<16x128xbf16>, vector<128x384xbf16>, vector<16x384xf32> -> vector<16x384xf32>
    %c0_23 = arith.constant 0 : index
    %c0_24 = arith.constant 0 : index
    %c0_25 = arith.constant 0 : index
    %48 = vector.load %arg5[%c0_23, %c0_24, %c0_25] : memref<2x1x384xf32, #tpu.memory_space<vmem>>, vector<1x1x384xf32>
    %49 = vector.shape_cast %48 : vector<1x1x384xf32> to vector<1x384xf32>
    %50 = vector.broadcast %49 : vector<1x384xf32> to vector<16x384xf32>
    %51 = arith.addf %47, %50 : vector<16x384xf32>
    %52 = vector.extract_strided_slice %51 {offsets = [0, 0], sizes = [16, 128], strides = [1, 1]} : vector<16x384xf32> to vector<16x128xf32>
    %53 = vector.broadcast %19 : f32 to vector<16x128xf32>
    %54 = arith.mulf %52, %53 : vector<16x128xf32>
    %55 = vector.extract_strided_slice %54 {offsets = [0, 0], sizes = [8, 128], strides = [1, 1]} : vector<16x128xf32> to vector<8x128xf32>
    %56 = vector.extract_strided_slice %55 {offsets = [0, 0], sizes = [8, 32], strides = [1, 1]} : vector<8x128xf32> to vector<8x32xf32>
    %57 = vector.extract_strided_slice %55 {offsets = [0, 32], sizes = [8, 32], strides = [1, 1]} : vector<8x128xf32> to vector<8x32xf32>
    %58 = vector.extract_strided_slice %55 {offsets = [0, 64], sizes = [8, 32], strides = [1, 1]} : vector<8x128xf32> to vector<8x32xf32>
    %59 = vector.extract_strided_slice %55 {offsets = [0, 96], sizes = [8, 32], strides = [1, 1]} : vector<8x128xf32> to vector<8x32xf32>
    %60 = vector.extract_strided_slice %54 {offsets = [8, 0], sizes = [8, 128], strides = [1, 1]} : vector<16x128xf32> to vector<8x128xf32>
    %61 = vector.extract_strided_slice %60 {offsets = [0, 0], sizes = [8, 32], strides = [1, 1]} : vector<8x128xf32> to vector<8x32xf32>
    %62 = vector.extract_strided_slice %60 {offsets = [0, 32], sizes = [8, 32], strides = [1, 1]} : vector<8x128xf32> to vector<8x32xf32>
    %63 = vector.extract_strided_slice %60 {offsets = [0, 64], sizes = [8, 32], strides = [1, 1]} : vector<8x128xf32> to vector<8x32xf32>
    %64 = vector.extract_strided_slice %60 {offsets = [0, 96], sizes = [8, 32], strides = [1, 1]} : vector<8x128xf32> to vector<8x32xf32>
    %65 = vector.shape_cast %56 : vector<8x32xf32> to vector<1x8x32xf32>
    %66 = vector.shape_cast %57 : vector<8x32xf32> to vector<1x8x32xf32>
    %67 = vector.shape_cast %58 : vector<8x32xf32> to vector<1x8x32xf32>
    %68 = vector.shape_cast %59 : vector<8x32xf32> to vector<1x8x32xf32>
    %69 = vector.shape_cast %61 : vector<8x32xf32> to vector<1x8x32xf32>
    %70 = vector.shape_cast %62 : vector<8x32xf32> to vector<1x8x32xf32>
    %71 = vector.shape_cast %63 : vector<8x32xf32> to vector<1x8x32xf32>
    %72 = vector.shape_cast %64 : vector<8x32xf32> to vector<1x8x32xf32>
    %73 = tpu.concatenate %65, %66, %67, %68, %69, %70, %71, %72 in 0 : vector<1x8x32xf32>, vector<1x8x32xf32>, vector<1x8x32xf32>, vector<1x8x32xf32>, vector<1x8x32xf32>, vector<1x8x32xf32>, vector<1x8x32xf32>, vector<1x8x32xf32> -> vector<8x8x32xf32>
    %74 = arith.truncf %73 : vector<8x8x32xf32> to vector<8x8x32xbf16>
    %75 = vector.extract_strided_slice %51 {offsets = [0, 128], sizes = [16, 128], strides = [1, 1]} : vector<16x384xf32> to vector<16x128xf32>
    %76 = vector.extract_strided_slice %75 {offsets = [0, 0], sizes = [8, 128], strides = [1, 1]} : vector<16x128xf32> to vector<8x128xf32>
    %77 = vector.extract_strided_slice %76 {offsets = [0, 0], sizes = [8, 32], strides = [1, 1]} : vector<8x128xf32> to vector<8x32xf32>
    %78 = vector.extract_strided_slice %76 {offsets = [0, 32], sizes = [8, 32], strides = [1, 1]} : vector<8x128xf32> to vector<8x32xf32>
    %79 = vector.extract_strided_slice %76 {offsets = [0, 64], sizes = [8, 32], strides = [1, 1]} : vector<8x128xf32> to vector<8x32xf32>
    %80 = vector.extract_strided_slice %76 {offsets = [0, 96], sizes = [8, 32], strides = [1, 1]} : vector<8x128xf32> to vector<8x32xf32>
    %81 = vector.extract_strided_slice %75 {offsets = [8, 0], sizes = [8, 128], strides = [1, 1]} : vector<16x128xf32> to vector<8x128xf32>
    %82 = vector.extract_strided_slice %81 {offsets = [0, 0], sizes = [8, 32], strides = [1, 1]} : vector<8x128xf32> to vector<8x32xf32>
    %83 = vector.extract_strided_slice %81 {offsets = [0, 32], sizes = [8, 32], strides = [1, 1]} : vector<8x128xf32> to vector<8x32xf32>
    %84 = vector.extract_strided_slice %81 {offsets = [0, 64], sizes = [8, 32], strides = [1, 1]} : vector<8x128xf32> to vector<8x32xf32>
    %85 = vector.extract_strided_slice %81 {offsets = [0, 96], sizes = [8, 32], strides = [1, 1]} : vector<8x128xf32> to vector<8x32xf32>
    %86 = vector.shape_cast %77 : vector<8x32xf32> to vector<1x8x32xf32>
    %87 = vector.shape_cast %78 : vector<8x32xf32> to vector<1x8x32xf32>
    %88 = vector.shape_cast %79 : vector<8x32xf32> to vector<1x8x32xf32>
    %89 = vector.shape_cast %80 : vector<8x32xf32> to vector<1x8x32xf32>
    %90 = vector.shape_cast %82 : vector<8x32xf32> to vector<1x8x32xf32>
    %91 = vector.shape_cast %83 : vector<8x32xf32> to vector<1x8x32xf32>
    %92 = vector.shape_cast %84 : vector<8x32xf32> to vector<1x8x32xf32>
    %93 = vector.shape_cast %85 : vector<8x32xf32> to vector<1x8x32xf32>
    %94 = tpu.concatenate %86, %87, %88, %89, %90, %91, %92, %93 in 0 : vector<1x8x32xf32>, vector<1x8x32xf32>, vector<1x8x32xf32>, vector<1x8x32xf32>, vector<1x8x32xf32>, vector<1x8x32xf32>, vector<1x8x32xf32>, vector<1x8x32xf32> -> vector<8x8x32xf32>
    %95 = arith.truncf %94 : vector<8x8x32xf32> to vector<8x8x32xbf16>
    %96 = vector.extract_strided_slice %51 {offsets = [0, 256], sizes = [16, 128], strides = [1, 1]} : vector<16x384xf32> to vector<16x128xf32>
    %97 = vector.extract_strided_slice %96 {offsets = [0, 0], sizes = [8, 128], strides = [1, 1]} : vector<16x128xf32> to vector<8x128xf32>
    %98 = vector.extract_strided_slice %97 {offsets = [0, 0], sizes = [8, 32], strides = [1, 1]} : vector<8x128xf32> to vector<8x32xf32>
    %99 = vector.extract_strided_slice %97 {offsets = [0, 32], sizes = [8, 32], strides = [1, 1]} : vector<8x128xf32> to vector<8x32xf32>
    %100 = vector.extract_strided_slice %97 {offsets = [0, 64], sizes = [8, 32], strides = [1, 1]} : vector<8x128xf32> to vector<8x32xf32>
    %101 = vector.extract_strided_slice %97 {offsets = [0, 96], sizes = [8, 32], strides = [1, 1]} : vector<8x128xf32> to vector<8x32xf32>
    %102 = vector.extract_strided_slice %96 {offsets = [8, 0], sizes = [8, 128], strides = [1, 1]} : vector<16x128xf32> to vector<8x128xf32>
    %103 = vector.extract_strided_slice %102 {offsets = [0, 0], sizes = [8, 32], strides = [1, 1]} : vector<8x128xf32> to vector<8x32xf32>
    %104 = vector.extract_strided_slice %102 {offsets = [0, 32], sizes = [8, 32], strides = [1, 1]} : vector<8x128xf32> to vector<8x32xf32>
    %105 = vector.extract_strided_slice %102 {offsets = [0, 64], sizes = [8, 32], strides = [1, 1]} : vector<8x128xf32> to vector<8x32xf32>
    %106 = vector.extract_strided_slice %102 {offsets = [0, 96], sizes = [8, 32], strides = [1, 1]} : vector<8x128xf32> to vector<8x32xf32>
    %107 = vector.shape_cast %98 : vector<8x32xf32> to vector<1x8x32xf32>
    %108 = vector.shape_cast %99 : vector<8x32xf32> to vector<1x8x32xf32>
    %109 = vector.shape_cast %100 : vector<8x32xf32> to vector<1x8x32xf32>
    %110 = vector.shape_cast %101 : vector<8x32xf32> to vector<1x8x32xf32>
    %111 = vector.shape_cast %103 : vector<8x32xf32> to vector<1x8x32xf32>
    %112 = vector.shape_cast %104 : vector<8x32xf32> to vector<1x8x32xf32>
    %113 = vector.shape_cast %105 : vector<8x32xf32> to vector<1x8x32xf32>
    %114 = vector.shape_cast %106 : vector<8x32xf32> to vector<1x8x32xf32>
    %115 = tpu.concatenate %107, %108, %109, %110, %111, %112, %113, %114 in 0 : vector<1x8x32xf32>, vector<1x8x32xf32>, vector<1x8x32xf32>, vector<1x8x32xf32>, vector<1x8x32xf32>, vector<1x8x32xf32>, vector<1x8x32xf32>, vector<1x8x32xf32> -> vector<8x8x32xf32>
    %116 = arith.truncf %115 : vector<8x8x32xf32> to vector<8x8x32xbf16>
    "tpu.trace_start"() <{level = 10 : i32, message = "gqd,gkd->gqk"}> : () -> ()
    %cst_26 = arith.constant dense<0.000000e+00> : vector<8x8x8xf32>
    %117 = tpu.matmul %74, %95, %cst_26 {dimension_numbers = #tpu.dot_dimension_numbers<[2], [2], [1], [1], [0, 0, 0, 1, 1, 1], [0], [0]>} : vector<8x8x32xbf16>, vector<8x8x32xbf16>, vector<8x8x8xf32> -> vector<8x8x8xf32>
    "tpu.trace_stop"() : () -> ()
    %118 = vector.shape_cast %18 : vector<8x8xf32> to vector<1x8x8xf32>
    %119 = vector.broadcast %118 : vector<1x8x8xf32> to vector<8x8x8xf32>
    %120 = arith.addf %117, %119 : vector<8x8x8xf32>
    %cst_27 = arith.constant dense<0xFF800000> : vector<8x8xf32>
    %121 = vector.multi_reduction <maximumf>, %120, %cst_27 [2] : vector<8x8x8xf32> to vector<8x8xf32>
    %122 = vector.shape_cast %121 : vector<8x8xf32> to vector<8x8x1xf32>
    %123 = vector.broadcast %122 : vector<8x8x1xf32> to vector<8x8x8xf32>
    %124 = arith.subf %120, %123 : vector<8x8x8xf32>
    %125 = math.exp %124 : vector<8x8x8xf32>
    %cst_28 = arith.constant dense<0.000000e+00> : vector<8x8xf32>
    %126 = vector.multi_reduction <add>, %125, %cst_28 [2] : vector<8x8x8xf32> to vector<8x8xf32>
    %127 = vector.shape_cast %126 : vector<8x8xf32> to vector<8x8x1xf32>
    %128 = tpu.reciprocal %127 {approx = true} : vector<8x8x1xf32> -> vector<8x8x1xf32>
    %129 = vector.broadcast %128 : vector<8x8x1xf32> to vector<8x8x8xf32>
    %130 = arith.mulf %125, %129 : vector<8x8x8xf32>
    %131 = arith.truncf %130 : vector<8x8x8xf32> to vector<8x8x8xbf16>
    "tpu.trace_start"() <{level = 10 : i32, message = "gqk,gkd->gqd"}> : () -> ()
    %cst_29 = arith.constant dense<0.000000e+00> : vector<8x8x32xf32>
    %132 = tpu.matmul %131, %116, %cst_29 {dimension_numbers = #tpu.dot_dimension_numbers<[2], [1], [1], [2], [0, 0, 0, 1, 1, 2], [0], [0]>} : vector<8x8x8xbf16>, vector<8x8x32xbf16>, vector<8x8x32xf32> -> vector<8x8x32xf32>
    "tpu.trace_stop"() : () -> ()
    %133 = vector.extract_strided_slice %132 {offsets = [0, 0, 0], sizes = [1, 8, 32], strides = [1, 1, 1]} : vector<8x8x32xf32> to vector<1x8x32xf32>
    %134 = vector.shape_cast %133 : vector<1x8x32xf32> to vector<8x32xf32>
    %135 = vector.extract_strided_slice %132 {offsets = [1, 0, 0], sizes = [1, 8, 32], strides = [1, 1, 1]} : vector<8x8x32xf32> to vector<1x8x32xf32>
    %136 = vector.shape_cast %135 : vector<1x8x32xf32> to vector<8x32xf32>
    %137 = vector.extract_strided_slice %132 {offsets = [2, 0, 0], sizes = [1, 8, 32], strides = [1, 1, 1]} : vector<8x8x32xf32> to vector<1x8x32xf32>
    %138 = vector.shape_cast %137 : vector<1x8x32xf32> to vector<8x32xf32>
    %139 = vector.extract_strided_slice %132 {offsets = [3, 0, 0], sizes = [1, 8, 32], strides = [1, 1, 1]} : vector<8x8x32xf32> to vector<1x8x32xf32>
    %140 = vector.shape_cast %139 : vector<1x8x32xf32> to vector<8x32xf32>
    %141 = tpu.concatenate %134, %136, %138, %140 in 1 : vector<8x32xf32>, vector<8x32xf32>, vector<8x32xf32>, vector<8x32xf32> -> vector<8x128xf32>
    %142 = vector.extract_strided_slice %132 {offsets = [4, 0, 0], sizes = [1, 8, 32], strides = [1, 1, 1]} : vector<8x8x32xf32> to vector<1x8x32xf32>
    %143 = vector.shape_cast %142 : vector<1x8x32xf32> to vector<8x32xf32>
    %144 = vector.extract_strided_slice %132 {offsets = [5, 0, 0], sizes = [1, 8, 32], strides = [1, 1, 1]} : vector<8x8x32xf32> to vector<1x8x32xf32>
    %145 = vector.shape_cast %144 : vector<1x8x32xf32> to vector<8x32xf32>
    %146 = vector.extract_strided_slice %132 {offsets = [6, 0, 0], sizes = [1, 8, 32], strides = [1, 1, 1]} : vector<8x8x32xf32> to vector<1x8x32xf32>
    %147 = vector.shape_cast %146 : vector<1x8x32xf32> to vector<8x32xf32>
    %148 = vector.extract_strided_slice %132 {offsets = [7, 0, 0], sizes = [1, 8, 32], strides = [1, 1, 1]} : vector<8x8x32xf32> to vector<1x8x32xf32>
    %149 = vector.shape_cast %148 : vector<1x8x32xf32> to vector<8x32xf32>
    %150 = tpu.concatenate %143, %145, %147, %149 in 1 : vector<8x32xf32>, vector<8x32xf32>, vector<8x32xf32>, vector<8x32xf32> -> vector<8x128xf32>
    %151 = tpu.concatenate %141, %150 in 0 : vector<8x128xf32>, vector<8x128xf32> -> vector<16x128xf32>
    %152 = arith.truncf %151 : vector<16x128xf32> to vector<16x128xbf16>
    %c0_30 = arith.constant 0 : index
    %c0_31 = arith.constant 0 : index
    %c0_32 = arith.constant 0 : index
    %153 = vector.load %arg6[%c0_30, %c0_31, %c0_32] : memref<2x128x128xbf16, #tpu.memory_space<vmem>>, vector<1x128x128xbf16>
    %154 = vector.shape_cast %153 : vector<1x128x128xbf16> to vector<128x128xbf16>
    %cst_33 = arith.constant dense<0.000000e+00> : vector<16x128xf32>
    %155 = tpu.matmul %152, %154, %cst_33 {dimension_numbers = #tpu.dot_dimension_numbers<[1], [0], [0], [1], [0, 0, 1, 1], [], []>} : vector<16x128xbf16>, vector<128x128xbf16>, vector<16x128xf32> -> vector<16x128xf32>
    %c0_34 = arith.constant 0 : index
    %c0_35 = arith.constant 0 : index
    %c0_36 = arith.constant 0 : index
    %156 = vector.load %arg7[%c0_34, %c0_35, %c0_36] : memref<2x1x128xf32, #tpu.memory_space<vmem>>, vector<1x1x128xf32>
    %157 = vector.shape_cast %156 : vector<1x1x128xf32> to vector<1x128xf32>
    %158 = vector.broadcast %157 : vector<1x128xf32> to vector<16x128xf32>
    %159 = arith.addf %155, %158 : vector<16x128xf32>
    %160 = arith.addf %12, %159 : vector<16x128xf32>
    %161 = vector.extract_strided_slice %21 {offsets = [2, 0], sizes = [1, 128], strides = [1, 1]} : vector<4x128xf32> to vector<1x128xf32>
    %162 = vector.extract_strided_slice %21 {offsets = [3, 0], sizes = [1, 128], strides = [1, 1]} : vector<4x128xf32> to vector<1x128xf32>
    %cst_37 = arith.constant dense<0.000000e+00> : vector<16xf32>
    %163 = vector.multi_reduction <add>, %160, %cst_37 [1] : vector<16x128xf32> to vector<16xf32>
    %164 = vector.shape_cast %163 : vector<16xf32> to vector<16x1xf32>
    %cst_38 = arith.constant 1.280000e+02 : f32
    %165 = vector.broadcast %cst_38 : f32 to vector<16x1xf32>
    %166 = arith.divf %164, %165 : vector<16x1xf32>
    %167 = vector.broadcast %166 : vector<16x1xf32> to vector<16x128xf32>
    %168 = arith.subf %160, %167 : vector<16x128xf32>
    %169 = arith.mulf %168, %168 : vector<16x128xf32>
    %cst_39 = arith.constant dense<0.000000e+00> : vector<16xf32>
    %170 = vector.multi_reduction <add>, %169, %cst_39 [1] : vector<16x128xf32> to vector<16xf32>
    %171 = vector.shape_cast %170 : vector<16xf32> to vector<16x1xf32>
    %cst_40 = arith.constant 1.280000e+02 : f32
    %172 = vector.broadcast %cst_40 : f32 to vector<16x1xf32>
    %173 = arith.divf %171, %172 : vector<16x1xf32>
    %cst_41 = arith.constant 9.99999974E-6 : f32
    %174 = vector.broadcast %cst_41 : f32 to vector<16x1xf32>
    %175 = arith.addf %173, %174 : vector<16x1xf32>
    %176 = math.rsqrt %175 : vector<16x1xf32>
    %177 = vector.broadcast %176 : vector<16x1xf32> to vector<16x128xf32>
    %178 = arith.mulf %168, %177 : vector<16x128xf32>
    %179 = vector.broadcast %161 : vector<1x128xf32> to vector<16x128xf32>
    %180 = arith.mulf %178, %179 : vector<16x128xf32>
    %181 = vector.broadcast %162 : vector<1x128xf32> to vector<16x128xf32>
    %182 = arith.addf %180, %181 : vector<16x128xf32>
    %183 = arith.truncf %182 : vector<16x128xf32> to vector<16x128xbf16>
    %c0_42 = arith.constant 0 : index
    %c0_43 = arith.constant 0 : index
    %c0_44 = arith.constant 0 : index
    %184 = vector.load %arg8[%c0_42, %c0_43, %c0_44] : memref<2x128x512xbf16, #tpu.memory_space<vmem>>, vector<1x128x512xbf16>
    %185 = vector.shape_cast %184 : vector<1x128x512xbf16> to vector<128x512xbf16>
    %cst_45 = arith.constant dense<0.000000e+00> : vector<16x512xf32>
    %186 = tpu.matmul %183, %185, %cst_45 {dimension_numbers = #tpu.dot_dimension_numbers<[1], [0], [0], [1], [0, 0, 1, 1], [], []>} : vector<16x128xbf16>, vector<128x512xbf16>, vector<16x512xf32> -> vector<16x512xf32>
    %c0_46 = arith.constant 0 : index
    %c0_47 = arith.constant 0 : index
    %c0_48 = arith.constant 0 : index
    %187 = vector.load %arg9[%c0_46, %c0_47, %c0_48] : memref<2x1x512xf32, #tpu.memory_space<vmem>>, vector<1x1x512xf32>
    %188 = vector.shape_cast %187 : vector<1x1x512xf32> to vector<1x512xf32>
    %189 = vector.broadcast %188 : vector<1x512xf32> to vector<16x512xf32>
    %190 = arith.addf %186, %189 : vector<16x512xf32>
    %cst_49 = arith.constant 1.702000e+00 : f32
    %191 = vector.broadcast %cst_49 : f32 to vector<16x512xf32>
    %192 = arith.mulf %191, %190 : vector<16x512xf32>
    %193 = arith.negf %192 : vector<16x512xf32>
    %194 = math.exp %193 : vector<16x512xf32>
    %cst_50 = arith.constant 1.000000e+00 : f32
    %195 = vector.broadcast %cst_50 : f32 to vector<16x512xf32>
    %196 = arith.addf %195, %194 : vector<16x512xf32>
    %197 = arith.divf %195, %196 : vector<16x512xf32>
    %198 = arith.mulf %190, %197 : vector<16x512xf32>
    %199 = arith.truncf %198 : vector<16x512xf32> to vector<16x512xbf16>
    %c0_51 = arith.constant 0 : index
    %c0_52 = arith.constant 0 : index
    %c0_53 = arith.constant 0 : index
    %200 = vector.load %arg10[%c0_51, %c0_52, %c0_53] : memref<2x512x128xbf16, #tpu.memory_space<vmem>>, vector<1x512x128xbf16>
    %201 = vector.shape_cast %200 : vector<1x512x128xbf16> to vector<512x128xbf16>
    %cst_54 = arith.constant dense<0.000000e+00> : vector<16x128xf32>
    %202 = tpu.matmul %199, %201, %cst_54 {dimension_numbers = #tpu.dot_dimension_numbers<[1], [0], [0], [1], [0, 0, 1, 1], [], []>} : vector<16x512xbf16>, vector<512x128xbf16>, vector<16x128xf32> -> vector<16x128xf32>
    %c0_55 = arith.constant 0 : index
    %c0_56 = arith.constant 0 : index
    %c0_57 = arith.constant 0 : index
    %203 = vector.load %arg11[%c0_55, %c0_56, %c0_57] : memref<2x1x128xf32, #tpu.memory_space<vmem>>, vector<1x1x128xf32>
    %204 = vector.shape_cast %203 : vector<1x1x128xf32> to vector<1x128xf32>
    %205 = vector.broadcast %204 : vector<1x128xf32> to vector<16x128xf32>
    %206 = arith.addf %202, %205 : vector<16x128xf32>
    %207 = arith.addf %160, %206 : vector<16x128xf32>
    %c1 = arith.constant 1 : index
    %c0_58 = arith.constant 0 : index
    %c0_59 = arith.constant 0 : index
    %208 = vector.load %arg3[%c1, %c0_58, %c0_59] : memref<2x4x128xf32, #tpu.memory_space<vmem>>, vector<1x4x128xf32>
    %209 = vector.shape_cast %208 : vector<1x4x128xf32> to vector<4x128xf32>
    %210 = vector.extract_strided_slice %209 {offsets = [0, 0], sizes = [1, 128], strides = [1, 1]} : vector<4x128xf32> to vector<1x128xf32>
    %211 = vector.extract_strided_slice %209 {offsets = [1, 0], sizes = [1, 128], strides = [1, 1]} : vector<4x128xf32> to vector<1x128xf32>
    %cst_60 = arith.constant dense<0.000000e+00> : vector<16xf32>
    %212 = vector.multi_reduction <add>, %207, %cst_60 [1] : vector<16x128xf32> to vector<16xf32>
    %213 = vector.shape_cast %212 : vector<16xf32> to vector<16x1xf32>
    %cst_61 = arith.constant 1.280000e+02 : f32
    %214 = vector.broadcast %cst_61 : f32 to vector<16x1xf32>
    %215 = arith.divf %213, %214 : vector<16x1xf32>
    %216 = vector.broadcast %215 : vector<16x1xf32> to vector<16x128xf32>
    %217 = arith.subf %207, %216 : vector<16x128xf32>
    %218 = arith.mulf %217, %217 : vector<16x128xf32>
    %cst_62 = arith.constant dense<0.000000e+00> : vector<16xf32>
    %219 = vector.multi_reduction <add>, %218, %cst_62 [1] : vector<16x128xf32> to vector<16xf32>
    %220 = vector.shape_cast %219 : vector<16xf32> to vector<16x1xf32>
    %cst_63 = arith.constant 1.280000e+02 : f32
    %221 = vector.broadcast %cst_63 : f32 to vector<16x1xf32>
    %222 = arith.divf %220, %221 : vector<16x1xf32>
    %cst_64 = arith.constant 9.99999974E-6 : f32
    %223 = vector.broadcast %cst_64 : f32 to vector<16x1xf32>
    %224 = arith.addf %222, %223 : vector<16x1xf32>
    %225 = math.rsqrt %224 : vector<16x1xf32>
    %226 = vector.broadcast %225 : vector<16x1xf32> to vector<16x128xf32>
    %227 = arith.mulf %217, %226 : vector<16x128xf32>
    %228 = vector.broadcast %210 : vector<1x128xf32> to vector<16x128xf32>
    %229 = arith.mulf %227, %228 : vector<16x128xf32>
    %230 = vector.broadcast %211 : vector<1x128xf32> to vector<16x128xf32>
    %231 = arith.addf %229, %230 : vector<16x128xf32>
    %232 = arith.truncf %231 : vector<16x128xf32> to vector<16x128xbf16>
    %c1_65 = arith.constant 1 : index
    %c0_66 = arith.constant 0 : index
    %c0_67 = arith.constant 0 : index
    %233 = vector.load %arg4[%c1_65, %c0_66, %c0_67] : memref<2x128x384xbf16, #tpu.memory_space<vmem>>, vector<1x128x384xbf16>
    %234 = vector.shape_cast %233 : vector<1x128x384xbf16> to vector<128x384xbf16>
    %cst_68 = arith.constant dense<0.000000e+00> : vector<16x384xf32>
    %235 = tpu.matmul %232, %234, %cst_68 {dimension_numbers = #tpu.dot_dimension_numbers<[1], [0], [0], [1], [0, 0, 1, 1], [], []>} : vector<16x128xbf16>, vector<128x384xbf16>, vector<16x384xf32> -> vector<16x384xf32>
    %c1_69 = arith.constant 1 : index
    %c0_70 = arith.constant 0 : index
    %c0_71 = arith.constant 0 : index
    %236 = vector.load %arg5[%c1_69, %c0_70, %c0_71] : memref<2x1x384xf32, #tpu.memory_space<vmem>>, vector<1x1x384xf32>
    %237 = vector.shape_cast %236 : vector<1x1x384xf32> to vector<1x384xf32>
    %238 = vector.broadcast %237 : vector<1x384xf32> to vector<16x384xf32>
    %239 = arith.addf %235, %238 : vector<16x384xf32>
    %240 = vector.extract_strided_slice %239 {offsets = [0, 0], sizes = [16, 128], strides = [1, 1]} : vector<16x384xf32> to vector<16x128xf32>
    %241 = vector.broadcast %19 : f32 to vector<16x128xf32>
    %242 = arith.mulf %240, %241 : vector<16x128xf32>
    %243 = vector.extract_strided_slice %242 {offsets = [0, 0], sizes = [8, 128], strides = [1, 1]} : vector<16x128xf32> to vector<8x128xf32>
    %244 = vector.extract_strided_slice %243 {offsets = [0, 0], sizes = [8, 32], strides = [1, 1]} : vector<8x128xf32> to vector<8x32xf32>
    %245 = vector.extract_strided_slice %243 {offsets = [0, 32], sizes = [8, 32], strides = [1, 1]} : vector<8x128xf32> to vector<8x32xf32>
    %246 = vector.extract_strided_slice %243 {offsets = [0, 64], sizes = [8, 32], strides = [1, 1]} : vector<8x128xf32> to vector<8x32xf32>
    %247 = vector.extract_strided_slice %243 {offsets = [0, 96], sizes = [8, 32], strides = [1, 1]} : vector<8x128xf32> to vector<8x32xf32>
    %248 = vector.extract_strided_slice %242 {offsets = [8, 0], sizes = [8, 128], strides = [1, 1]} : vector<16x128xf32> to vector<8x128xf32>
    %249 = vector.extract_strided_slice %248 {offsets = [0, 0], sizes = [8, 32], strides = [1, 1]} : vector<8x128xf32> to vector<8x32xf32>
    %250 = vector.extract_strided_slice %248 {offsets = [0, 32], sizes = [8, 32], strides = [1, 1]} : vector<8x128xf32> to vector<8x32xf32>
    %251 = vector.extract_strided_slice %248 {offsets = [0, 64], sizes = [8, 32], strides = [1, 1]} : vector<8x128xf32> to vector<8x32xf32>
    %252 = vector.extract_strided_slice %248 {offsets = [0, 96], sizes = [8, 32], strides = [1, 1]} : vector<8x128xf32> to vector<8x32xf32>
    %253 = vector.shape_cast %244 : vector<8x32xf32> to vector<1x8x32xf32>
    %254 = vector.shape_cast %245 : vector<8x32xf32> to vector<1x8x32xf32>
    %255 = vector.shape_cast %246 : vector<8x32xf32> to vector<1x8x32xf32>
    %256 = vector.shape_cast %247 : vector<8x32xf32> to vector<1x8x32xf32>
    %257 = vector.shape_cast %249 : vector<8x32xf32> to vector<1x8x32xf32>
    %258 = vector.shape_cast %250 : vector<8x32xf32> to vector<1x8x32xf32>
    %259 = vector.shape_cast %251 : vector<8x32xf32> to vector<1x8x32xf32>
    %260 = vector.shape_cast %252 : vector<8x32xf32> to vector<1x8x32xf32>
    %261 = tpu.concatenate %253, %254, %255, %256, %257, %258, %259, %260 in 0 : vector<1x8x32xf32>, vector<1x8x32xf32>, vector<1x8x32xf32>, vector<1x8x32xf32>, vector<1x8x32xf32>, vector<1x8x32xf32>, vector<1x8x32xf32>, vector<1x8x32xf32> -> vector<8x8x32xf32>
    %262 = arith.truncf %261 : vector<8x8x32xf32> to vector<8x8x32xbf16>
    %263 = vector.extract_strided_slice %239 {offsets = [0, 128], sizes = [16, 128], strides = [1, 1]} : vector<16x384xf32> to vector<16x128xf32>
    %264 = vector.extract_strided_slice %263 {offsets = [0, 0], sizes = [8, 128], strides = [1, 1]} : vector<16x128xf32> to vector<8x128xf32>
    %265 = vector.extract_strided_slice %264 {offsets = [0, 0], sizes = [8, 32], strides = [1, 1]} : vector<8x128xf32> to vector<8x32xf32>
    %266 = vector.extract_strided_slice %264 {offsets = [0, 32], sizes = [8, 32], strides = [1, 1]} : vector<8x128xf32> to vector<8x32xf32>
    %267 = vector.extract_strided_slice %264 {offsets = [0, 64], sizes = [8, 32], strides = [1, 1]} : vector<8x128xf32> to vector<8x32xf32>
    %268 = vector.extract_strided_slice %264 {offsets = [0, 96], sizes = [8, 32], strides = [1, 1]} : vector<8x128xf32> to vector<8x32xf32>
    %269 = vector.extract_strided_slice %263 {offsets = [8, 0], sizes = [8, 128], strides = [1, 1]} : vector<16x128xf32> to vector<8x128xf32>
    %270 = vector.extract_strided_slice %269 {offsets = [0, 0], sizes = [8, 32], strides = [1, 1]} : vector<8x128xf32> to vector<8x32xf32>
    %271 = vector.extract_strided_slice %269 {offsets = [0, 32], sizes = [8, 32], strides = [1, 1]} : vector<8x128xf32> to vector<8x32xf32>
    %272 = vector.extract_strided_slice %269 {offsets = [0, 64], sizes = [8, 32], strides = [1, 1]} : vector<8x128xf32> to vector<8x32xf32>
    %273 = vector.extract_strided_slice %269 {offsets = [0, 96], sizes = [8, 32], strides = [1, 1]} : vector<8x128xf32> to vector<8x32xf32>
    %274 = vector.shape_cast %265 : vector<8x32xf32> to vector<1x8x32xf32>
    %275 = vector.shape_cast %266 : vector<8x32xf32> to vector<1x8x32xf32>
    %276 = vector.shape_cast %267 : vector<8x32xf32> to vector<1x8x32xf32>
    %277 = vector.shape_cast %268 : vector<8x32xf32> to vector<1x8x32xf32>
    %278 = vector.shape_cast %270 : vector<8x32xf32> to vector<1x8x32xf32>
    %279 = vector.shape_cast %271 : vector<8x32xf32> to vector<1x8x32xf32>
    %280 = vector.shape_cast %272 : vector<8x32xf32> to vector<1x8x32xf32>
    %281 = vector.shape_cast %273 : vector<8x32xf32> to vector<1x8x32xf32>
    %282 = tpu.concatenate %274, %275, %276, %277, %278, %279, %280, %281 in 0 : vector<1x8x32xf32>, vector<1x8x32xf32>, vector<1x8x32xf32>, vector<1x8x32xf32>, vector<1x8x32xf32>, vector<1x8x32xf32>, vector<1x8x32xf32>, vector<1x8x32xf32> -> vector<8x8x32xf32>
    %283 = arith.truncf %282 : vector<8x8x32xf32> to vector<8x8x32xbf16>
    %284 = vector.extract_strided_slice %239 {offsets = [0, 256], sizes = [16, 128], strides = [1, 1]} : vector<16x384xf32> to vector<16x128xf32>
    %285 = vector.extract_strided_slice %284 {offsets = [0, 0], sizes = [8, 128], strides = [1, 1]} : vector<16x128xf32> to vector<8x128xf32>
    %286 = vector.extract_strided_slice %285 {offsets = [0, 0], sizes = [8, 32], strides = [1, 1]} : vector<8x128xf32> to vector<8x32xf32>
    %287 = vector.extract_strided_slice %285 {offsets = [0, 32], sizes = [8, 32], strides = [1, 1]} : vector<8x128xf32> to vector<8x32xf32>
    %288 = vector.extract_strided_slice %285 {offsets = [0, 64], sizes = [8, 32], strides = [1, 1]} : vector<8x128xf32> to vector<8x32xf32>
    %289 = vector.extract_strided_slice %285 {offsets = [0, 96], sizes = [8, 32], strides = [1, 1]} : vector<8x128xf32> to vector<8x32xf32>
    %290 = vector.extract_strided_slice %284 {offsets = [8, 0], sizes = [8, 128], strides = [1, 1]} : vector<16x128xf32> to vector<8x128xf32>
    %291 = vector.extract_strided_slice %290 {offsets = [0, 0], sizes = [8, 32], strides = [1, 1]} : vector<8x128xf32> to vector<8x32xf32>
    %292 = vector.extract_strided_slice %290 {offsets = [0, 32], sizes = [8, 32], strides = [1, 1]} : vector<8x128xf32> to vector<8x32xf32>
    %293 = vector.extract_strided_slice %290 {offsets = [0, 64], sizes = [8, 32], strides = [1, 1]} : vector<8x128xf32> to vector<8x32xf32>
    %294 = vector.extract_strided_slice %290 {offsets = [0, 96], sizes = [8, 32], strides = [1, 1]} : vector<8x128xf32> to vector<8x32xf32>
    %295 = vector.shape_cast %286 : vector<8x32xf32> to vector<1x8x32xf32>
    %296 = vector.shape_cast %287 : vector<8x32xf32> to vector<1x8x32xf32>
    %297 = vector.shape_cast %288 : vector<8x32xf32> to vector<1x8x32xf32>
    %298 = vector.shape_cast %289 : vector<8x32xf32> to vector<1x8x32xf32>
    %299 = vector.shape_cast %291 : vector<8x32xf32> to vector<1x8x32xf32>
    %300 = vector.shape_cast %292 : vector<8x32xf32> to vector<1x8x32xf32>
    %301 = vector.shape_cast %293 : vector<8x32xf32> to vector<1x8x32xf32>
    %302 = vector.shape_cast %294 : vector<8x32xf32> to vector<1x8x32xf32>
    %303 = tpu.concatenate %295, %296, %297, %298, %299, %300, %301, %302 in 0 : vector<1x8x32xf32>, vector<1x8x32xf32>, vector<1x8x32xf32>, vector<1x8x32xf32>, vector<1x8x32xf32>, vector<1x8x32xf32>, vector<1x8x32xf32>, vector<1x8x32xf32> -> vector<8x8x32xf32>
    %304 = arith.truncf %303 : vector<8x8x32xf32> to vector<8x8x32xbf16>
    "tpu.trace_start"() <{level = 10 : i32, message = "gqd,gkd->gqk"}> : () -> ()
    %cst_72 = arith.constant dense<0.000000e+00> : vector<8x8x8xf32>
    %305 = tpu.matmul %262, %283, %cst_72 {dimension_numbers = #tpu.dot_dimension_numbers<[2], [2], [1], [1], [0, 0, 0, 1, 1, 1], [0], [0]>} : vector<8x8x32xbf16>, vector<8x8x32xbf16>, vector<8x8x8xf32> -> vector<8x8x8xf32>
    "tpu.trace_stop"() : () -> ()
    %306 = vector.shape_cast %18 : vector<8x8xf32> to vector<1x8x8xf32>
    %307 = vector.broadcast %306 : vector<1x8x8xf32> to vector<8x8x8xf32>
    %308 = arith.addf %305, %307 : vector<8x8x8xf32>
    %cst_73 = arith.constant dense<0xFF800000> : vector<8x8xf32>
    %309 = vector.multi_reduction <maximumf>, %308, %cst_73 [2] : vector<8x8x8xf32> to vector<8x8xf32>
    %310 = vector.shape_cast %309 : vector<8x8xf32> to vector<8x8x1xf32>
    %311 = vector.broadcast %310 : vector<8x8x1xf32> to vector<8x8x8xf32>
    %312 = arith.subf %308, %311 : vector<8x8x8xf32>
    %313 = math.exp %312 : vector<8x8x8xf32>
    %cst_74 = arith.constant dense<0.000000e+00> : vector<8x8xf32>
    %314 = vector.multi_reduction <add>, %313, %cst_74 [2] : vector<8x8x8xf32> to vector<8x8xf32>
    %315 = vector.shape_cast %314 : vector<8x8xf32> to vector<8x8x1xf32>
    %316 = tpu.reciprocal %315 {approx = true} : vector<8x8x1xf32> -> vector<8x8x1xf32>
    %317 = vector.broadcast %316 : vector<8x8x1xf32> to vector<8x8x8xf32>
    %318 = arith.mulf %313, %317 : vector<8x8x8xf32>
    %319 = arith.truncf %318 : vector<8x8x8xf32> to vector<8x8x8xbf16>
    "tpu.trace_start"() <{level = 10 : i32, message = "gqk,gkd->gqd"}> : () -> ()
    %cst_75 = arith.constant dense<0.000000e+00> : vector<8x8x32xf32>
    %320 = tpu.matmul %319, %304, %cst_75 {dimension_numbers = #tpu.dot_dimension_numbers<[2], [1], [1], [2], [0, 0, 0, 1, 1, 2], [0], [0]>} : vector<8x8x8xbf16>, vector<8x8x32xbf16>, vector<8x8x32xf32> -> vector<8x8x32xf32>
    "tpu.trace_stop"() : () -> ()
    %321 = vector.extract_strided_slice %320 {offsets = [0, 0, 0], sizes = [1, 8, 32], strides = [1, 1, 1]} : vector<8x8x32xf32> to vector<1x8x32xf32>
    %322 = vector.shape_cast %321 : vector<1x8x32xf32> to vector<8x32xf32>
    %323 = vector.extract_strided_slice %320 {offsets = [1, 0, 0], sizes = [1, 8, 32], strides = [1, 1, 1]} : vector<8x8x32xf32> to vector<1x8x32xf32>
    %324 = vector.shape_cast %323 : vector<1x8x32xf32> to vector<8x32xf32>
    %325 = vector.extract_strided_slice %320 {offsets = [2, 0, 0], sizes = [1, 8, 32], strides = [1, 1, 1]} : vector<8x8x32xf32> to vector<1x8x32xf32>
    %326 = vector.shape_cast %325 : vector<1x8x32xf32> to vector<8x32xf32>
    %327 = vector.extract_strided_slice %320 {offsets = [3, 0, 0], sizes = [1, 8, 32], strides = [1, 1, 1]} : vector<8x8x32xf32> to vector<1x8x32xf32>
    %328 = vector.shape_cast %327 : vector<1x8x32xf32> to vector<8x32xf32>
    %329 = tpu.concatenate %322, %324, %326, %328 in 1 : vector<8x32xf32>, vector<8x32xf32>, vector<8x32xf32>, vector<8x32xf32> -> vector<8x128xf32>
    %330 = vector.extract_strided_slice %320 {offsets = [4, 0, 0], sizes = [1, 8, 32], strides = [1, 1, 1]} : vector<8x8x32xf32> to vector<1x8x32xf32>
    %331 = vector.shape_cast %330 : vector<1x8x32xf32> to vector<8x32xf32>
    %332 = vector.extract_strided_slice %320 {offsets = [5, 0, 0], sizes = [1, 8, 32], strides = [1, 1, 1]} : vector<8x8x32xf32> to vector<1x8x32xf32>
    %333 = vector.shape_cast %332 : vector<1x8x32xf32> to vector<8x32xf32>
    %334 = vector.extract_strided_slice %320 {offsets = [6, 0, 0], sizes = [1, 8, 32], strides = [1, 1, 1]} : vector<8x8x32xf32> to vector<1x8x32xf32>
    %335 = vector.shape_cast %334 : vector<1x8x32xf32> to vector<8x32xf32>
    %336 = vector.extract_strided_slice %320 {offsets = [7, 0, 0], sizes = [1, 8, 32], strides = [1, 1, 1]} : vector<8x8x32xf32> to vector<1x8x32xf32>
    %337 = vector.shape_cast %336 : vector<1x8x32xf32> to vector<8x32xf32>
    %338 = tpu.concatenate %331, %333, %335, %337 in 1 : vector<8x32xf32>, vector<8x32xf32>, vector<8x32xf32>, vector<8x32xf32> -> vector<8x128xf32>
    %339 = tpu.concatenate %329, %338 in 0 : vector<8x128xf32>, vector<8x128xf32> -> vector<16x128xf32>
    %340 = arith.truncf %339 : vector<16x128xf32> to vector<16x128xbf16>
    %c1_76 = arith.constant 1 : index
    %c0_77 = arith.constant 0 : index
    %c0_78 = arith.constant 0 : index
    %341 = vector.load %arg6[%c1_76, %c0_77, %c0_78] : memref<2x128x128xbf16, #tpu.memory_space<vmem>>, vector<1x128x128xbf16>
    %342 = vector.shape_cast %341 : vector<1x128x128xbf16> to vector<128x128xbf16>
    %cst_79 = arith.constant dense<0.000000e+00> : vector<16x128xf32>
    %343 = tpu.matmul %340, %342, %cst_79 {dimension_numbers = #tpu.dot_dimension_numbers<[1], [0], [0], [1], [0, 0, 1, 1], [], []>} : vector<16x128xbf16>, vector<128x128xbf16>, vector<16x128xf32> -> vector<16x128xf32>
    %c1_80 = arith.constant 1 : index
    %c0_81 = arith.constant 0 : index
    %c0_82 = arith.constant 0 : index
    %344 = vector.load %arg7[%c1_80, %c0_81, %c0_82] : memref<2x1x128xf32, #tpu.memory_space<vmem>>, vector<1x1x128xf32>
    %345 = vector.shape_cast %344 : vector<1x1x128xf32> to vector<1x128xf32>
    %346 = vector.broadcast %345 : vector<1x128xf32> to vector<16x128xf32>
    %347 = arith.addf %343, %346 : vector<16x128xf32>
    %348 = arith.addf %207, %347 : vector<16x128xf32>
    %349 = vector.extract_strided_slice %209 {offsets = [2, 0], sizes = [1, 128], strides = [1, 1]} : vector<4x128xf32> to vector<1x128xf32>
    %350 = vector.extract_strided_slice %209 {offsets = [3, 0], sizes = [1, 128], strides = [1, 1]} : vector<4x128xf32> to vector<1x128xf32>
    %cst_83 = arith.constant dense<0.000000e+00> : vector<16xf32>
    %351 = vector.multi_reduction <add>, %348, %cst_83 [1] : vector<16x128xf32> to vector<16xf32>
    %352 = vector.shape_cast %351 : vector<16xf32> to vector<16x1xf32>
    %cst_84 = arith.constant 1.280000e+02 : f32
    %353 = vector.broadcast %cst_84 : f32 to vector<16x1xf32>
    %354 = arith.divf %352, %353 : vector<16x1xf32>
    %355 = vector.broadcast %354 : vector<16x1xf32> to vector<16x128xf32>
    %356 = arith.subf %348, %355 : vector<16x128xf32>
    %357 = arith.mulf %356, %356 : vector<16x128xf32>
    %cst_85 = arith.constant dense<0.000000e+00> : vector<16xf32>
    %358 = vector.multi_reduction <add>, %357, %cst_85 [1] : vector<16x128xf32> to vector<16xf32>
    %359 = vector.shape_cast %358 : vector<16xf32> to vector<16x1xf32>
    %cst_86 = arith.constant 1.280000e+02 : f32
    %360 = vector.broadcast %cst_86 : f32 to vector<16x1xf32>
    %361 = arith.divf %359, %360 : vector<16x1xf32>
    %cst_87 = arith.constant 9.99999974E-6 : f32
    %362 = vector.broadcast %cst_87 : f32 to vector<16x1xf32>
    %363 = arith.addf %361, %362 : vector<16x1xf32>
    %364 = math.rsqrt %363 : vector<16x1xf32>
    %365 = vector.broadcast %364 : vector<16x1xf32> to vector<16x128xf32>
    %366 = arith.mulf %356, %365 : vector<16x128xf32>
    %367 = vector.broadcast %349 : vector<1x128xf32> to vector<16x128xf32>
    %368 = arith.mulf %366, %367 : vector<16x128xf32>
    %369 = vector.broadcast %350 : vector<1x128xf32> to vector<16x128xf32>
    %370 = arith.addf %368, %369 : vector<16x128xf32>
    %371 = arith.truncf %370 : vector<16x128xf32> to vector<16x128xbf16>
    %c1_88 = arith.constant 1 : index
    %c0_89 = arith.constant 0 : index
    %c0_90 = arith.constant 0 : index
    %372 = vector.load %arg8[%c1_88, %c0_89, %c0_90] : memref<2x128x512xbf16, #tpu.memory_space<vmem>>, vector<1x128x512xbf16>
    %373 = vector.shape_cast %372 : vector<1x128x512xbf16> to vector<128x512xbf16>
    %cst_91 = arith.constant dense<0.000000e+00> : vector<16x512xf32>
    %374 = tpu.matmul %371, %373, %cst_91 {dimension_numbers = #tpu.dot_dimension_numbers<[1], [0], [0], [1], [0, 0, 1, 1], [], []>} : vector<16x128xbf16>, vector<128x512xbf16>, vector<16x512xf32> -> vector<16x512xf32>
    %c1_92 = arith.constant 1 : index
    %c0_93 = arith.constant 0 : index
    %c0_94 = arith.constant 0 : index
    %375 = vector.load %arg9[%c1_92, %c0_93, %c0_94] : memref<2x1x512xf32, #tpu.memory_space<vmem>>, vector<1x1x512xf32>
    %376 = vector.shape_cast %375 : vector<1x1x512xf32> to vector<1x512xf32>
    %377 = vector.broadcast %376 : vector<1x512xf32> to vector<16x512xf32>
    %378 = arith.addf %374, %377 : vector<16x512xf32>
    %cst_95 = arith.constant 1.702000e+00 : f32
    %379 = vector.broadcast %cst_95 : f32 to vector<16x512xf32>
    %380 = arith.mulf %379, %378 : vector<16x512xf32>
    %381 = arith.negf %380 : vector<16x512xf32>
    %382 = math.exp %381 : vector<16x512xf32>
    %cst_96 = arith.constant 1.000000e+00 : f32
    %383 = vector.broadcast %cst_96 : f32 to vector<16x512xf32>
    %384 = arith.addf %383, %382 : vector<16x512xf32>
    %385 = arith.divf %383, %384 : vector<16x512xf32>
    %386 = arith.mulf %378, %385 : vector<16x512xf32>
    %387 = arith.truncf %386 : vector<16x512xf32> to vector<16x512xbf16>
    %c1_97 = arith.constant 1 : index
    %c0_98 = arith.constant 0 : index
    %c0_99 = arith.constant 0 : index
    %388 = vector.load %arg10[%c1_97, %c0_98, %c0_99] : memref<2x512x128xbf16, #tpu.memory_space<vmem>>, vector<1x512x128xbf16>
    %389 = vector.shape_cast %388 : vector<1x512x128xbf16> to vector<512x128xbf16>
    %cst_100 = arith.constant dense<0.000000e+00> : vector<16x128xf32>
    %390 = tpu.matmul %387, %389, %cst_100 {dimension_numbers = #tpu.dot_dimension_numbers<[1], [0], [0], [1], [0, 0, 1, 1], [], []>} : vector<16x512xbf16>, vector<512x128xbf16>, vector<16x128xf32> -> vector<16x128xf32>
    %c1_101 = arith.constant 1 : index
    %c0_102 = arith.constant 0 : index
    %c0_103 = arith.constant 0 : index
    %391 = vector.load %arg11[%c1_101, %c0_102, %c0_103] : memref<2x1x128xf32, #tpu.memory_space<vmem>>, vector<1x1x128xf32>
    %392 = vector.shape_cast %391 : vector<1x1x128xf32> to vector<1x128xf32>
    %393 = vector.broadcast %392 : vector<1x128xf32> to vector<16x128xf32>
    %394 = arith.addf %390, %393 : vector<16x128xf32>
    %395 = arith.addf %348, %394 : vector<16x128xf32>
    %c0_104 = arith.constant 0 : index
    %c0_105 = arith.constant 0 : index
    %396 = vector.load %arg12[%c0_104, %c0_105] : memref<2x128xf32, #tpu.memory_space<vmem>>, vector<2x128xf32>
    %397 = vector.extract_strided_slice %396 {offsets = [0, 0], sizes = [1, 128], strides = [1, 1]} : vector<2x128xf32> to vector<1x128xf32>
    %398 = vector.extract_strided_slice %396 {offsets = [1, 0], sizes = [1, 128], strides = [1, 1]} : vector<2x128xf32> to vector<1x128xf32>
    %cst_106 = arith.constant dense<0.000000e+00> : vector<16xf32>
    %399 = vector.multi_reduction <add>, %395, %cst_106 [1] : vector<16x128xf32> to vector<16xf32>
    %400 = vector.shape_cast %399 : vector<16xf32> to vector<16x1xf32>
    %cst_107 = arith.constant 1.280000e+02 : f32
    %401 = vector.broadcast %cst_107 : f32 to vector<16x1xf32>
    %402 = arith.divf %400, %401 : vector<16x1xf32>
    %403 = vector.broadcast %402 : vector<16x1xf32> to vector<16x128xf32>
    %404 = arith.subf %395, %403 : vector<16x128xf32>
    %405 = arith.mulf %404, %404 : vector<16x128xf32>
    %cst_108 = arith.constant dense<0.000000e+00> : vector<16xf32>
    %406 = vector.multi_reduction <add>, %405, %cst_108 [1] : vector<16x128xf32> to vector<16xf32>
    %407 = vector.shape_cast %406 : vector<16xf32> to vector<16x1xf32>
    %cst_109 = arith.constant 1.280000e+02 : f32
    %408 = vector.broadcast %cst_109 : f32 to vector<16x1xf32>
    %409 = arith.divf %407, %408 : vector<16x1xf32>
    %cst_110 = arith.constant 9.99999974E-6 : f32
    %410 = vector.broadcast %cst_110 : f32 to vector<16x1xf32>
    %411 = arith.addf %409, %410 : vector<16x1xf32>
    %412 = math.rsqrt %411 : vector<16x1xf32>
    %413 = vector.broadcast %412 : vector<16x1xf32> to vector<16x128xf32>
    %414 = arith.mulf %404, %413 : vector<16x128xf32>
    %415 = vector.broadcast %397 : vector<1x128xf32> to vector<16x128xf32>
    %416 = arith.mulf %414, %415 : vector<16x128xf32>
    %417 = vector.broadcast %398 : vector<1x128xf32> to vector<16x128xf32>
    %418 = arith.addf %416, %417 : vector<16x128xf32>
    %c0_111 = arith.constant 0 : index
    %c0_112 = arith.constant 0 : index
    %419 = vector.load %arg13[%c0_111, %c0_112] : memref<16x128xf32, #tpu.memory_space<vmem>>, vector<16x128xf32>
    tpu.vector_store %arg13[%c0_111, %c0_112], %418 {strides = array<i32>} : memref<16x128xf32, #tpu.memory_space<vmem>>, vector<16x128xf32>,
    return
  }
}

</mosaic_0001>

<bundles_post_ra>
// kernel: clip_text_embedder_forward.1
= control target key start
LH: loop header
LB: loop body
LE: loop exit
PB: predicated region body
PF: predicated region fallthrough
CT: control target
= control target key end

     0   :  { %18 = vsyncpa [#allocation3], 0  ;;  %s5986_s0 = inlined_call_operand.vmem [shape: s32[16,1], index: 0, kind: input, shape index: {}]   ;;  %s5987_s1 = inlined_call_operand.hbm [shape: bf16[128,128], index: 1, kind: input, shape index: {}]   ;;  %s5988_s2 = inlined_call_operand.vmem [shape: f32[8,128], index: 2, kind: input, shape index: {}]   ;;  %s5989_s3 = inlined_call_operand.vmem [shape: f32[2,4,128], index: 3, kind: input, shape index: {}]   ;;  %s5990_s4 = inlined_call_operand.hbm [shape: bf16[2,128,384], index: 4, kind: input, shape index: {}]   ;;  %s5991_s5 = inlined_call_operand.hbm [shape: f32[2,1,384], index: 5, kind: input, shape index: {}]   ;;  %s5992_s6 = inlined_call_operand.hbm [shape: bf16[2,128,128], index: 6, kind: input, shape index: {}]   ;;  %s5993_s7 = inlined_call_operand.vmem [shape: f32[2,1,128], index: 7, kind: input, shape index: {}]   ;;  %s5994_s8 = inlined_call_operand.hbm [shape: bf16[2,128,512], index: 8, kind: input, shape index: {}]   ;;  %s5995_s9 = inlined_call_operand.hbm [shape: f32[2,1,512], index: 9, kind: input, shape index: {}]   ;;  %s5996_s10 = inlined_call_operand.hbm [shape: bf16[2,512,128], index: 10, kind: input, shape index: {}]   ;;  %s5997_s11 = inlined_call_operand.hbm [shape: f32[2,1,128], index: 11, kind: input, shape index: {}]   ;;  %s5998_s12 = inlined_call_operand.vmem [shape: f32[2,128], index: 12, kind: input, shape index: {}]   ;;  %s5999_s13 = inlined_call_operand.hbm [shape: f32[16,128], index: 13, kind: output, shape index: {}]  }
   0x1   :  { %19 = vsyncpa [#allocation6], 0 }
   0x2   :  { %20 = vsyncpa [#allocation9], 0 }
   0x3   :  { %21 = vsyncpa [#allocation12], 0 }
   0x4   :  { %22 = vsyncpa [#allocation15], 0  ;;  %s47_s27 = sshll.u32 %s5990_s4, 4  ;;  %s48_s27 = int_to_ptr.hbm [resolvable:$true] %s47_s27 }
   0x5   :  { %23 = vsyncpa [#allocation4], 0  ;;  %s5163_s28 = smov [#allocation5]   ;;  %s5164_s30 = smov 192  }
   0x6   :  { %s49_s29 = sshll.u32 %s5163_s28, 4  ;;  %s5165_s14 = smov 12   ;;  %s50_s29 = int_to_ptr.vmem [resolvable:$true] %s49_s29 }
   0x7   :  { %55 = dma.hbm_to_vmem [thread:$0]  %s48_s27, 6144, %s50_s29, [#allocation6], %s5164_s30, %s5164_s30, %s5165_s14  }
   0x8   :  { %s73_s17 = sshll.u32 %s5992_s6, 4  ;;  %s5166_s18 = smov [#allocation8]   ;;  %s74_s17 = int_to_ptr.hbm [resolvable:$true] %s73_s17 }
   0x9   :  { %s75_s19 = sshll.u32 %s5166_s18, 4  ;;  %s101_s22 = sshll.u32 %s5995_s9, 4  ;;  %s76_s19 = int_to_ptr.vmem [resolvable:$true] %s75_s19  ;;  %s102_s22 = int_to_ptr.hbm [resolvable:$true] %s101_s22 }
   0xa   :  { %s5167_s4 = smov 64   ;;  %s5168_s23 = smov 4  }
   0xb   :  { %81 = dma.hbm_to_vmem [thread:$0]  %s74_s17, 2048, %s76_s19, [#allocation9], %s5167_s4, %s5167_s4, %s5168_s23  }
   0xc   :  { %s30_s26 = sshll.u32 %s5987_s1, 4  ;;  %s5169_s6 = smov [#allocation11]   ;;  %s31_s26 = int_to_ptr.hbm [resolvable:$true] %s30_s26 }
   0xd   :  { %s103_s27 = sshll.u32 %s5169_s6, 4  ;;  %s5170_s9 = smov [#allocation2]   ;;  %s104_s27 = int_to_ptr.vmem [resolvable:$true] %s103_s27 }
   0xe   :  { %109 = dma.hbm_to_vmem [thread:$0]  %s102_s22, 128, %s104_s27, [#allocation12], %s5167_s4, %s5167_s4, %s5168_s23  }
   0xf   :  { %s32_s28 = sshll.u32 %s5170_s9, 4  ;;  %s60_s14 = sshll.u32 %s5991_s5, 4  ;;  %s33_s28 = int_to_ptr.vmem [resolvable:$true] %s32_s28  ;;  %s61_s14 = int_to_ptr.hbm [resolvable:$true] %s60_s14 }
  0x10   :  { %38 = dma.hbm_to_vmem [thread:$0]  %s31_s26, 1024, %s33_s28, [#allocation3], %s5167_s4, %s5167_s4, %s5168_s23  }
  0x11   :  { %s5171_s1 = smov [#allocation7]   ;;  %s88_s18 = sshll.u32 %s5994_s8, 4  ;;  %s89_s18 = int_to_ptr.hbm [resolvable:$true] %s88_s18 }
  0x12   :  { %s62_s15 = sshll.u32 %s5171_s1, 4  ;;  %s5172_s19 = smov 48   ;;  %s63_s15 = int_to_ptr.vmem [resolvable:$true] %s62_s15 }
  0x13   :  { %s5173_s20 = smov 3   ;;  %s5174_s21 = smov [#allocation10]  }
  0x14   :  { %68 = dma.hbm_to_vmem [thread:$0]  %s61_s14, 96, %s63_s15, [#allocation6], %s5172_s19, %s5172_s19, %s5173_s20  }
  0x15   :  { %s90_s22 = sshll.u32 %s5174_s21, 4  ;;  %s5175_s5 = smov 256   ;;  %s91_s22 = int_to_ptr.vmem [resolvable:$true] %s90_s22 }
  0x16   :  { %s5176_s24 = smov 16   ;;  %s114_s26 = sshll.u32 %s5996_s10, 4  ;;  %s115_s26 = int_to_ptr.hbm [resolvable:$true] %s114_s26 }
  0x17   :  { %96 = dma.hbm_to_vmem [thread:$0]  %s89_s18, 8192, %s91_s22, [#allocation9], %s5175_s5, %s5175_s5, %s5176_s24  }
  0x18   :  { %s5177_s27 = smov [#allocation13]   ;;  %s127_s29 = sshll.u32 %s5997_s11, 4  ;;  %s128_s29 = int_to_ptr.hbm [resolvable:$true] %s127_s29 }
  0x19   :  { %s116_s9 = sshll.u32 %s5177_s27, 4  ;;  %s5178_s30 = smov [#allocation14]   ;;  %s117_s9 = int_to_ptr.vmem [resolvable:$true] %s116_s9 }
  0x1a   :  { %122 = dma.hbm_to_vmem [thread:$0]  %s115_s26, 8192, %s117_s9, [#allocation12], %s5167_s4, %s5167_s4, %s5168_s23  }
  0x1b   :  { %s129_s14 = sshll.u32 %s5178_s30, 4  ;;  %s5179_s1 = smov 1   ;;  %s130_s14 = int_to_ptr.vmem [resolvable:$true] %s129_s14 }
  0x1c   :  { %135 = dma.hbm_to_vmem [thread:$0]  %s128_s29, 32, %s130_s14, [#allocation15], %s5176_s24, %s5176_s24, %s5179_s1  }
  0x1d   :  { %5151 = dma.done.wait [#allocation3], 1024  }
  0x1e   :  { %5152 = vsyncadd [#allocation3], 4294966272 }
  0x1f   :  { %5153 = dma.done.wait [#allocation6], 6240  }
  0x20   :  { %5154 = vsyncadd [#allocation6], 4294961056 }
  0x21   :  { %5155 = dma.done.wait [#allocation9], 10240  }
  0x22   :  { %5156 = vsyncadd [#allocation9], 4294957056 }
  0x23   :  { %5157 = dma.done.wait [#allocation12], 8320  }
  0x24   :  { %5158 = vsyncadd [#allocation12], 4294958976 }
  0x25   :  { %5159 = dma.done.wait [#allocation15], 32  }
  0x26   :  { %5160 = vsyncadd [#allocation15], 4294967264  ;;  %v5180_v0 = vmov 0   ;;  %v171_v1 = vld [vmem:[%s5986_s0] sm:$0xff]  ;;  %v4529_v2 = vld [vmem:[#allocation2 + $0x38] sm:$0xff]  ;;  %v173_v12 = vlaneseq  ;;  %v5182_v21 = vmov 128.0  }
  0x27   :  { %4748 = vset.pattern.permute.xlu0 %v5180_v0  ;;  %251 = vmatpush.bf16.msra.mxu0 %v4529_v2  ;;  %v4528_v3 = vld [vmem:[#allocation2 + $0x30] sm:$0xff]  ;;  %v172_v4 = vld [vmem:[%s5986_s0 + $0x8] sm:$0xff]  ;;  %v4526_v6 = vld [vmem:[#allocation2 + $0x20] sm:$0xff]  ;;  %v5181_v15 = vmov 1.0|1.0   ;;  %4783 = vrcp.f32 %v5182_v21  ;;  %vm620_vm10 = vcmask 261120  }
  0x28   :  { %176 = vperm.xlu0 %4748, %v171_v1   ;;  %v4527_v5 = vld [vmem:[#allocation2 + $0x28] sm:$0xff]  ;;  %v4525_v7 = vld [vmem:[#allocation2 + $0x18] sm:$0xff]  ;;  %v4524_v8 = vld [vmem:[#allocation2 + $0x10] sm:$0xff]  ;;  %v5302_v13 = vand.u32 127, %v173_v12  ;;  %s5183_s18 = smov 32   ;;  %s5184_s19 = smov 96  }
  0x29   :  { %v4523_v9 = vld [vmem:[#allocation2 + $0x8] sm:$0xff]  ;;  %v4522_v10 = vld [vmem:[#allocation2] sm:$0xff]  ;;  %v4552_v37 = vld [vmem:[#allocation5 + $0xb0] sm:$0xf0]  ;;  %vm873_vm11 = vcmask 1043456   ;;  %vm773_vm13 = vcmask 64512  }
  0x2a   :  { %v202_v16 = vld [vmem:[%s5988_s2] sm:$0xff]  ;;  %v3790_v36 = vld [vmem:[#allocation5 + $0xa8] sm:$0xf]  ;;  %v4551_v38 = vld [vmem:[#allocation5 + $0xac] sm:$0xf]  ;;  %vm1036_vm14 = vcmask 523264  }
  0x2b   :  { %252 = vmatpush.bf16.msra.mxu0 %v4528_v3  ;;  %v3791_v39 = vor.u32 %v4552_v37, %v3790_v36  ;;  %v3792_v40 = vld [vmem:[#allocation5 + $0xb4] sm:$0xf0]  ;;  %v3798_v41 = vld [vmem:[#allocation5 + $0xb0] sm:$0xf]  ;;  %v4553_v42 = vld [vmem:[#allocation5 + $0xb8] sm:$0xf0] }
  0x2c   :  { %v3795_v43 = vor.u32 %v4551_v38, %v3792_v40  ;;  %v3799_v44 = vor.u32 %v4553_v42, %v3798_v41  ;;  %v3778_v45 = vld [vmem:[#allocation5 + $0x90] sm:$0xf]  ;;  %v4549_v46 = vld [vmem:[#allocation5 + $0x98] sm:$0xf0]  ;;  %v4548_v47 = vld [vmem:[#allocation5 + $0x94] sm:$0xf] }
  0x2d   :  { %v4784_v22 = vpop.eup %4783  ;;  %492 = vmatpush.bf16.msra.mxu1 %v3791_v39  ;;  %v3779_v48 = vor.u32 %v4549_v46, %v3778_v45  ;;  %v3780_v49 = vld [vmem:[#allocation5 + $0x9c] sm:$0xf0]  ;;  %v3786_v50 = vld [vmem:[#allocation5 + $0x98] sm:$0xf]  ;;  %v4550_v51 = vld [vmem:[#allocation5 + $0xa0] sm:$0xf0] }
  0x2e   :  { %v275_v23 = vmul.f32 128.0, %v4784_v22  ;;  %vm279_vm3 = vweird.f32 %v4784_v22  ;;  %506 = vmatpush.bf16.msra.mxu2 %v3795_v43  ;;  %520 = vmatpush.bf16.msra.mxu3 %v3799_v44  ;;  %v3783_v52 = vor.u32 %v4548_v47, %v3780_v49  ;;  %v3787_v53 = vor.u32 %v4550_v51, %v3786_v50  ;;  %v3766_v54 = vld [vmem:[#allocation5 + $0x78] sm:$0xf]  ;;  %v4546_v55 = vld [vmem:[#allocation5 + $0x80] sm:$0xf0]  ;;  %s3653_s29 = sshll.u32 %s5999_s13, 4  ;;  %s3654_s29 = int_to_ptr.hbm [resolvable:$true] %s3653_s29 }
  0x2f   :  { %253 = vmatpush.bf16.msra.mxu0 %v4527_v5  ;;  %v4545_v56 = vld [vmem:[#allocation5 + $0x7c] sm:$0xf]  ;;  %v3767_v57 = vor.u32 %v4546_v55, %v3766_v54  ;;  %v3768_v58 = vld [vmem:[#allocation5 + $0x84] sm:$0xf0]  ;;  %v3774_v59 = vld [vmem:[#allocation5 + $0x80] sm:$0xf] }
  0x30   :  { %179 = vperm.xlu0 %4748, %v172_v4   ;;  %v276_v24 = vsub.f32 1.0, %v275_v23  ;;  %v4547_v60 = vld [vmem:[#allocation5 + $0x88] sm:$0xf0]  ;;  %v3771_v61 = vor.u32 %v4545_v56, %v3768_v58  ;;  %v3754_v63 = vld [vmem:[#allocation5 + $0x60] sm:$0xf]  ;;  %vm1038_vm15 = vcmask 785408  }
  0x31   :  { %493 = vmatpush.bf16.msra.mxu1 %v3779_v48  ;;  %v3775_v62 = vor.u32 %v4547_v60, %v3774_v59  ;;  %v4543_v0 = vld [vmem:[#allocation5 + $0x68] sm:$0xf0]  ;;  %v4542_v1 = vld [vmem:[#allocation5 + $0x64] sm:$0xf]  ;;  %v3756_v3 = vld [vmem:[#allocation5 + $0x6c] sm:$0xf0] }
  0x32   :  { %v277_v25 = vmul.f32 %v4784_v22, %v276_v24  ;;  %507 = vmatpush.bf16.msra.mxu2 %v3783_v52  ;;  %521 = vmatpush.bf16.msra.mxu3 %v3787_v53  ;;  %v3755_v2 = vor.u32 %v4543_v0, %v3754_v63  ;;  %v3762_v4 = vld [vmem:[#allocation5 + $0x68] sm:$0xf]  ;;  %v4544_v5 = vld [vmem:[#allocation5 + $0x70] sm:$0xf0]  ;;  %v3730_v21 = vld [vmem:[#allocation5 + $0x30] sm:$0xf] }
  0x33   :  { %254 = vmatpush.bf16.msra.mxu0 %v4526_v6  ;;  %v3759_v6 = vor.u32 %v4542_v1, %v3756_v3  ;;  %v4536_v23 = vld [vmem:[#allocation5 + $0x34] sm:$0xf]  ;;  %v3720_v37 = vld [vmem:[#allocation5 + $0x24] sm:$0xf0]  ;;  %v3726_v38 = vld [vmem:[#allocation5 + $0x20] sm:$0xf] }
  0x34   :  { %v278_v26 = vadd.f32 %v4784_v22, %v277_v25  ;;  %v3732_v25 = vld [vmem:[#allocation5 + $0x3c] sm:$0xf0]  ;;  %v4535_v39 = vld [vmem:[#allocation5 + $0x28] sm:$0xf0]  ;;  %v4530_v44 = vld [vmem:[#allocation5 + $0x4] sm:$0xf] }
  0x35   :  { %494 = vmatpush.bf16.msra.mxu1 %v3767_v57  ;;  %v3727_v41 = vor.u32 %v4535_v39, %v3726_v38  ;;  %v3706_v42 = vld [vmem:[#allocation5] sm:$0xf]  ;;  %v4531_v43 = vld [vmem:[#allocation5 + $0x8] sm:$0xf0]  ;;  %v3708_v47 = vld [vmem:[#allocation5 + $0xc] sm:$0xf0] }
  0x36   :  { %v5315_v27 = vsel %vm279_vm3, %v4784_v22, %v278_v26  ;;  %508 = vmatpush.bf16.msra.mxu2 %v3771_v61  ;;  %522 = vmatpush.bf16.msra.mxu3 %v3775_v62  ;;  %v4537_v22 = vld [vmem:[#allocation5 + $0x38] sm:$0xf0]  ;;  %v3738_v26 = vld [vmem:[#allocation5 + $0x38] sm:$0xf]  ;;  %v3707_v46 = vor.u32 %v4531_v43, %v3706_v42  ;;  %v3714_v48 = vld [vmem:[#allocation5 + $0x8] sm:$0xf]  ;;  %v3711_v51 = vor.u32 %v4530_v44, %v3708_v47 }
  0x37   :  { %255 = vmatpush.bf16.msra.mxu0 %v4525_v7  ;;  %v3763_v7 = vor.u32 %v4544_v5, %v3762_v4  ;;  %v3731_v24 = vor.u32 %v4537_v22, %v3730_v21  ;;  %v4532_v49 = vld [vmem:[#allocation5 + $0x10] sm:$0xf0]  ;;  %v269_v4 = vld [vmem:[%s5989_s3] sm:$0xf]  ;;  %s5187_s30 = smov 128   ;;  %s5188_s14 = smov 8  }
  0x38   :  { %v3715_v52 = vor.u32 %v4532_v49, %v3714_v48  ;;  %v356_v21 = vld [vmem:[#allocation7] sm:$0x7] }
  0x39   :  { %495 = vmatpush.bf16.msra.mxu1 %v3755_v2  ;;  %v358_v22 = vperm.slane %v356_v21, 0 }
  0x3a   :  { %509 = vmatpush.bf16.msra.mxu2 %v3759_v6  ;;  %523 = vmatpush.bf16.msra.mxu3 %v3763_v7  ;;  %v317_v7 = vperm.slane %v269_v4, 0 }
  0x3b   :  { %256 = vmatpush.bf16.msra.mxu0 %v4524_v8  ;;  %v3742_v8 = vld [vmem:[#allocation5 + $0x48] sm:$0xf] }
  0x3f   :  { %257 = vmatpush.bf16.msra.mxu0 %v4523_v9  ;;  %v4540_v9 = vld [vmem:[#allocation5 + $0x50] sm:$0xf0] }
  0x43   :  { %258 = vmatpush.bf16.msra.mxu0 %v4522_v10  ;;  %v4539_v10 = vld [vmem:[#allocation5 + $0x4c] sm:$0xf] }
  0x9a   :  { %v177_v11 = vpop.permute.xlu0 %176 }
  0x9b   :  { %vm181_vm0 = vcmp.eq.s32.totalorder %v5302_v13, %v177_v11  ;;  %v3743_v11 = vor.u32 %v4540_v9, %v3742_v8 }
  0x9d   :  { %496 = vmatpush.bf16.msra.mxu1 %v3743_v11 }
  0xa1   :  { %497 = vmatpush.bf16.msra.mxu1 %v3731_v24 }
  0xa2   :  { %v180_v14 = vpop.permute.xlu0 %179 }
  0xa3   :  { %vm182_vm1 = vcmp.eq.s32.totalorder %v5302_v13, %v180_v14  ;;  %v3744_v14 = vld [vmem:[#allocation5 + $0x54] sm:$0xf0] }
  0xa4   :  { %vm3702_vm2 = vmpackc.low %vm182_vm1, %vm181_vm0 }
  0xa5   :  { %3703 = vmatmul.msk.bf16.vlgmr.msra.gmra.mxu0 %vm3702_vm2, %v5181_v15  ;;  %v3750_v15 = vld [vmem:[#allocation5 + $0x50] sm:$0xf] }
 0x122   :  { %v260_v17 = vpop.f32.mrf.mxu0 }
 0x123   :  { %v5309_v18 = vadd.f32 %v260_v17, %v202_v16  ;;  %v3747_v17 = vor.u32 %v4539_v10, %v3744_v14  ;;  %v320_v14 = vperm.slane %v269_v4, 1 }
 0x125   :  { %270 = vadd.xlane.f32.xlu1 %v5309_v18  ;;  %510 = vmatpush.bf16.msra.mxu2 %v3747_v17 }
 0x12a   :  { %v262_v19 = vpop.f32.mrf.mxu0 }
 0x12b   :  { %v5312_v20 = vadd.f32 %v262_v19, %v202_v16  ;;  %v4541_v16 = vld [vmem:[#allocation5 + $0x58] sm:$0xf0] }
 0x12c   :  { %v3751_v19 = vor.u32 %v4541_v16, %v3750_v15 }
 0x12d   :  { %272 = vadd.xlane.f32.xlu1 %v5312_v20 }
 0x12e   :  { %524 = vmatpush.bf16.msra.mxu3 %v3751_v19 }
 0x198   :  { %v271_v28 = vpop.xlane.xlu1 %270 }
 0x199   :  { %v281_v29 = vmul.f32 %v5315_v27, %v271_v28  ;;  %v4538_v28 = vld [vmem:[#allocation5 + $0x40] sm:$0xf0] }
 0x19b   :  { %v5319_v30 = vsub.f32 %v5309_v18, %v281_v29  ;;  %v3735_v29 = vor.u32 %v4536_v23, %v3732_v25  ;;  %v359_v25 = vperm.slane %v356_v21, 1 }
 0x19d   :  { %v285_v31 = vmul.f32 %v5319_v30, %v5319_v30  ;;  %511 = vmatpush.bf16.msra.mxu2 %v3735_v29  ;;  %v360_v29 = vperm.slane %v356_v21, 2 }
 0x19f   :  { %287 = vadd.xlane.f32.xlu2 %v285_v31  ;;  %v3739_v31 = vor.u32 %v4538_v28, %v3738_v26 }
 0x1a0   :  { %v273_v32 = vpop.xlane.xlu1 %272 }
 0x1a1   :  { %v282_v33 = vmul.f32 %v5315_v27, %v273_v32  ;;  %525 = vmatpush.bf16.msra.mxu3 %v3739_v31  ;;  %v3718_v32 = vld [vmem:[#allocation5 + $0x18] sm:$0xf] }
 0x1a3   :  { %v5325_v34 = vsub.f32 %v5312_v20, %v282_v33  ;;  %v4534_v33 = vld [vmem:[#allocation5 + $0x20] sm:$0xf0] }
 0x1a4   :  { %v3719_v36 = vor.u32 %v4534_v33, %v3718_v32 }
 0x1a5   :  { %v286_v35 = vmul.f32 %v5325_v34, %v5325_v34  ;;  %526 = vmatpush.bf16.msra.mxu3 %v3727_v41 }
 0x1a6   :  { %498 = vmatpush.bf16.msra.mxu1 %v3719_v36 }
 0x1a7   :  { %289 = vadd.xlane.f32.xlu2 %v286_v35  ;;  %v4533_v35 = vld [vmem:[#allocation5 + $0x1c] sm:$0xf] }
 0x1a8   :  { %v3723_v40 = vor.u32 %v4533_v35, %v3720_v37 }
 0x1a9   :  { %527 = vmatpush.bf16.msra.mxu3 %v3715_v52 }
 0x1aa   :  { %512 = vmatpush.bf16.msra.mxu2 %v3723_v40  ;;  %499 = vmatpush.bf16.msra.mxu1 %v3707_v46 }
 0x1ae   :  { %513 = vmatpush.bf16.msra.mxu2 %v3711_v51 }
 0x212   :  { %v288_v45 = vpop.xlane.xlu2 %287 }
 0x213   :  { %v291_v50 = vmul.f32 %v288_v45, %v5315_v27 }
 0x215   :  { %v293_v53 = vadd.f32 1e-05, %v291_v50 }
 0x217   :  { %4785 = vrsqrt.f32 %v293_v53  ;;  %vm301_vm5 = vweird.f32 %v293_v53 }
 0x21a   :  { %v290_v54 = vpop.xlane.xlu2 %289 }
 0x21b   :  { %v292_v55 = vmul.f32 %v290_v54, %v5315_v27 }
 0x21d   :  { %v4786_v56 = vpop.eup %4785  ;;  %v294_v57 = vadd.f32 1e-05, %v292_v55 }
 0x21e   :  { %v296_v58 = vmul.f32 %v4786_v56, %v293_v53  ;;  %vm302_vm4 = vweird.f32 %v4786_v56 }
 0x21f   :  { %4787 = vrsqrt.f32 %v294_v57  ;;  %vm303_vm6 = vmor %vm301_vm5, %vm302_vm4  ;;  %vm311_vm8 = vweird.f32 %v294_v57 }
 0x220   :  { %v297_v59 = vmul.f32 %v4786_v56, %v296_v58 }
 0x222   :  { %v298_v60 = vmul.f32 0.5, %v297_v59 }
 0x224   :  { %v299_v61 = vsub.f32 1.5, %v298_v60 }
 0x225   :  { %v4788_v62 = vpop.eup %4787 }
 0x226   :  { %v300_v63 = vmul.f32 %v4786_v56, %v299_v61  ;;  %v306_v0 = vmul.f32 %v4788_v62, %v294_v57  ;;  %vm312_vm7 = vweird.f32 %v4788_v62 }
 0x227   :  { %vm313_vm9 = vmor %vm311_vm8, %vm312_vm7 }
 0x228   :  { %v307_v1 = vmul.f32 %v4788_v62, %v306_v0  ;;  %v304_v2 = vsel %vm303_vm6, %v4786_v56, %v300_v63  ;;  %v266_v0 = vshrl.u32 %v173_v12, 7 }
 0x229   :  { %v315_v6 = vmul.f32 %v304_v2, %v5319_v30 }
 0x22a   :  { %v308_v3 = vmul.f32 0.5, %v307_v1  ;;  %vm267_vm12 = vcmp.le.s32.totalorder %v5302_v13, %v266_v0 }
 0x22b   :  { %v318_v11 = vmul.f32 %v317_v7, %v315_v6 }
 0x22c   :  { %v309_v5 = vsub.f32 1.5, %v308_v3 }
 0x22d   :  { %v321_v16 = vadd.f32 %v320_v14, %v318_v11 }
 0x22e   :  { %v310_v8 = vmul.f32 %v4788_v62, %v309_v5  ;;  %v5185_v5 = vmov -1e+09  }
 0x22f   :  { %v5369_v6 = vsel %vm267_vm12, 0.0, %v5185_v5 }
 0x230   :  { %v314_v9 = vsel %vm313_vm9, %v4788_v62, %v310_v8 }
 0x231   :  { %v316_v10 = vmul.f32 %v314_v9, %v5325_v34 }
 0x233   :  { %v319_v15 = vmul.f32 %v317_v7, %v316_v10 }
 0x235   :  { %v322_v17 = vadd.f32 %v320_v14, %v319_v15 }
 0x237   :  { %v323_v19 = vpack.c.bf16 %v322_v17, %v321_v16 }
 0x239   :  { %500 = vmatmul.bf16.vlgmr.msra.gmra.mxu1 %v323_v19  ;;  %514 = vmatmul.bf16.vlgmr.msra.gmra.mxu2 %v323_v19 }
 0x23a   :  { %528 = vmatmul.bf16.vlgmr.msra.gmra.mxu3 %v323_v19 }
 0x2b6   :  { %v501_v23 = vpop.f32.mrf.mxu1 }
 0x2b7   :  { %v502_v30 = vadd.f32 %v501_v23, %v358_v22 }
 0x2b9   :  { %v534_v24 = vmul.f32 0.17677669, %v502_v30 }
 0x2bb   :  { %540 = vrot.lane.b32.xlu2 %v534_v24, %s5167_s4  ;;  %v556_v41 = vpack.c.bf16 %v534_v24, %v534_v24 }
 0x2bc   :  { %v515_v26 = vpop.f32.mrf.mxu2 }
 0x2bd   :  { %v516_v28 = vadd.f32 %v515_v26, %v359_v25  ;;  %v529_v34 = vpop.f32.mrf.mxu3 }
 0x2be   :  { %v5340_v33 = vadd.f32 %v529_v34, %v360_v29  ;;  %v503_v35 = vpop.f32.mrf.mxu1 }
 0x2bf   :  { %571 = vrot.lane.b32.xlu1 %v516_v28, %s5183_s18  ;;  %568 = vrot.lane.b32.xlu0 %v516_v28, %s5167_s4  ;;  %v584_v31 = vpack.c.bf16 %v516_v28, %v516_v28  ;;  %v504_v40 = vadd.f32 %v503_v35, %v358_v22 }
 0x2c0   :  { %v612_v39 = vpack.c.bf16 %v5340_v33, %v5340_v33 }
 0x2c1   :  { %v625_v32 = vsel %vm620_vm10, %v584_v31, 0  ;;  %v535_v46 = vmul.f32 0.17677669, %v504_v40 }
 0x2c2   :  { %634 = vmatpush.bf16.xpose.msrb.mxu1 %v625_v32  ;;  %v875_v45 = vsel %vm873_vm11, %v612_v39, 0 }
 0x2c3   :  { %v560_v48 = vpack.c.bf16 %v535_v46, %v535_v46 }
 0x2c4   :  { %v517_v36 = vpop.f32.mrf.mxu2 }
 0x2c5   :  { %v518_v37 = vadd.f32 %v517_v36, %v359_v25  ;;  %v531_v38 = vpop.f32.mrf.mxu3 }
 0x2c6   :  { %v5347_v43 = vadd.f32 %v531_v38, %v360_v29 }
 0x2c7   :  { %537 = vrot.lane.b32.xlu1 %v534_v24, %s5184_s19  ;;  %543 = vrot.lane.b32.xlu0 %v534_v24, %s5183_s18  ;;  %v588_v42 = vpack.c.bf16 %v518_v37, %v518_v37 }
 0x2c8   :  { %581 = vrot.lane.b32.xlu2 %v518_v37, %s5183_s18  ;;  %v616_v47 = vpack.c.bf16 %v5347_v43, %v5347_v43 }
 0x2c9   :  { %3800 = vmatmul.msk.bf16.vlgmr.msrb.gmra.mxu1 %vm620_vm10, %v556_v41  ;;  %v701_v44 = vsel %vm620_vm10, %v588_v42, 0 }
 0x2ca   :  { %710 = vmatpush.bf16.xpose.msrb.mxu0 %v701_v44  ;;  %v951_v49 = vsel %vm873_vm11, %v616_v47, 0 }
 0x2cf   :  { %575 = vrot.lane.b32.xlu1 %v518_v37, %s5184_s19  ;;  %565 = vrot.lane.b32.xlu0 %v516_v28, %s5184_s19 }
 0x2d0   :  { %553 = vrot.lane.b32.xlu2 %v535_v46, %s5183_s18 }
 0x2d1   :  { %3804 = vmatmul.msk.bf16.vlgmr.msrb.gmra.mxu0 %vm620_vm10, %v560_v48 }
 0x2d2   :  { %884 = vmatpush.bf16.msra.mxu0 %v875_v45 }
 0x2d6   :  { %960 = vmatpush.bf16.msrb.mxu0 %v951_v49 }
 0x2d7   :  { %578 = vrot.lane.b32.xlu0 %v518_v37, %s5167_s4 }
 0x2df   :  { %550 = vrot.lane.b32.xlu0 %v535_v46, %s5167_s4 }
 0x2e7   :  { %547 = vrot.lane.b32.xlu0 %v535_v46, %s5184_s19 }
 0x315   :  { %v541_v50 = vpop.permute.xlu2 %540 }
 0x316   :  { %v558_v62 = vpack.c.bf16 %v541_v50, %v541_v50 }
 0x322   :  { %v582_v51 = vpop.permute.xlu2 %581 }
 0x323   :  { %v591_v52 = vpack.c.bf16 %v582_v51, %v582_v51 }
 0x325   :  { %v758_v59 = vsel %vm620_vm10, %v591_v52, 0 }
 0x32a   :  { %v554_v10 = vpop.permute.xlu2 %553 }
 0x32b   :  { %v563_v14 = vpack.c.bf16 %v554_v10, %v554_v10 }
 0x331   :  { %v572_v53 = vpop.permute.xlu1 %571  ;;  %v569_v54 = vpop.permute.xlu0 %568 }
 0x332   :  { %v587_v55 = vpack.c.bf16 %v572_v53, %v572_v53  ;;  %v586_v56 = vpack.c.bf16 %v569_v54, %v569_v54 }
 0x334   :  { %v663_v57 = vsel %vm620_vm10, %v586_v56, 0  ;;  %v682_v58 = vsel %vm620_vm10, %v587_v55, 0 }
 0x335   :  { %672 = vmatpush.bf16.xpose.msrb.mxu2 %v663_v57  ;;  %691 = vmatpush.bf16.xpose.msrb.mxu3 %v682_v58 }
 0x339   :  { %v538_v60 = vpop.permute.xlu1 %537  ;;  %v544_v61 = vpop.permute.xlu0 %543 }
 0x33a   :  { %v559_v63 = vpack.c.bf16 %v544_v61, %v544_v61  ;;  %v557_v15 = vpack.c.bf16 %v538_v60, %v538_v60 }
 0x33c   :  { %3802 = vmatmul.msk.bf16.vlgmr.msrb.gmra.mxu2 %vm620_vm10, %v558_v62  ;;  %3803 = vmatmul.msk.bf16.vlgmr.msrb.gmra.mxu3 %vm620_vm10, %v559_v63 }
 0x33d   :  { %767 = vmatpush.bf16.xpose.msra.mxu3 %v758_v59 }
 0x341   :  { %v576_v1 = vpop.permute.xlu1 %575  ;;  %v566_v2 = vpop.permute.xlu0 %565 }
 0x342   :  { %v589_v3 = vpack.c.bf16 %v576_v1, %v576_v1  ;;  %v585_v4 = vpack.c.bf16 %v566_v2, %v566_v2 }
 0x344   :  { %v720_v7 = vsel %vm620_vm10, %v589_v3, 0  ;;  %v644_v8 = vsel %vm620_vm10, %v585_v4, 0 }
 0x345   :  { %653 = vmatpush.bf16.xpose.msra.mxu1 %v644_v8 }
 0x346   :  { %v636_v9 = vpop.f32.mrf.mxu1 }
 0x347   :  { %v5374_v12 = vadd.f32 %v636_v9, %v5369_v6 }
 0x349   :  { %v579_v13 = vpop.permute.xlu0 %578  ;;  %v774_v11 = vsel %vm773_vm13, %v5374_v12, -inf }
 0x34a   :  { %v590_v16 = vpack.c.bf16 %v579_v13, %v579_v13  ;;  %775 = vmax.xlane.f32.xlu0 %v774_v11 }
 0x34c   :  { %v739_v17 = vsel %vm620_vm10, %v590_v16, 0  ;;  %3801 = vmatmul.msk.bf16.vlgmr.msra.gmra.mxu1 %vm620_vm10, %v557_v15  ;;  %3807 = vmatmul.msk.bf16.vlgmr.msra.gmra.mxu3 %vm620_vm10, %v563_v14 }
 0x34d   :  { %729 = vmatpush.bf16.xpose.msrb.mxu1 %v720_v7  ;;  %748 = vmatpush.bf16.xpose.msra.mxu2 %v739_v17 }
 0x34e   :  { %v638_v19 = vpop.f32.mrf.mxu1  ;;  %v712_v21 = vpop.f32.mrf.mxu0 }
 0x34f   :  { %v5390_v41 = vadd.f32 %v712_v21, %v5369_v6 }
 0x351   :  { %v551_v22 = vpop.permute.xlu0 %550  ;;  %v786_v44 = vsel %vm773_vm13, %v5390_v41, -inf }
 0x352   :  { %v562_v23 = vpack.c.bf16 %v551_v22, %v551_v22 }
 0x354   :  { %3806 = vmatmul.msk.bf16.vlgmr.msra.gmra.mxu2 %vm620_vm10, %v562_v23 }
 0x356   :  { %v714_v30 = vpop.f32.mrf.mxu0 }
 0x359   :  { %v548_v24 = vpop.permute.xlu0 %547 }
 0x35a   :  { %v561_v25 = vpack.c.bf16 %v548_v24, %v548_v24 }
 0x35c   :  { %3805 = vmatmul.msk.bf16.vlgmr.msrb.gmra.mxu1 %vm620_vm10, %v561_v25 }
 0x3bd   :  { %v776_v60 = vpop.xlane.xlu0 %775 }
 0x3bf   :  { %v674_v26 = vpop.f32.mrf.mxu2  ;;  %v693_v28 = vpop.f32.mrf.mxu3 }
 0x3c0   :  { %v675_v34 = vadd.f32 %v674_v26, %v5369_v6  ;;  %v694_v29 = vadd.f32 %v693_v28, %v5369_v6 }
 0x3c2   :  { %v783_v31 = vsel %vm773_vm13, %v694_v29, -inf  ;;  %v780_v32 = vsel %vm773_vm13, %v675_v34, -inf }
 0x3c3   :  { %784 = vmax.xlane.f32.xlu1 %v783_v31  ;;  %781 = vmax.xlane.f32.xlu2 %v780_v32 }
 0x3c7   :  { %v676_v35 = vpop.f32.mrf.mxu2  ;;  %v695_v36 = vpop.f32.mrf.mxu3 }
 0x3c9   :  { %v655_v37 = vpop.f32.mrf.mxu1 }
 0x3ca   :  { %v656_v38 = vadd.f32 %v655_v37, %v5369_v6 }
 0x3cc   :  { %v777_v39 = vsel %vm773_vm13, %v656_v38, -inf }
 0x3cd   :  { %778 = vmax.xlane.f32.xlu0 %v777_v39 }
 0x3cf   :  { %v769_v40 = vpop.f32.mrf.mxu3 }
 0x3d0   :  { %v770_v54 = vadd.f32 %v769_v40, %v5369_v6 }
 0x3d1   :  { %v657_v42 = vpop.f32.mrf.mxu1 }
 0x3d2   :  { %v795_v55 = vsel %vm773_vm13, %v770_v54, -inf }
 0x3d5   :  { %787 = vmax.xlane.f32.xlu0 %v786_v44 }
 0x3d7   :  { %v750_v45 = vpop.f32.mrf.mxu2  ;;  %v771_v46 = vpop.f32.mrf.mxu3 }
 0x3d8   :  { %v751_v51 = vadd.f32 %v750_v45, %v5369_v6 }
 0x3d9   :  { %v731_v47 = vpop.f32.mrf.mxu1 }
 0x3da   :  { %v732_v48 = vadd.f32 %v731_v47, %v5369_v6  ;;  %v792_v53 = vsel %vm773_vm13, %v751_v51, -inf }
 0x3dc   :  { %596 = vrot.lane.b32.xlu1 %v5340_v33, %s5167_s4  ;;  %v789_v49 = vsel %vm773_vm13, %v732_v48, -inf }
 0x3dd   :  { %790 = vmax.xlane.f32.xlu2 %v789_v49 }
 0x3df   :  { %v752_v50 = vpop.f32.mrf.mxu2 }
 0x3e1   :  { %v733_v52 = vpop.f32.mrf.mxu1 }
 0x3e5   :  { %793 = vmax.xlane.f32.xlu2 %v792_v53 }
 0x3e9   :  { %593 = vrot.lane.b32.xlu0 %v5340_v33, %s5184_s19 }
 0x3fd   :  { %599 = vrot.lane.b32.xlu2 %v5340_v33, %s5183_s18 }
 0x406   :  { %796 = vmax.xlane.f32.xlu1 %v795_v55 }
 0x436   :  { %v785_v56 = vpop.xlane.xlu1 %784  ;;  %v782_v57 = vpop.xlane.xlu2 %781 }
 0x437   :  { %v801_v58 = vsub.f32 %v694_v29, %v785_v56  ;;  %v800_v59 = vsub.f32 %v675_v34, %v782_v57 }
 0x439   :  { %v812_v61 = vmul.f32 1.442695, %v801_v58  ;;  %v810_v62 = vmul.f32 1.442695, %v800_v59 }
 0x43b   :  { %4789 = vpow2.f32 %v812_v61 }
 0x43c   :  { %4791 = vpow2.f32 %v810_v62 }
 0x440   :  { %v779_v63 = vpop.xlane.xlu0 %778 }
 0x441   :  { %v5406_v0 = vpop.eup %4789  ;;  %v799_v1 = vsub.f32 %v656_v38, %v779_v63  ;;  %v798_v38 = vsub.f32 %v5374_v12, %v776_v60 }
 0x442   :  { %v5408_v2 = vpop.eup %4791  ;;  %v831_v33 = vsel %vm773_vm13, %v5406_v0, 0.0 }
 0x443   :  { %v808_v3 = vmul.f32 1.442695, %v799_v1  ;;  %v828_v4 = vsel %vm773_vm13, %v5408_v2, 0.0  ;;  %832 = vadd.xlane.f32.xlu2 %v831_v33  ;;  %v806_v39 = vmul.f32 1.442695, %v798_v38 }
 0x444   :  { %829 = vadd.xlane.f32.xlu1 %v828_v4 }
 0x445   :  { %4793 = vpow2.f32 %v808_v3 }
 0x448   :  { %v788_v14 = vpop.xlane.xlu0 %787 }
 0x449   :  { %v802_v44 = vsub.f32 %v5390_v41, %v788_v14 }
 0x44b   :  { %v5414_v5 = vpop.eup %4793  ;;  %v814_v47 = vmul.f32 1.442695, %v802_v44 }
 0x44c   :  { %v825_v7 = vsel %vm773_vm13, %v5414_v5, 0.0 }
 0x44d   :  { %826 = vadd.xlane.f32.xlu0 %v825_v7 }
 0x44e   :  { %v597_v8 = vpop.permute.xlu1 %596 }
 0x44f   :  { %v614_v9 = vpack.c.bf16 %v597_v8, %v597_v8 }
 0x450   :  { %v791_v10 = vpop.xlane.xlu2 %790 }
 0x451   :  { %v913_v13 = vsel %vm873_vm11, %v614_v9, 0  ;;  %v803_v11 = vsub.f32 %v732_v48, %v791_v10 }
 0x452   :  { %922 = vmatpush.bf16.msrb.mxu2 %v913_v13 }
 0x453   :  { %v816_v15 = vmul.f32 1.442695, %v803_v11 }
 0x455   :  { %4795 = vpow2.f32 %v816_v15 }
 0x458   :  { %v794_v16 = vpop.xlane.xlu2 %793 }
 0x459   :  { %v804_v17 = vsub.f32 %v751_v51, %v794_v16 }
 0x45b   :  { %v4796_v19 = vpop.eup %4795  ;;  %v818_v21 = vmul.f32 1.442695, %v804_v17  ;;  %v594_v22 = vpop.permute.xlu0 %593 }
 0x45c   :  { %v613_v23 = vpack.c.bf16 %v594_v22, %v594_v22  ;;  %v837_v30 = vsel %vm773_vm13, %v4796_v19, 0.0 }
 0x45d   :  { %4797 = vpow2.f32 %v818_v21  ;;  %838 = vadd.xlane.f32.xlu0 %v837_v30 }
 0x45e   :  { %v894_v24 = vsel %vm873_vm11, %v613_v23, 0 }
 0x45f   :  { %903 = vmatpush.bf16.msra.mxu1 %v894_v24 }
 0x460   :  { %v600_v25 = vpop.permute.xlu2 %599 }
 0x461   :  { %v615_v26 = vpack.c.bf16 %v600_v25, %v600_v25 }
 0x463   :  { %v4798_v28 = vpop.eup %4797  ;;  %v932_v34 = vsel %vm873_vm11, %v615_v26, 0 }
 0x464   :  { %941 = vmatpush.bf16.msrb.mxu3 %v932_v34  ;;  %v840_v29 = vsel %vm773_vm13, %v4798_v28, 0.0 }
 0x465   :  { %841 = vadd.xlane.f32.xlu1 %v840_v29 }
 0x471   :  { %603 = vrot.lane.b32.xlu0 %v5347_v43, %s5184_s19 }
 0x479   :  { %v797_v31 = vpop.xlane.xlu1 %796 }
 0x47a   :  { %v805_v32 = vsub.f32 %v770_v54, %v797_v31 }
 0x47c   :  { %v820_v35 = vmul.f32 1.442695, %v805_v32 }
 0x47e   :  { %4799 = vpow2.f32 %v820_v35  ;;  %606 = vrot.lane.b32.xlu1 %v5347_v43, %s5167_s4 }
 0x47f   :  { %4801 = vpow2.f32 %v806_v39 }
 0x484   :  { %v4800_v36 = vpop.eup %4799 }
 0x485   :  { %v843_v37 = vsel %vm773_vm13, %v4800_v36, 0.0  ;;  %v4802_v40 = vpop.eup %4801 }
 0x486   :  { %844 = vadd.xlane.f32.xlu2 %v843_v37  ;;  %v822_v42 = vsel %vm773_vm13, %v4802_v40, 0.0 }
 0x49e   :  { %609 = vrot.lane.b32.xlu2 %v5347_v43, %s5183_s18 }
 0x4a8   :  { %823 = vadd.xlane.f32.xlu1 %v822_v42 }
 0x4b6   :  { %v833_v45 = vpop.xlane.xlu2 %832 }
 0x4b7   :  { %v830_v46 = vpop.xlane.xlu1 %829  ;;  %4803 = vrcp.f32 %v833_v45 }
 0x4b8   :  { %4805 = vrcp.f32 %v830_v46  ;;  %v4561_v46 = vld [vmem:[#allocation8 + $0x38] sm:$0xff] }
 0x4b9   :  { %4807 = vpow2.f32 %v814_v47  ;;  %v4560_v47 = vld [vmem:[#allocation8 + $0x30] sm:$0xff] }
 0x4bd   :  { %v4804_v48 = vpop.eup %4803 }
 0x4be   :  { %v4806_v49 = vpop.eup %4805  ;;  %v857_v12 = vmul.f32 %v4804_v48, %v5406_v0 }
 0x4bf   :  { %v856_v50 = vmul.f32 %v4806_v49, %v5408_v2  ;;  %v4808_v53 = vpop.eup %4807  ;;  %v4559_v49 = vld [vmem:[#allocation8 + $0x28] sm:$0xff] }
 0x4c0   :  { %v865_v51 = vpack.c.bf16 %v857_v12, %v857_v12  ;;  %v827_v43 = vpop.xlane.xlu0 %826  ;;  %v834_v41 = vsel %vm773_vm13, %v4808_v53, 0.0 }
 0x4c1   :  { %v864_v52 = vpack.c.bf16 %v856_v50, %v856_v50  ;;  %4809 = vrcp.f32 %v827_v43  ;;  %v4558_v50 = vld [vmem:[#allocation8 + $0x20] sm:$0xff]  ;;  %v4556_v43 = vld [vmem:[#allocation8 + $0x10] sm:$0xff] }
 0x4c2   :  { %3811 = vmatmul.msk.bf16.vlgmr.msrb.gmra.mxu3 %vm773_vm13, %v865_v51  ;;  %v4557_v51 = vld [vmem:[#allocation8 + $0x18] sm:$0xff] }
 0x4c3   :  { %3810 = vmatmul.msk.bf16.vlgmr.msrb.gmra.mxu2 %vm773_vm13, %v864_v52  ;;  %v4555_v52 = vld [vmem:[#allocation8 + $0x8] sm:$0xff] }
 0x4c7   :  { %v4810_v54 = vpop.eup %4809  ;;  %835 = vadd.xlane.f32.xlu2 %v834_v41 }
 0x4c8   :  { %v855_v55 = vmul.f32 %v4810_v54, %v5414_v5 }
 0x4ca   :  { %v863_v56 = vpack.c.bf16 %v855_v55, %v855_v55 }
 0x4cc   :  { %3809 = vmatmul.msk.bf16.vlgmr.msra.gmra.mxu1 %vm773_vm13, %v863_v56 }
 0x4d0   :  { %v839_v57 = vpop.xlane.xlu0 %838 }
 0x4d1   :  { %4811 = vrcp.f32 %v839_v57 }
 0x4d7   :  { %v4812_v58 = vpop.eup %4811 }
 0x4d8   :  { %v859_v60 = vmul.f32 %v4812_v58, %v4796_v19  ;;  %v842_v62 = vpop.xlane.xlu1 %841 }
 0x4d9   :  { %4813 = vrcp.f32 %v842_v62 }
 0x4da   :  { %v867_v0 = vpack.c.bf16 %v859_v60, %v859_v60 }
 0x4df   :  { %v4814_v1 = vpop.eup %4813 }
 0x4e0   :  { %v860_v33 = vmul.f32 %v4814_v1, %v4798_v28 }
 0x4e2   :  { %v868_v5 = vpack.c.bf16 %v860_v33, %v860_v33 }
 0x4e3   :  { %v604_v59 = vpop.permute.xlu0 %603 }
 0x4e4   :  { %v617_v61 = vpack.c.bf16 %v604_v59, %v604_v59 }
 0x4e6   :  { %v970_v63 = vsel %vm873_vm11, %v617_v61, 0 }
 0x4e7   :  { %979 = vmatpush.bf16.msrb.mxu1 %v970_v63 }
 0x4ea   :  { %3813 = vmatmul.msk.bf16.vlgmr.msrb.gmra.mxu1 %vm773_vm13, %v867_v0 }
 0x4f0   :  { %v607_v2 = vpop.permute.xlu1 %606 }
 0x4f1   :  { %v618_v3 = vpack.c.bf16 %v607_v2, %v607_v2 }
 0x4f3   :  { %v989_v4 = vsel %vm873_vm11, %v618_v3, 0 }
 0x4f4   :  { %998 = vmatpush.bf16.msra.mxu2 %v989_v4  ;;  %v4779_v4 = vld [vmem:[%s5993_s7] ss:$0 sm:$0xff] }
 0x4f7   :  { %3814 = vmatmul.msk.bf16.vlgmr.msra.gmra.mxu2 %vm773_vm13, %v868_v5 }
 0x4f9   :  { %v845_v7 = vpop.xlane.xlu2 %844 }
 0x4fa   :  { %4815 = vrcp.f32 %v845_v7 }
 0x500   :  { %v4816_v8 = vpop.eup %4815 }
 0x501   :  { %v610_v9 = vpop.permute.xlu2 %609  ;;  %v861_v10 = vmul.f32 %v4816_v8, %v4800_v36 }
 0x502   :  { %v619_v13 = vpack.c.bf16 %v610_v9, %v610_v9 }
 0x503   :  { %v869_v14 = vpack.c.bf16 %v861_v10, %v861_v10 }
 0x504   :  { %v1008_v11 = vsel %vm873_vm11, %v619_v13, 0 }
 0x505   :  { %1017 = vmatpush.bf16.msra.mxu3 %v1008_v11 }
 0x508   :  { %3815 = vmatmul.msk.bf16.vlgmr.msra.gmra.mxu3 %vm773_vm13, %v869_v14 }
 0x51b   :  { %v824_v15 = vpop.xlane.xlu1 %823 }
 0x51c   :  { %4817 = vrcp.f32 %v824_v15 }
 0x522   :  { %v4818_v16 = vpop.eup %4817 }
 0x523   :  { %v854_v17 = vmul.f32 %v4818_v16, %v4802_v40 }
 0x525   :  { %v862_v19 = vpack.c.bf16 %v854_v17, %v854_v17 }
 0x527   :  { %3808 = vmatmul.msk.bf16.vlgmr.msra.gmra.mxu0 %vm773_vm13, %v862_v19 }
 0x528   :  { %1124 = vmatpush.bf16.msra.mxu0 %v4561_v46  ;;  %v4587_v46 = vld [vmem:[#allocation10 + $0xcc] sm:$0xf] }
 0x52c   :  { %1125 = vmatpush.bf16.msra.mxu0 %v4560_v47  ;;  %v3956_v47 = vld [vmem:[#allocation10 + $0xd8] sm:$0xf0] }
 0x530   :  { %1126 = vmatpush.bf16.msra.mxu0 %v4559_v49  ;;  %v3930_v49 = vld [vmem:[#allocation10 + $0xa0] sm:$0xf] }
 0x534   :  { %1127 = vmatpush.bf16.msra.mxu0 %v4558_v50  ;;  %v4582_v50 = vld [vmem:[#allocation10 + $0xa4] sm:$0xf] }
 0x538   :  { %1128 = vmatpush.bf16.msra.mxu0 %v4557_v51 }
 0x53a   :  { %v836_v21 = vpop.xlane.xlu2 %835 }
 0x53b   :  { %4819 = vrcp.f32 %v836_v21  ;;  %v3962_v21 = vld [vmem:[#allocation10 + $0xe0] sm:$0xf] }
 0x53c   :  { %1129 = vmatpush.bf16.msra.mxu0 %v4556_v43  ;;  %v3932_v43 = vld [vmem:[#allocation10 + $0xb0] sm:$0xf0] }
 0x540   :  { %1130 = vmatpush.bf16.msra.mxu0 %v4555_v52  ;;  %v3938_v52 = vld [vmem:[#allocation10 + $0xa8] sm:$0xf] }
 0x541   :  { %v4820_v22 = vpop.eup %4819 }
 0x542   :  { %v858_v23 = vmul.f32 %v4820_v22, %v4808_v53  ;;  %v4554_v53 = vld [vmem:[#allocation8] sm:$0xff]  ;;  %v4592_v22 = vld [vmem:[#allocation10 + $0xec] sm:$0xf0] }
 0x544   :  { %v866_v30 = vpack.c.bf16 %v858_v23, %v858_v23  ;;  %1131 = vmatpush.bf16.msra.mxu0 %v4554_v53  ;;  %v4590_v23 = vld [vmem:[#allocation10 + $0xe4] sm:$0xf]  ;;  %v4585_v53 = vld [vmem:[#allocation10 + $0xb4] sm:$0xf0] }
 0x545   :  { %v943_v24 = vpop.f32.mrf.mxu3 }
 0x546   :  { %v924_v25 = vpop.f32.mrf.mxu2  ;;  %3812 = vmatmul.msk.bf16.vlgmr.msrb.gmra.mxu0 %vm773_vm13, %v866_v30  ;;  %v3963_v30 = vor.u32 %v4592_v22, %v3962_v21  ;;  %v3908_v21 = vld [vmem:[#allocation10 + $0x78] sm:$0xf0] }
 0x548   :  { %1389 = vmatpush.bf16.msra.mxu1 %v3963_v30  ;;  %v4572_v30 = vld [vmem:[#allocation10 + $0x4c] sm:$0xf0] }
 0x549   :  { %v905_v26 = vpop.f32.mrf.mxu1 }
 0x54d   :  { %v945_v28 = vpop.f32.mrf.mxu3 }
 0x54e   :  { %v926_v34 = vpop.f32.mrf.mxu2 }
 0x551   :  { %v907_v29 = vpop.f32.mrf.mxu1 }
 0x552   :  { %v4591_v29 = vld [vmem:[#allocation10 + $0xec] sm:$0xf] }
 0x567   :  { %v981_v31 = vpop.f32.mrf.mxu1 }
 0x568   :  { %v4749_v32 = vpack.i.bf16 %v981_v31, %v905_v26  ;;  %v4593_v26 = vld [vmem:[#allocation10 + $0xf4] sm:$0xf0]  ;;  %v3972_v31 = vld [vmem:[#allocation10 + $0xf8] sm:$0xf0] }
 0x56a   :  { %4750 = vrot.lane.b32.xlu0 %v4749_v32, %s5183_s18  ;;  %v3975_v32 = vor.u32 %v4591_v29, %v3972_v31 }
 0x56c   :  { %1431 = vmatpush.bf16.msrb.mxu0 %v3975_v32  ;;  %v4571_v32 = vld [vmem:[#allocation10 + $0x4c] sm:$0xf] }
 0x56f   :  { %v983_v35 = vpop.f32.mrf.mxu1 }
 0x570   :  { %v3946_v35 = vld [vmem:[#allocation10 + $0xc0] sm:$0xf] }
 0x57a   :  { %v1000_v36 = vpop.f32.mrf.mxu2 }
 0x57b   :  { %v4754_v37 = vpack.i.bf16 %v1000_v36, %v924_v25  ;;  %v3970_v25 = vld [vmem:[#allocation10 + $0xe8] sm:$0xf]  ;;  %v4588_v36 = vld [vmem:[#allocation10 + $0xcc] sm:$0xf0] }
 0x57c   :  { %v3971_v34 = vor.u32 %v4593_v26, %v3970_v25  ;;  %v3884_v26 = vld [vmem:[#allocation10 + $0x50] sm:$0xf0] }
 0x57d   :  { %4755 = vrot.lane.b32.xlu0 %v4754_v37, %s5167_s4  ;;  %v4586_v37 = vld [vmem:[#allocation10 + $0xc4] sm:$0xf] }
 0x57e   :  { %1417 = vmatpush.bf16.msrb.mxu3 %v3971_v34  ;;  %v4573_v34 = vld [vmem:[#allocation10 + $0x54] sm:$0xf0] }
 0x582   :  { %v1002_v38 = vpop.f32.mrf.mxu2 }
 0x583   :  { %v3947_v38 = vor.u32 %v4588_v36, %v3946_v35  ;;  %v3892_v35 = vld [vmem:[#allocation10 + $0x58] sm:$0xf0] }
 0x584   :  { %v3895_v36 = vor.u32 %v4571_v32, %v3892_v35  ;;  %v4601_v35 = vld [vmem:[#allocation13 + $0x38] sm:$0xff] }
 0x585   :  { %1390 = vmatpush.bf16.msra.mxu1 %v3947_v38  ;;  %v4568_v38 = vld [vmem:[#allocation10 + $0x2c] sm:$0xf0] }
 0x58b   :  { %v1019_v39 = vpop.f32.mrf.mxu3 }
 0x58c   :  { %v4759_v40 = vpack.i.bf16 %v1019_v39, %v943_v24  ;;  %v3964_v24 = vld [vmem:[#allocation10 + $0xf0] sm:$0xf0] }
 0x58d   :  { %v3967_v28 = vor.u32 %v4590_v23, %v3964_v24  ;;  %v3948_v39 = vld [vmem:[#allocation10 + $0xd0] sm:$0xf0]  ;;  %v3882_v23 = vld [vmem:[#allocation10 + $0x40] sm:$0xf]  ;;  %v4570_v24 = vld [vmem:[#allocation10 + $0x44] sm:$0xf] }
 0x58e   :  { %4760 = vrot.lane.b32.xlu0 %v4759_v40, %s5184_s19  ;;  %v3954_v40 = vld [vmem:[#allocation10 + $0xc8] sm:$0xf]  ;;  %v3883_v25 = vor.u32 %v4572_v30, %v3882_v23  ;;  %v3887_v29 = vor.u32 %v4570_v24, %v3884_v26 }
 0x58f   :  { %1403 = vmatpush.bf16.msrb.mxu2 %v3967_v28  ;;  %v3890_v28 = vld [vmem:[#allocation10 + $0x48] sm:$0xf] }
 0x590   :  { %v3891_v31 = vor.u32 %v4573_v34, %v3890_v28 }
 0x593   :  { %v1021_v42 = vpop.f32.mrf.mxu3 }
 0x594   :  { %v4589_v42 = vld [vmem:[#allocation10 + $0xd4] sm:$0xf0] }
 0x5a4   :  { %v886_v44 = vpop.f32.mrf.mxu0 }
 0x5ac   :  { %v888_v45 = vpop.f32.mrf.mxu0 }
 0x5ad   :  { %v3955_v45 = vor.u32 %v4589_v42, %v3954_v40  ;;  %v3868_v42 = vld [vmem:[#allocation10 + $0x30] sm:$0xf0] }
 0x5af   :  { %1418 = vmatpush.bf16.msrb.mxu3 %v3955_v45  ;;  %v4569_v45 = vld [vmem:[#allocation10 + $0x34] sm:$0xf0] }
 0x5c3   :  { %v962_v48 = vpop.f32.mrf.mxu0 }
 0x5cb   :  { %v964_v12 = vpop.f32.mrf.mxu0 }
 0x5cc   :  { %v4584_v12 = vld [vmem:[#allocation10 + $0xac] sm:$0xf0] }
 0x5cd   :  { %v3931_v51 = vor.u32 %v4584_v12, %v3930_v49  ;;  %v4567_v49 = vld [vmem:[#allocation10 + $0x2c] sm:$0xf]  ;;  %v3876_v12 = vld [vmem:[#allocation10 + $0x38] sm:$0xf0] }
 0x5cf   :  { %1391 = vmatpush.bf16.msra.mxu1 %v3931_v51 }
 0x5dc   :  { %v4751_v41 = vpop.permute.xlu0 %4750 }
 0x5dd   :  { %v4753_v55 = vunpack.i.h.bf16 %v4751_v41  ;;  %v4752_v56 = vunpack.i.l.bf16 %v4751_v41  ;;  %v3935_v41 = vor.u32 %v4582_v50, %v3932_v43  ;;  %v3850_v50 = vld [vmem:[#allocation10] sm:$0xf]  ;;  %v3879_v43 = vor.u32 %v4567_v49, %v3876_v12 }
 0x5de   :  { %v4609_v49 = vld [vmem:[#allocation13 + $0x78] sm:$0xff] }
 0x5df   :  { %v1052_v60 = vsel %vm620_vm10, %v962_v48, %v4753_v55  ;;  %v1035_v61 = vsel %vm620_vm10, %v886_v44, %v4752_v56  ;;  %v3951_v44 = vor.u32 %v4586_v37, %v3948_v39  ;;  %v3959_v48 = vor.u32 %v4587_v46, %v3956_v47  ;;  %v4583_v55 = vld [vmem:[#allocation10 + $0xac] sm:$0xf]  ;;  %v3940_v56 = vld [vmem:[#allocation10 + $0xb8] sm:$0xf0]  ;;  %v3866_v37 = vld [vmem:[#allocation10 + $0x20] sm:$0xf] }
 0x5e0   :  { %v4566_v39 = vld [vmem:[#allocation10 + $0x24] sm:$0xf]  ;;  %v3867_v40 = vor.u32 %v4568_v38, %v3866_v37 }
 0x5e1   :  { %1404 = vmatpush.bf16.msrb.mxu2 %v3951_v44  ;;  %1432 = vmatpush.bf16.msrb.mxu0 %v3959_v48  ;;  %v3874_v44 = vld [vmem:[#allocation10 + $0x28] sm:$0xf]  ;;  %v3871_v47 = vor.u32 %v4566_v39, %v3868_v42  ;;  %v4617_v12 = vld [vmem:[#allocation13 + $0xb8] sm:$0xff] }
 0x5e2   :  { %v3875_v48 = vor.u32 %v4569_v45, %v3874_v44  ;;  %v4600_v44 = vld [vmem:[#allocation13 + $0x30] sm:$0xff] }
 0x5e3   :  { %v4624_v45 = vld [vmem:[#allocation13 + $0xf0] sm:$0xff] }
 0x5e5   :  { %1405 = vmatpush.bf16.msrb.mxu2 %v3935_v41  ;;  %v3852_v41 = vld [vmem:[#allocation10 + $0x10] sm:$0xf0] }
 0x5ef   :  { %v4756_v54 = vpop.permute.xlu0 %4755 }
 0x5f0   :  { %v4758_v57 = vunpack.i.h.bf16 %v4756_v54  ;;  %v4757_v58 = vunpack.i.l.bf16 %v4756_v54  ;;  %v3939_v54 = vor.u32 %v4585_v53, %v3938_v52  ;;  %v4564_v52 = vld [vmem:[#allocation10 + $0xc] sm:$0xf0]  ;;  %v4562_v53 = vld [vmem:[#allocation10 + $0x4] sm:$0xf] }
 0x5f2   :  { %v1037_v0 = vsel %vm1036_vm14, %v1035_v61, %v4757_v58  ;;  %v1053_v1 = vsel %vm1036_vm14, %v1052_v60, %v4758_v57  ;;  %v3943_v57 = vor.u32 %v4583_v55, %v3940_v56  ;;  %1419 = vmatpush.bf16.msrb.mxu3 %v3939_v54  ;;  %v3914_v58 = vld [vmem:[#allocation10 + $0x80] sm:$0xf]  ;;  %v4578_v60 = vld [vmem:[#allocation10 + $0x84] sm:$0xf]  ;;  %v3851_v54 = vor.u32 %v4564_v52, %v3850_v50  ;;  %v3858_v56 = vld [vmem:[#allocation10 + $0x8] sm:$0xf] }
 0x5f3   :  { %v3855_v55 = vor.u32 %v4562_v53, %v3852_v41  ;;  %v4599_v53 = vld [vmem:[#allocation13 + $0x28] sm:$0xff] }
 0x5f4   :  { %1433 = vmatpush.bf16.msrb.mxu0 %v3943_v57  ;;  %v4565_v57 = vld [vmem:[#allocation10 + $0x14] sm:$0xf0]  ;;  %v4623_v41 = vld [vmem:[#allocation13 + $0xe8] sm:$0xff] }
 0x600   :  { %v4761_v59 = vpop.permute.xlu0 %4760 }
 0x601   :  { %v4763_v62 = vunpack.i.h.bf16 %v4761_v59  ;;  %v4762_v63 = vunpack.i.l.bf16 %v4761_v59  ;;  %v4580_v59 = vld [vmem:[#allocation10 + $0x8c] sm:$0xf0] }
 0x602   :  { %v3915_v61 = vor.u32 %v4580_v59, %v3914_v58  ;;  %v4563_v58 = vld [vmem:[#allocation10 + $0xc] sm:$0xf] }
 0x603   :  { %v1039_v2 = vsel %vm1038_vm15, %v1037_v0, %v4762_v63  ;;  %v1054_v33 = vsel %vm1038_vm15, %v1053_v1, %v4763_v62  ;;  %v3916_v62 = vld [vmem:[#allocation10 + $0x90] sm:$0xf0]  ;;  %v3922_v63 = vld [vmem:[#allocation10 + $0x88] sm:$0xf]  ;;  %v4581_v0 = vld [vmem:[#allocation10 + $0x94] sm:$0xf0] }
 0x604   :  { %v1055_v3 = vpack.c.bf16 %v1054_v33, %v1039_v2  ;;  %v3919_v1 = vor.u32 %v4578_v60, %v3916_v62  ;;  %v3923_v2 = vor.u32 %v4581_v0, %v3922_v63  ;;  %v4579_v33 = vld [vmem:[#allocation10 + $0x8c] sm:$0xf]  ;;  %1392 = vmatpush.bf16.msra.mxu1 %v3915_v61  ;;  %v3859_v60 = vor.u32 %v4565_v57, %v3858_v56  ;;  %v3860_v61 = vld [vmem:[#allocation10 + $0x18] sm:$0xf0] }
 0x605   :  { %v3863_v62 = vor.u32 %v4563_v58, %v3860_v61 }
 0x606   :  { %1132 = vmatmul.bf16.vlgmr.msra.gmra.mxu0 %v1055_v3  ;;  %v3924_v3 = vld [vmem:[#allocation10 + $0x98] sm:$0xf0]  ;;  %1406 = vmatpush.bf16.msrb.mxu2 %v3919_v1 }
 0x607   :  { %1420 = vmatpush.bf16.msrb.mxu3 %v3923_v2 }
 0x683   :  { %v1133_v5 = vpop.f32.mrf.mxu0 }
 0x684   :  { %v1134_v7 = vadd.f32 %v4779_v4, %v1133_v5  ;;  %v3898_v5 = vld [vmem:[#allocation10 + $0x60] sm:$0xf] }
 0x686   :  { %v5461_v8 = vadd.f32 %v1134_v7, %v5309_v18  ;;  %v4576_v7 = vld [vmem:[#allocation10 + $0x6c] sm:$0xf0] }
 0x688   :  { %1140 = vadd.xlane.f32.xlu0 %v5461_v8 }
 0x68b   :  { %v1135_v9 = vpop.f32.mrf.mxu0 }
 0x68c   :  { %v1136_v10 = vadd.f32 %v4779_v4, %v1135_v9  ;;  %v3927_v4 = vor.u32 %v4579_v33, %v3924_v3  ;;  %v4574_v9 = vld [vmem:[#allocation10 + $0x64] sm:$0xf] }
 0x68e   :  { %v5465_v13 = vadd.f32 %v1136_v10, %v5312_v20  ;;  %1434 = vmatpush.bf16.msrb.mxu0 %v3927_v4  ;;  %v3899_v10 = vor.u32 %v4576_v7, %v3898_v5 }
 0x690   :  { %1142 = vadd.xlane.f32.xlu1 %v5465_v13  ;;  %1393 = vmatpush.bf16.msra.mxu1 %v3899_v10 }
 0x694   :  { %1394 = vmatpush.bf16.msra.mxu1 %v3883_v25 }
 0x698   :  { %1395 = vmatpush.bf16.msra.mxu1 %v3867_v40 }
 0x69c   :  { %1396 = vmatpush.bf16.msra.mxu1 %v3851_v54 }
 0x6a0   :  { %1877 = vmatpush.bf16.msrb.mxu1 %v4601_v35 }
 0x6a4   :  { %1878 = vmatpush.bf16.msrb.mxu1 %v4600_v44 }
 0x6a8   :  { %1879 = vmatpush.bf16.msrb.mxu1 %v4599_v53 }
 0x6fb   :  { %v1141_v11 = vpop.xlane.xlu0 %1140 }
 0x6fc   :  { %v1144_v14 = vmul.f32 %v1141_v11, %v5315_v27  ;;  %v3900_v11 = vld [vmem:[#allocation10 + $0x70] sm:$0xf0] }
 0x6fe   :  { %v5470_v15 = vsub.f32 %v5461_v8, %v1144_v14  ;;  %v3906_v14 = vld [vmem:[#allocation10 + $0x68] sm:$0xf] }
 0x700   :  { %v1148_v16 = vmul.f32 %v5470_v15, %v5470_v15 }
 0x702   :  { %1150 = vadd.xlane.f32.xlu2 %v1148_v16  ;;  %v4577_v16 = vld [vmem:[#allocation10 + $0x74] sm:$0xf0] }
 0x703   :  { %v1143_v18 = vpop.xlane.xlu1 %1142 }
 0x704   :  { %v1145_v17 = vmul.f32 %v1143_v18, %v5315_v27  ;;  %v3903_v18 = vor.u32 %v4574_v9, %v3900_v11 }
 0x706   :  { %v5476_v19 = vsub.f32 %v5465_v13, %v1145_v17  ;;  %v3907_v17 = vor.u32 %v4577_v16, %v3906_v14  ;;  %1407 = vmatpush.bf16.msrb.mxu2 %v3903_v18 }
 0x708   :  { %v1149_v20 = vmul.f32 %v5476_v19, %v5476_v19  ;;  %1421 = vmatpush.bf16.msrb.mxu3 %v3907_v17 }
 0x70a   :  { %1152 = vadd.xlane.f32.xlu1 %v1149_v20  ;;  %v4575_v20 = vld [vmem:[#allocation10 + $0x6c] sm:$0xf]  ;;  %1408 = vmatpush.bf16.msrb.mxu2 %v3887_v29 }
 0x70b   :  { %v3911_v22 = vor.u32 %v4575_v20, %v3908_v21  ;;  %v4933_v20 = vld [vmem:[%s5989_s3] sm:$0xf] }
 0x70c   :  { %1422 = vmatpush.bf16.msrb.mxu3 %v3891_v31  ;;  %v1180_v21 = vperm.slane %v4933_v20, 2  ;;  %v1183_v25 = vperm.slane %v4933_v20, 3  ;;  %v4597_v20 = vld [vmem:[#allocation13 + $0x18] sm:$0xff] }
 0x70d   :  { %1435 = vmatpush.bf16.msrb.mxu0 %v3911_v22 }
 0x70e   :  { %1409 = vmatpush.bf16.msrb.mxu2 %v3871_v47 }
 0x710   :  { %1423 = vmatpush.bf16.msrb.mxu3 %v3875_v48 }
 0x711   :  { %1436 = vmatpush.bf16.msrb.mxu0 %v3895_v36  ;;  %v4625_v36 = vld [vmem:[#allocation13 + $0xf8] sm:$0xff] }
 0x712   :  { %1410 = vmatpush.bf16.msrb.mxu2 %v3855_v55 }
 0x714   :  { %1424 = vmatpush.bf16.msrb.mxu3 %v3859_v60  ;;  %v4616_v60 = vld [vmem:[#allocation13 + $0xb0] sm:$0xff] }
 0x715   :  { %1437 = vmatpush.bf16.msrb.mxu0 %v3879_v43 }
 0x716   :  { %1891 = vmatpush.bf16.msra.mxu2 %v4609_v49 }
 0x718   :  { %1905 = vmatpush.bf16.msra.mxu3 %v4617_v12  ;;  %v4604_v12 = vld [vmem:[#allocation13 + $0x50] sm:$0xff] }
 0x719   :  { %1438 = vmatpush.bf16.msrb.mxu0 %v3863_v62 }
 0x71c   :  { %1906 = vmatpush.bf16.msra.mxu3 %v4616_v60 }
 0x71d   :  { %1919 = vmatpush.bf16.msra.mxu0 %v4625_v36 }
 0x721   :  { %1920 = vmatpush.bf16.msra.mxu0 %v4624_v45 }
 0x725   :  { %1921 = vmatpush.bf16.msra.mxu0 %v4623_v41  ;;  %v4594_v41 = vld [vmem:[#allocation13] sm:$0xff] }
 0x775   :  { %v1151_v46 = vpop.xlane.xlu2 %1150 }
 0x776   :  { %v1154_v51 = vmul.f32 %v1151_v46, %v5315_v27 }
 0x778   :  { %v1156_v59 = vadd.f32 1e-05, %v1154_v51 }
 0x77a   :  { %4821 = vrsqrt.f32 %v1156_v59  ;;  %vm1164_vm1 = vweird.f32 %v1156_v59 }
 0x77d   :  { %v1153_v63 = vpop.xlane.xlu1 %1152 }
 0x77e   :  { %v1155_v0 = vmul.f32 %v1153_v63, %v5315_v27 }
 0x780   :  { %v4822_v1 = vpop.eup %4821  ;;  %v1157_v2 = vadd.f32 1e-05, %v1155_v0 }
 0x781   :  { %v1159_v33 = vmul.f32 %v4822_v1, %v1156_v59  ;;  %vm1165_vm0 = vweird.f32 %v4822_v1  ;;  %v4608_v59 = vld [vmem:[#allocation13 + $0x70] sm:$0xff] }
 0x782   :  { %4823 = vrsqrt.f32 %v1157_v2  ;;  %vm1166_vm2 = vmor %vm1164_vm1, %vm1165_vm0  ;;  %vm1174_vm4 = vweird.f32 %v1157_v2  ;;  %1892 = vmatpush.bf16.msra.mxu2 %v4608_v59 }
 0x783   :  { %v1160_v3 = vmul.f32 %v4822_v1, %v1159_v33 }
 0x785   :  { %v1161_v4 = vmul.f32 0.5, %v1160_v3 }
 0x787   :  { %v1162_v5 = vsub.f32 1.5, %v1161_v4 }
 0x788   :  { %v4824_v7 = vpop.eup %4823 }
 0x789   :  { %v1163_v9 = vmul.f32 %v4822_v1, %v1162_v5  ;;  %v1169_v10 = vmul.f32 %v4824_v7, %v1157_v2  ;;  %vm1175_vm3 = vweird.f32 %v4824_v7  ;;  %v4622_v2 = vld [vmem:[#allocation13 + $0xe0] sm:$0xff]  ;;  %v4607_v5 = vld [vmem:[#allocation13 + $0x68] sm:$0xff] }
 0x78a   :  { %vm1176_vm5 = vmor %vm1174_vm4, %vm1175_vm3  ;;  %1922 = vmatpush.bf16.msra.mxu0 %v4622_v2  ;;  %1893 = vmatpush.bf16.msra.mxu2 %v4607_v5 }
 0x78b   :  { %v1170_v11 = vmul.f32 %v4824_v7, %v1169_v10  ;;  %v1167_v14 = vsel %vm1166_vm2, %v4822_v1, %v1163_v9  ;;  %v4598_v1 = vld [vmem:[#allocation13 + $0x20] sm:$0xff] }
 0x78c   :  { %v1178_v17 = vmul.f32 %v1167_v14, %v5470_v15  ;;  %v5487_v15 = vld [vmem:[#allocation11] sm:$0xf]  ;;  %1880 = vmatpush.bf16.msrb.mxu1 %v4598_v1 }
 0x78d   :  { %v1171_v16 = vmul.f32 0.5, %v1170_v11  ;;  %v1221_v31 = vperm.slane %v5487_v15, 0  ;;  %v1224_v32 = vperm.slane %v5487_v15, 3  ;;  %v1222_v42 = vperm.slane %v5487_v15, 1 }
 0x78e   :  { %v1181_v24 = vmul.f32 %v1180_v21, %v1178_v17  ;;  %v1223_v47 = vperm.slane %v5487_v15, 2 }
 0x78f   :  { %v1172_v18 = vsub.f32 1.5, %v1171_v16 }
 0x790   :  { %v1184_v28 = vadd.f32 %v1183_v25, %v1181_v24  ;;  %1881 = vmatpush.bf16.msrb.mxu1 %v4597_v20 }
 0x791   :  { %v1173_v22 = vmul.f32 %v4824_v7, %v1172_v18 }
 0x793   :  { %v1177_v23 = vsel %vm1176_vm5, %v4824_v7, %v1173_v22  ;;  %v4615_v7 = vld [vmem:[#allocation13 + $0xa8] sm:$0xff]  ;;  %v4606_v22 = vld [vmem:[#allocation13 + $0x60] sm:$0xff] }
 0x794   :  { %v1179_v30 = vmul.f32 %v1177_v23, %v5476_v19  ;;  %1907 = vmatpush.bf16.msra.mxu3 %v4615_v7  ;;  %v4614_v23 = vld [vmem:[#allocation13 + $0xa0] sm:$0xff]  ;;  %1894 = vmatpush.bf16.msra.mxu2 %v4606_v22 }
 0x796   :  { %v1182_v26 = vmul.f32 %v1180_v21, %v1179_v30  ;;  %v4621_v21 = vld [vmem:[#allocation13 + $0xd8] sm:$0xff] }
 0x797   :  { %1923 = vmatpush.bf16.msra.mxu0 %v4621_v21 }
 0x798   :  { %v1185_v34 = vadd.f32 %v1183_v25, %v1182_v26  ;;  %1908 = vmatpush.bf16.msra.mxu3 %v4614_v23  ;;  %v4596_v25 = vld [vmem:[#allocation13 + $0x10] sm:$0xff] }
 0x799   :  { %v4620_v26 = vld [vmem:[#allocation13 + $0xd0] sm:$0xff]  ;;  %1882 = vmatpush.bf16.msrb.mxu1 %v4596_v25 }
 0x79a   :  { %v1186_v29 = vpack.c.bf16 %v1185_v34, %v1184_v28 }
 0x79b   :  { %1924 = vmatpush.bf16.msra.mxu0 %v4620_v26 }
 0x79c   :  { %1397 = vmatmul.bf16.vlgmr.msra.gmra.mxu1 %v1186_v29  ;;  %1411 = vmatmul.bf16.vlgmr.msrb.gmra.mxu2 %v1186_v29 }
 0x79d   :  { %1425 = vmatmul.bf16.vlgmr.msrb.gmra.mxu3 %v1186_v29  ;;  %1439 = vmatmul.bf16.vlgmr.msrb.gmra.mxu0 %v1186_v29  ;;  %v4605_v29 = vld [vmem:[#allocation13 + $0x58] sm:$0xff] }
 0x79e   :  { %1895 = vmatpush.bf16.msra.mxu2 %v4605_v29 }
 0x7a2   :  { %1896 = vmatpush.bf16.msra.mxu2 %v4604_v12 }
 0x819   :  { %v1398_v37 = vpop.f32.mrf.mxu1 }
 0x81a   :  { %v5491_v19 = vadd.f32 %v1398_v37, %v1221_v31  ;;  %v1440_v38 = vpop.f32.mrf.mxu0 }
 0x81b   :  { %v5493_v39 = vadd.f32 %v1440_v38, %v1224_v32  ;;  %v4595_v38 = vld [vmem:[#allocation13 + $0x8] sm:$0xff] }
 0x81c   :  { %v3976_v40 = vmul.f32 -1.702, %v5491_v19  ;;  %1883 = vmatpush.bf16.msrb.mxu1 %v4595_v38 }
 0x81d   :  { %v3979_v46 = vmul.f32 -1.702, %v5493_v39 }
 0x81e   :  { %v1461_v48 = vmul.f32 1.442695, %v3976_v40  ;;  %v4619_v40 = vld [vmem:[#allocation13 + $0xc8] sm:$0xff] }
 0x81f   :  { %v1467_v50 = vmul.f32 1.442695, %v3979_v46  ;;  %v1412_v51 = vpop.f32.mrf.mxu2  ;;  %1925 = vmatpush.bf16.msra.mxu0 %v4619_v40 }
 0x820   :  { %4825 = vpow2.f32 %v1461_v48  ;;  %v5499_v43 = vadd.f32 %v1412_v51, %v1222_v42  ;;  %v1426_v52 = vpop.f32.mrf.mxu3  ;;  %v4612_v51 = vld [vmem:[#allocation13 + $0x90] sm:$0xff]  ;;  %1884 = vmatpush.bf16.msrb.mxu1 %v4594_v41 }
 0x821   :  { %4827 = vpow2.f32 %v1467_v50  ;;  %v5503_v54 = vadd.f32 %v1426_v52, %v1223_v47  ;;  %v1400_v55 = vpop.f32.mrf.mxu1 }
 0x822   :  { %v3977_v56 = vmul.f32 -1.702, %v5499_v43  ;;  %v5506_v57 = vadd.f32 %v1400_v55, %v1221_v31  ;;  %v1442_v58 = vpop.f32.mrf.mxu0  ;;  %v4613_v31 = vld [vmem:[#allocation13 + $0x98] sm:$0xff]  ;;  %v4618_v55 = vld [vmem:[#allocation13 + $0xc0] sm:$0xff] }
 0x823   :  { %v3978_v61 = vmul.f32 -1.702, %v5503_v54  ;;  %v5509_v62 = vadd.f32 %v1442_v58, %v1224_v32  ;;  %1909 = vmatpush.bf16.msra.mxu3 %v4613_v31  ;;  %1926 = vmatpush.bf16.msra.mxu0 %v4618_v55 }
 0x824   :  { %v1463_v63 = vmul.f32 1.442695, %v3977_v56  ;;  %v3980_v0 = vmul.f32 -1.702, %v5506_v57 }
 0x825   :  { %v3983_v33 = vmul.f32 -1.702, %v5509_v62  ;;  %v1465_v18 = vmul.f32 1.442695, %v3978_v61  ;;  %v4603_v61 = vld [vmem:[#allocation13 + $0x48] sm:$0xff] }
 0x826   :  { %v4826_v3 = vpop.eup %4825  ;;  %4829 = vpow2.f32 %v1463_v63  ;;  %v1469_v4 = vmul.f32 1.442695, %v3980_v0  ;;  %v4611_v63 = vld [vmem:[#allocation13 + $0x88] sm:$0xff]  ;;  %1897 = vmatpush.bf16.msra.mxu2 %v4603_v61 }
 0x827   :  { %v4828_v9 = vpop.eup %4827  ;;  %v5513_v10 = vadd.f32 1.0, %v4826_v3  ;;  %v1475_v11 = vmul.f32 1.442695, %v3983_v33  ;;  %v1414_v14 = vpop.f32.mrf.mxu2  ;;  %1910 = vmatpush.bf16.msra.mxu3 %v4612_v51 }
 0x828   :  { %v5515_v16 = vadd.f32 1.0, %v4828_v9  ;;  %4831 = vpow2.f32 %v1469_v4  ;;  %v5517_v17 = vadd.f32 %v1414_v14, %v1222_v42  ;;  %v1428_v49 = vpop.f32.mrf.mxu3  ;;  %v4602_v9 = vld [vmem:[#allocation13 + $0x40] sm:$0xff] }
 0x829   :  { %4833 = vrcp.f32 %v5513_v10  ;;  %v5545_v59 = vadd.f32 %v1428_v49, %v1223_v47  ;;  %v1494_v60 = vand.u32 2147483647, %v5513_v10  ;;  %v1496_v0 = vand.u32 2147483648, %v5513_v10 }
 0x82a   :  { %4835 = vrcp.f32 %v5515_v16  ;;  %v3981_v30 = vmul.f32 -1.702, %v5517_v17  ;;  %v1539_v1 = vand.u32 2147483647, %v5515_v16  ;;  %v1541_v3 = vand.u32 2147483648, %v5515_v16  ;;  %1898 = vmatpush.bf16.msra.mxu2 %v4602_v9 }
 0x82b   :  { %4837 = vpow2.f32 %v1475_v11  ;;  %v3982_v4 = vmul.f32 -1.702, %v5545_v59  ;;  %1911 = vmatpush.bf16.msra.mxu3 %v4611_v63  ;;  %vm1490_vm7 = vweird.f32 %v5513_v10  ;;  %vm5560_vm8 = vcmp.eq.f32.partialorder %v1494_v60, 8.507059e+37  ;;  %v4610_v11 = vld [vmem:[#allocation13 + $0x80] sm:$0xff] }
 0x82c   :  { %v4830_v24 = vpop.eup %4829  ;;  %4839 = vpow2.f32 %v1465_v18  ;;  %v1471_v35 = vmul.f32 1.442695, %v3981_v30  ;;  %vm1535_vm9 = vweird.f32 %v5515_v16  ;;  %v1497_v18 = vor.u32 1.1754944e-38, %v1496_v0 }
 0x82d   :  { %v5522_v28 = vadd.f32 1.0, %v4830_v24  ;;  %vm5572_vm1 = vcmp.eq.f32.partialorder %v1539_v1, 8.507059e+37  ;;  %v1542_v25 = vor.u32 1.1754944e-38, %v1541_v3  ;;  %v1473_v29 = vmul.f32 1.442695, %v3982_v4 }
 0x82e   :  { %v4832_v34 = vpop.eup %4831 }
 0x82f   :  { %v5524_v32 = vpop.eup %4833  ;;  %4841 = vrcp.f32 %v5522_v28  ;;  %v5533_v48 = vadd.f32 1.0, %v4832_v34  ;;  %1912 = vmatpush.bf16.msra.mxu3 %v4610_v11 }
 0x830   :  { %v5527_v36 = vpop.eup %4835  ;;  %v1486_v37 = vmul.f32 %v5524_v32, %v5513_v10  ;;  %4843 = vpow2.f32 %v1471_v35  ;;  %vm1491_vm6 = vweird.f32 %v5524_v32 }
 0x831   :  { %v4838_v42 = vpop.eup %4837  ;;  %v1531_v44 = vmul.f32 %v5527_v36, %v5515_v16  ;;  %4845 = vrcp.f32 %v5533_v48  ;;  %vm5567_vm12 = vmor %vm1490_vm7, %vm1491_vm6  ;;  %vm1536_vm0 = vweird.f32 %v5527_v36  ;;  %vm1550_vm2 = vweird.f32 %v5533_v48 }
 0x832   :  { %v4840_v45 = vpop.eup %4839  ;;  %v1487_v46 = vsub.f32 1.0, %v1486_v37  ;;  %v5535_v50 = vadd.f32 1.0, %v4838_v42  ;;  %v1554_v31 = vand.u32 2147483647, %v5533_v48  ;;  %v1556_v35 = vand.u32 2147483648, %v5533_v48  ;;  %vm5596_vm3 = vmor %vm1535_vm9, %vm1536_vm0 }
 0x833   :  { %v1532_v53 = vsub.f32 1.0, %v1531_v44  ;;  %v5541_v58 = vadd.f32 1.0, %v4840_v45 }
 0x834   :  { %v1488_v52 = vmul.f32 %v5524_v32, %v1487_v46  ;;  %4847 = vrcp.f32 %v5535_v50  ;;  %v1599_v46 = vand.u32 2147483647, %v5535_v50  ;;  %v1601_v49 = vand.u32 2147483648, %v5535_v50 }
 0x835   :  { %v5539_v56 = vpop.eup %4841  ;;  %v1533_v15 = vmul.f32 %v5527_v36, %v1532_v53  ;;  %4849 = vrcp.f32 %v5541_v58  ;;  %vm1595_vm9 = vweird.f32 %v5535_v50 }
 0x836   :  { %v1489_v2 = vadd.f32 %v5524_v32, %v1488_v52  ;;  %v1501_v47 = vmul.f32 %v5539_v56, %v5522_v28  ;;  %v4844_v33 = vpop.eup %4843  ;;  %vm1506_vm6 = vweird.f32 %v5539_v56  ;;  %v1602_v0 = vor.u32 1.1754944e-38, %v1601_v49 }
 0x837   :  { %v4846_v5 = vpop.eup %4845  ;;  %v1534_v23 = vadd.f32 %v5527_v36, %v1533_v15  ;;  %v5581_v24 = vadd.f32 1.0, %v4844_v33  ;;  %vm1600_vm0 = vcmp.eq.f32.partialorder %v1599_v46, 8.507059e+37 }
 0x838   :  { %v1546_v10 = vmul.f32 %v4846_v5, %v5533_v48  ;;  %v1493_v22 = vsel %vm5567_vm12, %v5524_v32, %v1489_v2  ;;  %v1502_v30 = vsub.f32 1.0, %v1501_v47  ;;  %vm1551_vm4 = vweird.f32 %v4846_v5 }
 0x839   :  { %4851 = vrcp.f32 %v5581_v24  ;;  %v1498_v37 = vsel %vm5560_vm8, %v1497_v18, %v1493_v22  ;;  %v1538_v44 = vsel %vm5596_vm3, %v5527_v36, %v1534_v23  ;;  %vm1552_vm7 = vmor %vm1550_vm2, %vm1551_vm4  ;;  %vm1555_vm8 = vcmp.eq.f32.partialorder %v1554_v31, 8.507059e+37 }
 0x83a   :  { %v4848_v21 = vpop.eup %4847  ;;  %v1547_v26 = vsub.f32 1.0, %v1546_v10  ;;  %v1503_v45 = vmul.f32 %v5539_v56, %v1502_v30  ;;  %4853 = vpow2.f32 %v1473_v29  ;;  %v1557_v36 = vor.u32 1.1754944e-38, %v1556_v35 }
 0x83b   :  { %v1591_v34 = vmul.f32 %v4848_v21, %v5535_v50  ;;  %v5588_v32 = vpop.eup %4849  ;;  %vm1596_vm5 = vweird.f32 %v4848_v21  ;;  %v1605_v52 = vmul.f32 %v1498_v37, %v5491_v19  ;;  %v1543_v60 = vsel %vm5572_vm1, %v1542_v25, %v1538_v44 }
 0x83c   :  { %v1548_v40 = vmul.f32 %v4846_v5, %v1547_v26  ;;  %v1516_v16 = vmul.f32 %v5588_v32, %v5541_v58  ;;  %v1504_v61 = vadd.f32 %v5539_v56, %v1503_v45  ;;  %vm1597_vm12 = vmor %vm1595_vm9, %vm1596_vm5  ;;  %vm1505_vm2 = vweird.f32 %v5522_v28 }
 0x83d   :  { %v1592_v42 = vsub.f32 1.0, %v1591_v34  ;;  %v1509_v50 = vand.u32 2147483647, %v5522_v28  ;;  %v1511_v2 = vand.u32 2147483648, %v5522_v28  ;;  %v1608_v33 = vmul.f32 %v1543_v60, %v5493_v39  ;;  %vm5625_vm1 = vmor %vm1505_vm2, %vm1506_vm6 }
 0x83e   :  { %v1549_v12 = vadd.f32 %v4846_v5, %v1548_v40  ;;  %v1508_v7 = vsel %vm5625_vm1, %v5539_v56, %v1504_v61  ;;  %v1517_v9 = vsub.f32 1.0, %v1516_v16  ;;  %v1571_v28 = vand.u32 2147483648, %v5581_v24 }
 0x83f   :  { %v1593_v51 = vmul.f32 %v4848_v21, %v1592_v42  ;;  %v4852_v55 = vpop.eup %4851  ;;  %v1569_v18 = vand.u32 2147483647, %v5581_v24  ;;  %v1512_v20 = vor.u32 1.1754944e-38, %v1511_v2  ;;  %vm1510_vm4 = vcmp.eq.f32.partialorder %v1509_v50, 8.507059e+37 }
 0x840   :  { %v1553_v53 = vsel %vm1552_vm7, %v4846_v5, %v1549_v12  ;;  %v1561_v19 = vmul.f32 %v4852_v55, %v5581_v24  ;;  %v4854_v47 = vpop.eup %4853  ;;  %vm1566_vm3 = vweird.f32 %v4852_v55  ;;  %vm1565_vm5 = vweird.f32 %v5581_v24 }
 0x841   :  { %v1594_v41 = vadd.f32 %v4848_v21, %v1593_v51  ;;  %v1558_v63 = vsel %vm1555_vm8, %v1557_v36, %v1553_v53  ;;  %v1483_v11 = vadd.f32 1.0, %v4854_v47  ;;  %vm1567_vm6 = vmor %vm1565_vm5, %vm1566_vm3  ;;  %v1572_v56 = vor.u32 1.1754944e-38, %v1571_v28  ;;  %v4780_v36 = vld [vmem:[#allocation14] ss:$0 sm:$0xff]  ;;  %v4648_v28 = vld [vmem:[#allocation5 + $0x170] sm:$0xf0] }
 0x842   :  { %v1609_v48 = vmul.f32 %v1558_v63, %v5506_v57  ;;  %v1562_v5 = vsub.f32 1.0, %v1561_v19  ;;  %vm1570_vm7 = vcmp.eq.f32.partialorder %v1569_v18, 8.507059e+37  ;;  %vm1521_vm8 = vweird.f32 %v5588_v32  ;;  %v4207_v18 = vld [vmem:[#allocation5 + $0x170] sm:$0xf] }
 0x843   :  { %v1598_v1 = vsel %vm1597_vm12, %v4848_v21, %v1594_v41  ;;  %4855 = vrcp.f32 %v1483_v11  ;;  %v1518_v21 = vmul.f32 %v5588_v32, %v1517_v9  ;;  %v1526_v31 = vand.u32 2147483648, %v5541_v58  ;;  %v4199_v9 = vld [vmem:[#allocation5 + $0x168] sm:$0xf] }
 0x844   :  { %v1603_v15 = vsel %vm1600_vm0, %v1602_v0, %v1598_v1  ;;  %v1613_v57 = vpack.c.bf16 %v1609_v48, %v1605_v52  ;;  %v1563_v39 = vmul.f32 %v4852_v55, %v1562_v5  ;;  %vm1520_vm9 = vweird.f32 %v5541_v58 }
 0x845   :  { %v1612_v4 = vmul.f32 %v1603_v15, %v5509_v62  ;;  %v1513_v62 = vsel %vm1510_vm4, %v1512_v20, %v1508_v7  ;;  %v1519_v34 = vadd.f32 %v5588_v32, %v1518_v21  ;;  %v1524_v35 = vand.u32 2147483647, %v5541_v58  ;;  %vm1522_vm12 = vmor %vm1520_vm9, %vm1521_vm8  ;;  %v4649_v20 = vld [vmem:[#allocation5 + $0x178] sm:$0xf0] }
 0x846   :  { %1885 = vmatmul.bf16.vlgmr.msrb.gmra.mxu1 %v1613_v57  ;;  %v1564_v10 = vadd.f32 %v4852_v55, %v1563_v39  ;;  %v1606_v30 = vmul.f32 %v1513_v62, %v5499_v43  ;;  %v1586_v38 = vand.u32 2147483648, %v1483_v11  ;;  %v1584_v40 = vand.u32 2147483647, %v1483_v11  ;;  %v4201_v39 = vld [vmem:[#allocation5 + $0x174] sm:$0xf0] }
 0x847   :  { %v1616_v14 = vpack.c.bf16 %v1612_v4, %v1608_v33  ;;  %v1523_v43 = vsel %vm1522_vm12, %v5588_v32, %v1519_v34  ;;  %v1527_v42 = vor.u32 1.1754944e-38, %v1526_v31  ;;  %vm1525_vm2 = vcmp.eq.f32.partialorder %v1524_v35, 8.507059e+37  ;;  %v4645_v21 = vld [vmem:[#allocation5 + $0x158] sm:$0xf0]  ;;  %v4642_v31 = vld [vmem:[#allocation5 + $0x140] sm:$0xf0] }
 0x848   :  { %v1568_v22 = vsel %vm1567_vm6, %v4852_v55, %v1564_v10  ;;  %vm1580_vm1 = vweird.f32 %v1483_v11  ;;  %v1587_v46 = vor.u32 1.1754944e-38, %v1586_v38  ;;  %vm1585_vm4 = vcmp.eq.f32.partialorder %v1584_v40, 8.507059e+37  ;;  %v4641_v35 = vld [vmem:[#allocation5 + $0x13c] sm:$0xf]  ;;  %v4177_v38 = vld [vmem:[#allocation5 + $0x144] sm:$0xf0] }
 0x849   :  { %1927 = vmatmul.bf16.vlgmr.msra.gmra.mxu0 %v1616_v14  ;;  %v1573_v23 = vsel %vm1570_vm7, %v1572_v56, %v1568_v22  ;;  %v4856_v26 = vpop.eup %4855  ;;  %v1528_v45 = vsel %vm1525_vm2, %v1527_v42, %v1523_v43  ;;  %v4200_v14 = vor.u32 %v4648_v28, %v4199_v9  ;;  %v4208_v62 = vor.u32 %v4649_v20, %v4207_v18  ;;  %v4187_v56 = vld [vmem:[#allocation5 + $0x150] sm:$0xf]  ;;  %v4644_v22 = vld [vmem:[#allocation5 + $0x154] sm:$0xf]  ;;  %v4183_v43 = vld [vmem:[#allocation5 + $0x140] sm:$0xf] }
 0x84a   :  { %v1610_v25 = vmul.f32 %v1573_v23, %v5517_v17  ;;  %v1576_v24 = vmul.f32 %v4856_v26, %v1483_v11  ;;  %vm1581_vm0 = vweird.f32 %v4856_v26  ;;  %v1607_v58 = vmul.f32 %v1528_v45, %v5503_v54  ;;  %v4647_v11 = vld [vmem:[#allocation5 + $0x16c] sm:$0xf]  ;;  %v4129_v28 = vld [vmem:[#allocation5 + $0xe4] sm:$0xf0] }
 0x84b   :  { %vm1582_vm3 = vmor %vm1580_vm1, %vm1581_vm0  ;;  %v4204_v10 = vor.u32 %v4647_v11, %v4201_v39  ;;  %2154 = vmatpush.bf16.msra.mxu1 %v4200_v14  ;;  %2182 = vmatpush.bf16.msrb.mxu3 %v4208_v62  ;;  %v4188_v23 = vor.u32 %v4645_v21, %v4187_v56  ;;  %v4180_v40 = vor.u32 %v4641_v35, %v4177_v38  ;;  %v4639_v45 = vld [vmem:[#allocation5 + $0x128] sm:$0xf0]  ;;  %v4135_v11 = vld [vmem:[#allocation5 + $0xe0] sm:$0xf] }
 0x84c   :  { %v1614_v29 = vpack.c.bf16 %v1610_v25, %v1606_v30  ;;  %v1577_v37 = vsub.f32 1.0, %v1576_v24  ;;  %v4189_v30 = vld [vmem:[#allocation5 + $0x15c] sm:$0xf0]  ;;  %v4195_v25 = vld [vmem:[#allocation5 + $0x158] sm:$0xf] }
 0x84d   :  { %2168 = vmatpush.bf16.msrb.mxu2 %v4204_v10  ;;  %v4192_v34 = vor.u32 %v4644_v22, %v4189_v30  ;;  %v4175_v24 = vld [vmem:[#allocation5 + $0x138] sm:$0xf]  ;;  %v4631_v14 = vld [vmem:[#allocation5 + $0xe8] sm:$0xf0]  ;;  %v4115_v10 = vld [vmem:[#allocation5 + $0xc0] sm:$0xf] }
 0x84e   :  { %1899 = vmatmul.bf16.vlgmr.msra.gmra.mxu2 %v1614_v29  ;;  %v1578_v17 = vmul.f32 %v4856_v26, %v1577_v37  ;;  %v4176_v37 = vor.u32 %v4642_v31, %v4175_v24  ;;  %v4136_v20 = vor.u32 %v4631_v14, %v4135_v11  ;;  %v4627_v62 = vld [vmem:[#allocation5 + $0xc8] sm:$0xf0]  ;;  %v4626_v56 = vld [vmem:[#allocation5 + $0xc4] sm:$0xf]  ;;  %v4117_v22 = vld [vmem:[#allocation5 + $0xcc] sm:$0xf0] }
 0x84f   :  { %2155 = vmatpush.bf16.msra.mxu1 %v4188_v23  ;;  %v4116_v21 = vor.u32 %v4627_v62, %v4115_v10  ;;  %v4123_v23 = vld [vmem:[#allocation5 + $0xc8] sm:$0xf]  ;;  %v4628_v30 = vld [vmem:[#allocation5 + $0xd0] sm:$0xf0] }
 0x850   :  { %v1579_v44 = vadd.f32 %v4856_v26, %v1578_v17  ;;  %v4643_v17 = vld [vmem:[#allocation5 + $0x148] sm:$0xf0] }
 0x851   :  { %2169 = vmatpush.bf16.msrb.mxu2 %v4192_v34  ;;  %v4184_v42 = vor.u32 %v4643_v17, %v4183_v43  ;;  %v4124_v34 = vor.u32 %v4628_v30, %v4123_v23 }
 0x852   :  { %v1583_v49 = vsel %vm1582_vm3, %v4856_v26, %v1579_v44  ;;  %v4646_v26 = vld [vmem:[#allocation5 + $0x160] sm:$0xf0]  ;;  %v4163_v44 = vld [vmem:[#allocation5 + $0x120] sm:$0xf] }
 0x853   :  { %v1588_v12 = vsel %vm1585_vm4, %v1587_v46, %v1583_v49  ;;  %v4196_v29 = vor.u32 %v4646_v26, %v4195_v25  ;;  %2156 = vmatpush.bf16.msra.mxu1 %v4176_v37  ;;  %v4638_v46 = vld [vmem:[#allocation5 + $0x124] sm:$0xf]  ;;  %v4164_v49 = vor.u32 %v4639_v45, %v4163_v44  ;;  %v4120_v26 = vor.u32 %v4626_v56, %v4117_v22 }
 0x854   :  { %v1611_v51 = vmul.f32 %v1588_v12, %v5545_v59  ;;  %v4165_v12 = vld [vmem:[#allocation5 + $0x12c] sm:$0xf0] }
 0x855   :  { %2183 = vmatpush.bf16.msrb.mxu3 %v4196_v29  ;;  %2170 = vmatpush.bf16.msrb.mxu2 %v4180_v40 }
 0x856   :  { %v1615_v16 = vpack.c.bf16 %v1611_v51, %v1607_v58  ;;  %v4171_v58 = vld [vmem:[#allocation5 + $0x128] sm:$0xf]  ;;  %v4640_v51 = vld [vmem:[#allocation5 + $0x130] sm:$0xf0] }
 0x857   :  { %2157 = vmatpush.bf16.msra.mxu1 %v4164_v49 }
 0x858   :  { %1913 = vmatmul.bf16.vlgmr.msra.gmra.mxu3 %v1615_v16  ;;  %v4168_v16 = vor.u32 %v4638_v46, %v4165_v12  ;;  %v5672_v12 = vld [vmem:[%s5989_s3 + $0x4] sm:$0xf] }
 0x859   :  { %2184 = vmatpush.bf16.msrb.mxu3 %v4184_v42 }
 0x85a   :  { %2171 = vmatpush.bf16.msrb.mxu2 %v4168_v16  ;;  %v1977_v16 = vperm.slane %v5672_v12, 0 }
 0x8c3   :  { %v1886_v32 = vpop.f32.mrf.mxu1 }
 0x8c4   :  { %v1887_v53 = vadd.f32 %v4780_v36, %v1886_v32  ;;  %v4172_v32 = vor.u32 %v4640_v51, %v4171_v58 }
 0x8c6   :  { %v1928_v55 = vpop.f32.mrf.mxu0  ;;  %2185 = vmatpush.bf16.msrb.mxu3 %v4172_v32 }
 0x8cb   :  { %v1888_v60 = vpop.f32.mrf.mxu1 }
 0x8cc   :  { %v1889_v48 = vadd.f32 %v4780_v36, %v1888_v60  ;;  %v4151_v36 = vld [vmem:[#allocation5 + $0x108] sm:$0xf]  ;;  %v4159_v60 = vld [vmem:[#allocation5 + $0x110] sm:$0xf] }
 0x8ce   :  { %v1930_v2 = vpop.f32.mrf.mxu0 }
 0x8d1   :  { %v1900_v52 = vpop.f32.mrf.mxu2 }
 0x8d2   :  { %v1901_v41 = vadd.f32 %v1900_v52, %v1887_v53  ;;  %v4636_v52 = vld [vmem:[#allocation5 + $0x110] sm:$0xf0]  ;;  %v4635_v53 = vld [vmem:[#allocation5 + $0x10c] sm:$0xf] }
 0x8d9   :  { %v1902_v0 = vpop.f32.mrf.mxu2 }
 0x8da   :  { %v1903_v19 = vadd.f32 %v1902_v0, %v1889_v48  ;;  %v4139_v48 = vld [vmem:[#allocation5 + $0xf0] sm:$0xf] }
 0x8db   :  { %v1914_v61 = vpop.f32.mrf.mxu3 }
 0x8dc   :  { %v1915_v63 = vadd.f32 %v1914_v61, %v1901_v41  ;;  %v4152_v41 = vor.u32 %v4636_v52, %v4151_v36  ;;  %v4637_v61 = vld [vmem:[#allocation5 + $0x118] sm:$0xf0] }
 0x8dd   :  { %v4160_v0 = vor.u32 %v4637_v61, %v4159_v60 }
 0x8de   :  { %v1929_v1 = vadd.f32 %v1928_v55, %v1915_v63  ;;  %v4153_v55 = vld [vmem:[#allocation5 + $0x114] sm:$0xf0]  ;;  %2158 = vmatpush.bf16.msra.mxu1 %v4152_v41  ;;  %v1980_v41 = vperm.slane %v5672_v12, 1 }
 0x8df   :  { %v4156_v63 = vor.u32 %v4635_v53, %v4153_v55  ;;  %2186 = vmatpush.bf16.msrb.mxu3 %v4160_v0  ;;  %v2018_v0 = vld [vmem:[#allocation7 + $0x3] sm:$0x7] }
 0x8e0   :  { %v5648_v50 = vadd.f32 %v1929_v1, %v5461_v8  ;;  %v4633_v1 = vld [vmem:[#allocation5 + $0xf8] sm:$0xf0] }
 0x8e1   :  { %2172 = vmatpush.bf16.msrb.mxu2 %v4156_v63 }
 0x8e2   :  { %1937 = vadd.xlane.f32.xlu2 %v5648_v50 }
 0x8e3   :  { %v1916_v54 = vpop.f32.mrf.mxu3 }
 0x8e4   :  { %v1917_v59 = vadd.f32 %v1916_v54, %v1903_v19  ;;  %v4632_v19 = vld [vmem:[#allocation5 + $0xf4] sm:$0xf]  ;;  %v4140_v54 = vor.u32 %v4633_v1, %v4139_v48 }
 0x8e6   :  { %v1931_v15 = vadd.f32 %v1930_v2, %v1917_v59  ;;  %v4141_v59 = vld [vmem:[#allocation5 + $0xfc] sm:$0xf0]  ;;  %v4147_v2 = vld [vmem:[#allocation5 + $0xf8] sm:$0xf]  ;;  %2159 = vmatpush.bf16.msra.mxu1 %v4140_v54  ;;  %v2021_v54 = vperm.slane %v2018_v0, 1 }
 0x8e8   :  { %v5652_v47 = vadd.f32 %v1931_v15, %v5465_v13  ;;  %v4634_v15 = vld [vmem:[#allocation5 + $0x100] sm:$0xf0] }
 0x8ea   :  { %1939 = vadd.xlane.f32.xlu1 %v5652_v47 }
 0x955   :  { %v1938_v33 = vpop.xlane.xlu2 %1937 }
 0x956   :  { %v1941_v3 = vmul.f32 %v1938_v33, %v5315_v27  ;;  %v4144_v33 = vor.u32 %v4632_v19, %v4141_v59 }
 0x958   :  { %v5657_v57 = vsub.f32 %v5648_v50, %v1941_v3  ;;  %v4148_v3 = vor.u32 %v4634_v15, %v4147_v2  ;;  %2173 = vmatpush.bf16.msrb.mxu2 %v4144_v33  ;;  %v2022_v2 = vperm.slane %v2018_v0, 2 }
 0x95a   :  { %v1945_v8 = vmul.f32 %v5657_v57, %v5657_v57  ;;  %2187 = vmatpush.bf16.msrb.mxu3 %v4148_v3 }
 0x95c   :  { %1947 = vadd.xlane.f32.xlu2 %v1945_v8  ;;  %v4127_v8 = vld [vmem:[#allocation5 + $0xd8] sm:$0xf] }
 0x95d   :  { %v1940_v4 = vpop.xlane.xlu1 %1939 }
 0x95e   :  { %v1942_v5 = vmul.f32 %v1940_v4, %v5315_v27  ;;  %v4630_v4 = vld [vmem:[#allocation5 + $0xe0] sm:$0xf0]  ;;  %2188 = vmatpush.bf16.msrb.mxu3 %v4136_v20 }
 0x95f   :  { %v4128_v9 = vor.u32 %v4630_v4, %v4127_v8 }
 0x960   :  { %v5663_v7 = vsub.f32 %v5652_v47, %v1942_v5  ;;  %v4629_v5 = vld [vmem:[#allocation5 + $0xdc] sm:$0xf] }
 0x961   :  { %v4132_v18 = vor.u32 %v4629_v5, %v4129_v28  ;;  %2160 = vmatpush.bf16.msra.mxu1 %v4128_v9 }
 0x962   :  { %v1946_v13 = vmul.f32 %v5663_v7, %v5663_v7  ;;  %2189 = vmatpush.bf16.msrb.mxu3 %v4124_v34 }
 0x963   :  { %2174 = vmatpush.bf16.msrb.mxu2 %v4132_v18 }
 0x964   :  { %1949 = vadd.xlane.f32.xlu1 %v1946_v13 }
 0x965   :  { %2161 = vmatpush.bf16.msra.mxu1 %v4116_v21 }
 0x967   :  { %2175 = vmatpush.bf16.msrb.mxu2 %v4120_v26 }
 0x9cf   :  { %v1948_v13 = vpop.xlane.xlu2 %1947 }
 0x9d0   :  { %v1951_v39 = vmul.f32 %v1948_v13, %v5315_v27 }
 0x9d2   :  { %v1953_v25 = vadd.f32 1e-05, %v1951_v39 }
 0x9d4   :  { %4857 = vrsqrt.f32 %v1953_v25  ;;  %vm1961_vm6 = vweird.f32 %v1953_v25 }
 0x9d7   :  { %v1950_v29 = vpop.xlane.xlu1 %1949 }
 0x9d8   :  { %v1952_v24 = vmul.f32 %v1950_v29, %v5315_v27 }
 0x9da   :  { %v4858_v31 = vpop.eup %4857  ;;  %v1954_v35 = vadd.f32 1e-05, %v1952_v24 }
 0x9db   :  { %v1956_v37 = vmul.f32 %v4858_v31, %v1953_v25  ;;  %vm1962_vm5 = vweird.f32 %v4858_v31 }
 0x9dc   :  { %4859 = vrsqrt.f32 %v1954_v35  ;;  %vm1963_vm7 = vmor %vm1961_vm6, %vm1962_vm5  ;;  %vm1971_vm9 = vweird.f32 %v1954_v35 }
 0x9dd   :  { %v1957_v38 = vmul.f32 %v4858_v31, %v1956_v37 }
 0x9df   :  { %v1958_v43 = vmul.f32 0.5, %v1957_v38 }
 0x9e1   :  { %v1959_v17 = vsub.f32 1.5, %v1958_v43 }
 0x9e2   :  { %v4860_v40 = vpop.eup %4859 }
 0x9e3   :  { %v1960_v42 = vmul.f32 %v4858_v31, %v1959_v17  ;;  %v1966_v44 = vmul.f32 %v4860_v40, %v1954_v35  ;;  %vm1972_vm8 = vweird.f32 %v4860_v40 }
 0x9e4   :  { %vm1973_vm12 = vmor %vm1971_vm9, %vm1972_vm8 }
 0x9e5   :  { %v1967_v45 = vmul.f32 %v4860_v40, %v1966_v44  ;;  %v1964_v46 = vsel %vm1963_vm7, %v4858_v31, %v1960_v42 }
 0x9e6   :  { %v1975_v51 = vmul.f32 %v1964_v46, %v5657_v57  ;;  %v2020_v57 = vperm.slane %v2018_v0, 0 }
 0x9e7   :  { %v1968_v49 = vmul.f32 0.5, %v1967_v45 }
 0x9e8   :  { %v1978_v53 = vmul.f32 %v1977_v16, %v1975_v51 }
 0x9e9   :  { %v1969_v58 = vsub.f32 1.5, %v1968_v49 }
 0x9ea   :  { %v1981_v60 = vadd.f32 %v1980_v41, %v1978_v53 }
 0x9eb   :  { %v1970_v32 = vmul.f32 %v4860_v40, %v1969_v58 }
 0x9ed   :  { %v1974_v36 = vsel %vm1973_vm12, %v4860_v40, %v1970_v32 }
 0x9ee   :  { %v1976_v52 = vmul.f32 %v1974_v36, %v5663_v7 }
 0x9f0   :  { %v1979_v55 = vmul.f32 %v1977_v16, %v1976_v52 }
 0x9f2   :  { %v1982_v61 = vadd.f32 %v1980_v41, %v1979_v55 }
 0x9f4   :  { %v1983_v63 = vpack.c.bf16 %v1982_v61, %v1981_v60 }
 0x9f6   :  { %2162 = vmatmul.bf16.vlgmr.msra.gmra.mxu1 %v1983_v63  ;;  %2176 = vmatmul.bf16.vlgmr.msrb.gmra.mxu2 %v1983_v63 }
 0x9f7   :  { %2190 = vmatmul.bf16.vlgmr.msrb.gmra.mxu3 %v1983_v63 }
 0xa73   :  { %v2163_v48 = vpop.f32.mrf.mxu1 }
 0xa74   :  { %v2164_v1 = vadd.f32 %v2163_v48, %v2020_v57 }
 0xa76   :  { %v2196_v19 = vmul.f32 0.17677669, %v2164_v1 }
 0xa78   :  { %2202 = vrot.lane.b32.xlu1 %v2196_v19, %s5167_s4  ;;  %v2218_v9 = vpack.c.bf16 %v2196_v19, %v2196_v19 }
 0xa79   :  { %v2177_v59 = vpop.f32.mrf.mxu2 }
 0xa7a   :  { %v2178_v7 = vadd.f32 %v2177_v59, %v2021_v54  ;;  %v2191_v15 = vpop.f32.mrf.mxu3 }
 0xa7b   :  { %v5682_v8 = vadd.f32 %v2191_v15, %v2022_v2  ;;  %v2165_v28 = vpop.f32.mrf.mxu1 }
 0xa7c   :  { %2233 = vrot.lane.b32.xlu0 %v2178_v7, %s5183_s18  ;;  %2230 = vrot.lane.b32.xlu2 %v2178_v7, %s5167_s4  ;;  %v2246_v33 = vpack.c.bf16 %v2178_v7, %v2178_v7  ;;  %v2166_v39 = vadd.f32 %v2165_v28, %v2020_v57 }
 0xa7d   :  { %v2274_v13 = vpack.c.bf16 %v5682_v8, %v5682_v8 }
 0xa7e   :  { %v2286_v3 = vsel %vm620_vm10, %v2246_v33, 0  ;;  %v2197_v20 = vmul.f32 0.17677669, %v2166_v39 }
 0xa7f   :  { %2295 = vmatpush.bf16.xpose.msrb.mxu0 %v2286_v3  ;;  %v2534_v18 = vsel %vm873_vm11, %v2274_v13, 0 }
 0xa80   :  { %v2222_v21 = vpack.c.bf16 %v2197_v20, %v2197_v20 }
 0xa81   :  { %v2179_v4 = vpop.f32.mrf.mxu2 }
 0xa82   :  { %v2180_v5 = vadd.f32 %v2179_v4, %v2021_v54  ;;  %v2193_v10 = vpop.f32.mrf.mxu3 }
 0xa83   :  { %v5695_v62 = vadd.f32 %v2193_v10, %v2022_v2 }
 0xa84   :  { %2227 = vrot.lane.b32.xlu2 %v2178_v7, %s5184_s19  ;;  %2205 = vrot.lane.b32.xlu0 %v2196_v19, %s5183_s18  ;;  %v2250_v11 = vpack.c.bf16 %v2180_v5, %v2180_v5 }
 0xa85   :  { %2243 = vrot.lane.b32.xlu1 %v2180_v5, %s5183_s18  ;;  %v2278_v56 = vpack.c.bf16 %v5695_v62, %v5695_v62 }
 0xa86   :  { %4209 = vmatmul.msk.bf16.vlgmr.msrb.gmra.mxu0 %vm620_vm10, %v2218_v9  ;;  %v2362_v14 = vsel %vm620_vm10, %v2250_v11, 0 }
 0xa87   :  { %2371 = vmatpush.bf16.xpose.msra.mxu0 %v2362_v14  ;;  %v2610_v22 = vsel %vm873_vm11, %v2278_v56, 0 }
 0xa8c   :  { %2199 = vrot.lane.b32.xlu2 %v2196_v19, %s5184_s19  ;;  %2240 = vrot.lane.b32.xlu0 %v2180_v5, %s5167_s4 }
 0xa8d   :  { %2215 = vrot.lane.b32.xlu1 %v2197_v20, %s5183_s18 }
 0xa8f   :  { %2543 = vmatpush.bf16.msrb.mxu0 %v2534_v18 }
 0xa94   :  { %2237 = vrot.lane.b32.xlu2 %v2180_v5, %s5184_s19  ;;  %2212 = vrot.lane.b32.xlu0 %v2197_v20, %s5167_s4 }
 0xa96   :  { %4213 = vmatmul.msk.bf16.vlgmr.msra.gmra.mxu0 %vm620_vm10, %v2222_v21 }
 0xa97   :  { %2619 = vmatpush.bf16.msra.mxu0 %v2610_v22 }
 0xa9c   :  { %2209 = vrot.lane.b32.xlu0 %v2197_v20, %s5184_s19 }
 0xad6   :  { %v2231_v23 = vpop.permute.xlu2 %2230 }
 0xad7   :  { %v2248_v30 = vpack.c.bf16 %v2231_v23, %v2231_v23 }
 0xad9   :  { %v2324_v25 = vsel %vm620_vm10, %v2248_v30, 0 }
 0xada   :  { %2333 = vmatpush.bf16.xpose.msra.mxu2 %v2324_v25 }
 0xade   :  { %v2228_v26 = vpop.permute.xlu2 %2227 }
 0xadf   :  { %v2247_v34 = vpack.c.bf16 %v2228_v26, %v2228_v26 }
 0xae1   :  { %v2305_v29 = vsel %vm620_vm10, %v2247_v34, 0 }
 0xae2   :  { %2314 = vmatpush.bf16.xpose.msrb.mxu1 %v2305_v29 }
 0xae6   :  { %v2200_v24 = vpop.permute.xlu2 %2199 }
 0xae7   :  { %v2219_v31 = vpack.c.bf16 %v2200_v24, %v2200_v24 }
 0xae9   :  { %4210 = vmatmul.msk.bf16.vlgmr.msrb.gmra.mxu1 %vm620_vm10, %v2219_v31 }
 0xaea   :  { %v2203_v35 = vpop.permute.xlu1 %2202 }
 0xaeb   :  { %v2220_v37 = vpack.c.bf16 %v2203_v35, %v2203_v35 }
 0xaed   :  { %4211 = vmatmul.msk.bf16.vlgmr.msra.gmra.mxu2 %vm620_vm10, %v2220_v37 }
 0xaee   :  { %v2234_v38 = vpop.permute.xlu0 %2233  ;;  %v2238_v43 = vpop.permute.xlu2 %2237 }
 0xaef   :  { %v2249_v17 = vpack.c.bf16 %v2234_v38, %v2234_v38  ;;  %v2251_v40 = vpack.c.bf16 %v2238_v43, %v2238_v43 }
 0xaf1   :  { %v2343_v42 = vsel %vm620_vm10, %v2249_v17, 0  ;;  %v2381_v44 = vsel %vm620_vm10, %v2251_v40, 0 }
 0xaf2   :  { %2352 = vmatpush.bf16.xpose.msra.mxu3 %v2343_v42  ;;  %2390 = vmatpush.bf16.xpose.msra.mxu1 %v2381_v44 }
 0xaf6   :  { %v2206_v45 = vpop.permute.xlu0 %2205 }
 0xaf7   :  { %v2221_v46 = vpack.c.bf16 %v2206_v45, %v2206_v45  ;;  %v2244_v49 = vpop.permute.xlu1 %2243 }
 0xaf8   :  { %v2253_v58 = vpack.c.bf16 %v2244_v49, %v2244_v49 }
 0xaf9   :  { %4212 = vmatmul.msk.bf16.vlgmr.msra.gmra.mxu3 %vm620_vm10, %v2221_v46 }
 0xafa   :  { %v2419_v51 = vsel %vm620_vm10, %v2253_v58, 0 }
 0xafb   :  { %2428 = vmatpush.bf16.xpose.msrb.mxu3 %v2419_v51 }
 0xafe   :  { %v2241_v16 = vpop.permute.xlu0 %2240 }
 0xaff   :  { %v2252_v32 = vpack.c.bf16 %v2241_v16, %v2241_v16  ;;  %v2216_v53 = vpop.permute.xlu1 %2215 }
 0xb00   :  { %v2225_v61 = vpack.c.bf16 %v2216_v53, %v2216_v53 }
 0xb01   :  { %v2400_v36 = vsel %vm620_vm10, %v2252_v32, 0 }
 0xb02   :  { %2409 = vmatpush.bf16.xpose.msrb.mxu2 %v2400_v36 }
 0xb03   :  { %v2297_v52 = vpop.f32.mrf.mxu0 }
 0xb04   :  { %v5714_v41 = vadd.f32 %v2297_v52, %v5369_v6 }
 0xb06   :  { %v2213_v55 = vpop.permute.xlu0 %2212  ;;  %v2434_v60 = vsel %vm773_vm13, %v5714_v41, -inf }
 0xb07   :  { %v2224_v63 = vpack.c.bf16 %v2213_v55, %v2213_v55  ;;  %2435 = vmax.xlane.f32.xlu1 %v2434_v60 }
 0xb09   :  { %4215 = vmatmul.msk.bf16.vlgmr.msrb.gmra.mxu2 %vm620_vm10, %v2224_v63  ;;  %4216 = vmatmul.msk.bf16.vlgmr.msrb.gmra.mxu3 %vm620_vm10, %v2225_v61 }
 0xb0b   :  { %v2299_v0 = vpop.f32.mrf.mxu0 }
 0xb0e   :  { %v2210_v57 = vpop.permute.xlu0 %2209 }
 0xb0f   :  { %v2223_v48 = vpack.c.bf16 %v2210_v57, %v2210_v57 }
 0xb11   :  { %4214 = vmatmul.msk.bf16.vlgmr.msra.gmra.mxu1 %vm620_vm10, %v2223_v48 }
 0xb13   :  { %v2373_v1 = vpop.f32.mrf.mxu0 }
 0xb14   :  { %v5726_v4 = vadd.f32 %v2373_v1, %v5369_v6 }
 0xb16   :  { %v2446_v13 = vsel %vm773_vm13, %v5726_v4, -inf }
 0xb1b   :  { %v2375_v19 = vpop.f32.mrf.mxu0 }
 0xb66   :  { %v2316_v54 = vpop.f32.mrf.mxu1 }
 0xb67   :  { %v2317_v59 = vadd.f32 %v2316_v54, %v5369_v6 }
 0xb69   :  { %v2437_v7 = vsel %vm773_vm13, %v2317_v59, -inf }
 0xb6a   :  { %2438 = vmax.xlane.f32.xlu0 %v2437_v7 }
 0xb6e   :  { %v2318_v2 = vpop.f32.mrf.mxu1 }
 0xb70   :  { %v2335_v15 = vpop.f32.mrf.mxu2 }
 0xb71   :  { %v2336_v33 = vadd.f32 %v2335_v15, %v5369_v6 }
 0xb73   :  { %v2440_v3 = vsel %vm773_vm13, %v2336_v33, -inf }
 0xb74   :  { %2441 = vmax.xlane.f32.xlu1 %v2440_v3 }
 0xb78   :  { %v2337_v5 = vpop.f32.mrf.mxu2 }
 0xb7a   :  { %v2436_v31 = vpop.xlane.xlu1 %2435 }
 0xb7c   :  { %v2354_v9 = vpop.f32.mrf.mxu3  ;;  %2447 = vmax.xlane.f32.xlu1 %v2446_v13  ;;  %v2458_v13 = vsub.f32 %v5714_v41, %v2436_v31 }
 0xb7d   :  { %v2355_v28 = vadd.f32 %v2354_v9, %v5369_v6 }
 0xb7e   :  { %2261 = vrot.lane.b32.xlu0 %v5682_v8, %s5183_s18 }
 0xb7f   :  { %v2443_v11 = vsel %vm773_vm13, %v2355_v28, -inf }
 0xb80   :  { %2444 = vmax.xlane.f32.xlu2 %v2443_v11 }
 0xb84   :  { %v2356_v14 = vpop.f32.mrf.mxu3 }
 0xb8c   :  { %v2411_v39 = vpop.f32.mrf.mxu2  ;;  %v2430_v18 = vpop.f32.mrf.mxu3 }
 0xb8d   :  { %v2412_v20 = vadd.f32 %v2411_v39, %v5369_v6  ;;  %v2431_v26 = vadd.f32 %v2430_v18, %v5369_v6 }
 0xb8e   :  { %v2392_v10 = vpop.f32.mrf.mxu1 }
 0xb8f   :  { %v2452_v56 = vsel %vm773_vm13, %v2412_v20, -inf  ;;  %v2393_v30 = vadd.f32 %v2392_v10, %v5369_v6  ;;  %v2455_v34 = vsel %vm773_vm13, %v2431_v26, -inf }
 0xb90   :  { %2453 = vmax.xlane.f32.xlu1 %v2452_v56 }
 0xb91   :  { %v2449_v25 = vsel %vm773_vm13, %v2393_v30, -inf }
 0xb94   :  { %v2413_v21 = vpop.f32.mrf.mxu2  ;;  %v2432_v22 = vpop.f32.mrf.mxu3 }
 0xb96   :  { %v2394_v23 = vpop.f32.mrf.mxu1 }
 0xb98   :  { %2258 = vrot.lane.b32.xlu2 %v5682_v8, %s5167_s4 }
 0xba8   :  { %2450 = vmax.xlane.f32.xlu0 %v2449_v25 }
 0xba9   :  { %2255 = vrot.lane.b32.xlu1 %v5682_v8, %s5184_s19 }
 0xbc1   :  { %2456 = vmax.xlane.f32.xlu2 %v2455_v34 }
 0xbdd   :  { %v2439_v29 = vpop.xlane.xlu0 %2438 }
 0xbde   :  { %v2459_v24 = vsub.f32 %v2317_v59, %v2439_v29 }
 0xbe0   :  { %v2468_v35 = vmul.f32 1.442695, %v2459_v24 }
 0xbe2   :  { %4861 = vpow2.f32 %v2468_v35 }
 0xbe7   :  { %v2442_v37 = vpop.xlane.xlu1 %2441 }
 0xbe8   :  { %v4862_v38 = vpop.eup %4861  ;;  %v2460_v43 = vsub.f32 %v2336_v33, %v2442_v37 }
 0xbe9   :  { %v2485_v17 = vsel %vm773_vm13, %v4862_v38, 0.0 }
 0xbea   :  { %v2470_v40 = vmul.f32 1.442695, %v2460_v43  ;;  %2486 = vadd.xlane.f32.xlu1 %v2485_v17 }
 0xbec   :  { %4863 = vpow2.f32 %v2470_v40 }
 0xbef   :  { %v2448_v51 = vpop.xlane.xlu1 %2447 }
 0xbf0   :  { %v2262_v42 = vpop.permute.xlu0 %2261  ;;  %v2462_v56 = vsub.f32 %v5726_v4, %v2448_v51 }
 0xbf1   :  { %v2277_v8 = vpack.c.bf16 %v2262_v42, %v2262_v42 }
 0xbf2   :  { %v4864_v44 = vpop.eup %4863  ;;  %v2474_v23 = vmul.f32 1.442695, %v2462_v56  ;;  %v4656_v56 = vld [vmem:[#allocation8 + $0x70] sm:$0xff] }
 0xbf3   :  { %v2591_v6 = vsel %vm873_vm11, %v2277_v8, 0  ;;  %v2445_v45 = vpop.xlane.xlu2 %2444  ;;  %v2488_v46 = vsel %vm773_vm13, %v4864_v44, 0.0 }
 0xbf4   :  { %v2461_v49 = vsub.f32 %v2355_v28, %v2445_v45  ;;  %2600 = vmatpush.bf16.msra.mxu3 %v2591_v6  ;;  %2489 = vadd.xlane.f32.xlu2 %v2488_v46  ;;  %v2466_v28 = vmul.f32 1.442695, %v2458_v13 }
 0xbf6   :  { %v2472_v58 = vmul.f32 1.442695, %v2461_v49 }
 0xbf8   :  { %4865 = vpow2.f32 %v2472_v58 }
 0xbfb   :  { %v2259_v16 = vpop.permute.xlu2 %2258 }
 0xbfc   :  { %v2276_v32 = vpack.c.bf16 %v2259_v16, %v2259_v16 }
 0xbfe   :  { %v4866_v36 = vpop.eup %4865  ;;  %v2572_v52 = vsel %vm873_vm11, %v2276_v32, 0 }
 0xbff   :  { %2581 = vmatpush.bf16.msra.mxu2 %v2572_v52  ;;  %v2491_v53 = vsel %vm773_vm13, %v4866_v36, 0.0 }
 0xc00   :  { %2492 = vadd.xlane.f32.xlu0 %v2491_v53 }
 0xc03   :  { %v2454_v55 = vpop.xlane.xlu1 %2453 }
 0xc04   :  { %v2464_v60 = vsub.f32 %v2412_v20, %v2454_v55 }
 0xc06   :  { %v2478_v61 = vmul.f32 1.442695, %v2464_v60 }
 0xc08   :  { %4867 = vpow2.f32 %v2478_v61 }
 0xc0e   :  { %v4868_v63 = vpop.eup %4867 }
 0xc0f   :  { %v2500_v0 = vsel %vm773_vm13, %v4868_v63, 0.0 }
 0xc10   :  { %2501 = vadd.xlane.f32.xlu2 %v2500_v0 }
 0xc1b   :  { %v2451_v57 = vpop.xlane.xlu0 %2450  ;;  %v2256_v48 = vpop.permute.xlu1 %2255 }
 0xc1c   :  { %v2463_v1 = vsub.f32 %v2393_v30, %v2451_v57  ;;  %v2275_v19 = vpack.c.bf16 %v2256_v48, %v2256_v48 }
 0xc1e   :  { %v2476_v54 = vmul.f32 1.442695, %v2463_v1  ;;  %v2553_v59 = vsel %vm873_vm11, %v2275_v19, 0 }
 0xc1f   :  { %2562 = vmatpush.bf16.msrb.mxu1 %v2553_v59 }
 0xc20   :  { %4869 = vpow2.f32 %v2476_v54 }
 0xc26   :  { %v4870_v7 = vpop.eup %4869 }
 0xc27   :  { %v2497_v2 = vsel %vm773_vm13, %v4870_v7, 0.0 }
 0xc28   :  { %2498 = vadd.xlane.f32.xlu1 %v2497_v2  ;;  %2268 = vrot.lane.b32.xlu2 %v5695_v62, %s5167_s4 }
 0xc34   :  { %v2457_v15 = vpop.xlane.xlu2 %2456 }
 0xc35   :  { %v2465_v33 = vsub.f32 %v2431_v26, %v2457_v15 }
 0xc37   :  { %v2480_v3 = vmul.f32 1.442695, %v2465_v33 }
 0xc39   :  { %4871 = vpow2.f32 %v2480_v3 }
 0xc3a   :  { %4873 = vpow2.f32 %v2466_v28 }
 0xc3f   :  { %v4872_v5 = vpop.eup %4871 }
 0xc40   :  { %v2503_v9 = vsel %vm773_vm13, %v4872_v5, 0.0  ;;  %v4874_v11 = vpop.eup %4873 }
 0xc41   :  { %2504 = vadd.xlane.f32.xlu0 %v2503_v9  ;;  %2265 = vrot.lane.b32.xlu1 %v5695_v62, %s5184_s19  ;;  %v2482_v14 = vsel %vm773_vm13, %v4874_v11, 0.0 }
 0xc51   :  { %2483 = vadd.xlane.f32.xlu2 %v2482_v14 }
 0xc55   :  { %2271 = vrot.lane.b32.xlu0 %v5695_v62, %s5183_s18 }
 0xc5d   :  { %v2487_v39 = vpop.xlane.xlu1 %2486 }
 0xc5e   :  { %4875 = vrcp.f32 %v2487_v39 }
 0xc64   :  { %v4876_v18 = vpop.eup %4875 }
 0xc65   :  { %v2515_v20 = vmul.f32 %v4876_v18, %v4862_v38 }
 0xc67   :  { %v2523_v41 = vpack.c.bf16 %v2515_v20, %v2515_v20  ;;  %v2490_v10 = vpop.xlane.xlu2 %2489 }
 0xc68   :  { %4877 = vrcp.f32 %v2490_v10  ;;  %v4657_v10 = vld [vmem:[#allocation8 + $0x78] sm:$0xff] }
 0xc69   :  { %4218 = vmatmul.msk.bf16.vlgmr.msrb.gmra.mxu1 %vm773_vm13, %v2523_v41 }
 0xc6e   :  { %v4878_v21 = vpop.eup %4877 }
 0xc6f   :  { %v2516_v22 = vmul.f32 %v4878_v21, %v4864_v44  ;;  %v4655_v21 = vld [vmem:[#allocation8 + $0x68] sm:$0xff] }
 0xc71   :  { %v2524_v30 = vpack.c.bf16 %v2516_v22, %v2516_v22  ;;  %v4654_v22 = vld [vmem:[#allocation8 + $0x60] sm:$0xff] }
 0xc73   :  { %v2493_v25 = vpop.xlane.xlu0 %2492  ;;  %4219 = vmatmul.msk.bf16.vlgmr.msra.gmra.mxu2 %vm773_vm13, %v2524_v30  ;;  %v4652_v30 = vld [vmem:[#allocation8 + $0x50] sm:$0xff] }
 0xc74   :  { %4879 = vrcp.f32 %v2493_v25  ;;  %v4651_v25 = vld [vmem:[#allocation8 + $0x48] sm:$0xff] }
 0xc75   :  { %4881 = vpow2.f32 %v2474_v23  ;;  %v4653_v23 = vld [vmem:[#allocation8 + $0x58] sm:$0xff] }
 0xc7a   :  { %v4880_v62 = vpop.eup %4879 }
 0xc7b   :  { %v4882_v26 = vpop.eup %4881  ;;  %v2517_v34 = vmul.f32 %v4880_v62, %v4866_v36  ;;  %v4650_v62 = vld [vmem:[#allocation8 + $0x40] sm:$0xff] }
 0xc7c   :  { %v2494_v24 = vsel %vm773_vm13, %v4882_v26, 0.0 }
 0xc7d   :  { %v2525_v29 = vpack.c.bf16 %v2517_v34, %v2517_v34 }
 0xc7f   :  { %4220 = vmatmul.msk.bf16.vlgmr.msra.gmra.mxu3 %vm773_vm13, %v2525_v29  ;;  %2495 = vadd.xlane.f32.xlu0 %v2494_v24 }
 0xc83   :  { %v2502_v31 = vpop.xlane.xlu2 %2501 }
 0xc84   :  { %4883 = vrcp.f32 %v2502_v31 }
 0xc8a   :  { %v4884_v4 = vpop.eup %4883 }
 0xc8b   :  { %v2269_v35 = vpop.permute.xlu2 %2268  ;;  %v2520_v37 = vmul.f32 %v4884_v4, %v4868_v63 }
 0xc8c   :  { %v2280_v38 = vpack.c.bf16 %v2269_v35, %v2269_v35 }
 0xc8d   :  { %v2528_v17 = vpack.c.bf16 %v2520_v37, %v2520_v37 }
 0xc8e   :  { %v2648_v43 = vsel %vm873_vm11, %v2280_v38, 0 }
 0xc8f   :  { %2657 = vmatpush.bf16.msrb.mxu2 %v2648_v43 }
 0xc92   :  { %4223 = vmatmul.msk.bf16.vlgmr.msrb.gmra.mxu2 %vm773_vm13, %v2528_v17 }
 0xc9b   :  { %v2499_v40 = vpop.xlane.xlu1 %2498 }
 0xc9c   :  { %4885 = vrcp.f32 %v2499_v40 }
 0xca2   :  { %v4886_v42 = vpop.eup %4885 }
 0xca3   :  { %v2519_v44 = vmul.f32 %v4886_v42, %v4870_v7 }
 0xca5   :  { %v2527_v46 = vpack.c.bf16 %v2519_v44, %v2519_v44 }
 0xcb3   :  { %v2266_v8 = vpop.permute.xlu1 %2265 }
 0xcb4   :  { %v2279_v6 = vpack.c.bf16 %v2266_v8, %v2266_v8  ;;  %v2505_v49 = vpop.xlane.xlu0 %2504 }
 0xcb5   :  { %4887 = vrcp.f32 %v2505_v49 }
 0xcb6   :  { %v2629_v45 = vsel %vm873_vm11, %v2279_v6, 0 }
 0xcb7   :  { %2638 = vmatpush.bf16.msra.mxu1 %v2629_v45  ;;  %v4781_v45 = vld [vmem:[%s5993_s7 + $0x1] ss:$0 sm:$0xff] }
 0xcba   :  { %4222 = vmatmul.msk.bf16.vlgmr.msra.gmra.mxu1 %vm773_vm13, %v2527_v46 }
 0xcbb   :  { %v4888_v51 = vpop.eup %4887 }
 0xcbc   :  { %v2521_v32 = vmul.f32 %v4888_v51, %v4872_v5 }
 0xcbe   :  { %v2529_v55 = vpack.c.bf16 %v2521_v32, %v2521_v32 }
 0xcc4   :  { %v2484_v58 = vpop.xlane.xlu2 %2483 }
 0xcc5   :  { %4889 = vrcp.f32 %v2484_v58 }
 0xcc7   :  { %v2272_v16 = vpop.permute.xlu0 %2271 }
 0xcc8   :  { %v2281_v36 = vpack.c.bf16 %v2272_v16, %v2272_v16 }
 0xcca   :  { %v2667_v52 = vsel %vm873_vm11, %v2281_v36, 0 }
 0xccb   :  { %v4890_v53 = vpop.eup %4889  ;;  %2676 = vmatpush.bf16.msrb.mxu3 %v2667_v52 }
 0xccc   :  { %v2514_v60 = vmul.f32 %v4890_v53, %v4874_v11 }
 0xcce   :  { %v2522_v61 = vpack.c.bf16 %v2514_v60, %v2514_v60  ;;  %4224 = vmatmul.msk.bf16.vlgmr.msrb.gmra.mxu3 %vm773_vm13, %v2529_v55 }
 0xcd0   :  { %4217 = vmatmul.msk.bf16.vlgmr.msrb.gmra.mxu0 %vm773_vm13, %v2522_v61 }
 0xcd1   :  { %2783 = vmatpush.bf16.msrb.mxu0 %v4657_v10 }
 0xcd5   :  { %2784 = vmatpush.bf16.msrb.mxu0 %v4656_v56  ;;  %v4340_v56 = vld [vmem:[#allocation10 + $0x1a0] sm:$0xf] }
 0xcd9   :  { %2785 = vmatpush.bf16.msrb.mxu0 %v4655_v21  ;;  %v4680_v21 = vld [vmem:[#allocation10 + $0x1ac] sm:$0xf0] }
 0xcdd   :  { %2786 = vmatpush.bf16.msrb.mxu0 %v4654_v22  ;;  %v4678_v22 = vld [vmem:[#allocation10 + $0x1a4] sm:$0xf] }
 0xce1   :  { %2787 = vmatpush.bf16.msrb.mxu0 %v4653_v23  ;;  %v4341_v23 = vor.u32 %v4680_v21, %v4340_v56  ;;  %v4663_v21 = vld [vmem:[#allocation10 + $0x12c] sm:$0xf] }
 0xce5   :  { %2788 = vmatpush.bf16.msrb.mxu0 %v4652_v30  ;;  %v4342_v30 = vld [vmem:[#allocation10 + $0x1b0] sm:$0xf0] }
 0xce6   :  { %v2564_v63 = vpop.f32.mrf.mxu1 }
 0xce9   :  { %2789 = vmatpush.bf16.msrb.mxu0 %v4651_v25  ;;  %v4348_v25 = vld [vmem:[#allocation10 + $0x1a8] sm:$0xf] }
 0xced   :  { %2790 = vmatpush.bf16.msrb.mxu0 %v4650_v62  ;;  %v4681_v62 = vld [vmem:[#allocation10 + $0x1b4] sm:$0xf0] }
 0xcee   :  { %v2566_v0 = vpop.f32.mrf.mxu1 }
 0xcef   :  { %v4688_v0 = vld [vmem:[#allocation10 + $0x1ec] sm:$0xf0] }
 0xcf2   :  { %v2496_v57 = vpop.xlane.xlu0 %2495 }
 0xcf3   :  { %4891 = vrcp.f32 %v2496_v57  ;;  %v4686_v57 = vld [vmem:[#allocation10 + $0x1e4] sm:$0xf] }
 0xcf6   :  { %v2583_v48 = vpop.f32.mrf.mxu2 }
 0xcf9   :  { %v4892_v1 = vpop.eup %4891 }
 0xcfa   :  { %v2518_v19 = vmul.f32 %v4892_v1, %v4882_v26  ;;  %v4374_v1 = vld [vmem:[#allocation10 + $0x1f0] sm:$0xf0] }
 0xcfc   :  { %v2526_v54 = vpack.c.bf16 %v2518_v19, %v2518_v19  ;;  %v4380_v19 = vld [vmem:[#allocation10 + $0x1e8] sm:$0xf] }
 0xcfe   :  { %v2585_v59 = vpop.f32.mrf.mxu2  ;;  %4221 = vmatmul.msk.bf16.vlgmr.msra.gmra.mxu0 %vm773_vm13, %v2526_v54  ;;  %v4689_v54 = vld [vmem:[#allocation10 + $0x1f4] sm:$0xf0] }
 0xcff   :  { %v4377_v59 = vor.u32 %v4686_v57, %v4374_v1  ;;  %v4292_v57 = vld [vmem:[#allocation10 + $0x140] sm:$0xf]  ;;  %v4666_v1 = vld [vmem:[#allocation10 + $0x144] sm:$0xf] }
 0xd01   :  { %3064 = vmatpush.bf16.msra.mxu2 %v4377_v59  ;;  %v4300_v59 = vld [vmem:[#allocation10 + $0x148] sm:$0xf] }
 0xd02   :  { %v2602_v7 = vpop.f32.mrf.mxu3 }
 0xd0a   :  { %v2604_v2 = vpop.f32.mrf.mxu3 }
 0xd0b   :  { %v4687_v2 = vld [vmem:[#allocation10 + $0x1ec] sm:$0xf] }
 0xd15   :  { %v2659_v15 = vpop.f32.mrf.mxu2 }
 0xd16   :  { %v4769_v9 = vpack.i.bf16 %v2659_v15, %v2583_v48  ;;  %v4382_v15 = vld [vmem:[#allocation10 + $0x1f8] sm:$0xf0] }
 0xd1d   :  { %v2661_v33 = vpop.f32.mrf.mxu2 }
 0xd1e   :  { %v4385_v33 = vor.u32 %v4687_v2, %v4382_v15 }
 0xd20   :  { %3092 = vmatpush.bf16.msra.mxu0 %v4385_v33  ;;  %v4667_v33 = vld [vmem:[#allocation10 + $0x14c] sm:$0xf] }
 0xd37   :  { %v2640_v3 = vpop.f32.mrf.mxu1 }
 0xd38   :  { %v4764_v5 = vpack.i.bf16 %v2640_v3, %v2564_v63  ;;  %v4372_v63 = vld [vmem:[#allocation10 + $0x1e0] sm:$0xf] }
 0xd39   :  { %v4373_v48 = vor.u32 %v4688_v0, %v4372_v63  ;;  %v4356_v3 = vld [vmem:[#allocation10 + $0x1c0] sm:$0xf]  ;;  %v4318_v63 = vld [vmem:[#allocation10 + $0x178] sm:$0xf0] }
 0xd3a   :  { %4765 = vrot.lane.b32.xlu1 %v4764_v5, %s5183_s18  ;;  %v4684_v5 = vld [vmem:[#allocation10 + $0x1cc] sm:$0xf0] }
 0xd3b   :  { %3050 = vmatpush.bf16.msrb.mxu1 %v4373_v48  ;;  %v4668_v48 = vld [vmem:[#allocation10 + $0x14c] sm:$0xf0] }
 0xd3f   :  { %v2642_v13 = vpop.f32.mrf.mxu1 }
 0xd40   :  { %v4682_v13 = vld [vmem:[#allocation10 + $0x1c4] sm:$0xf] }
 0xd42   :  { %4770 = vrot.lane.b32.xlu1 %v4769_v9, %s5167_s4  ;;  %v4357_v9 = vor.u32 %v4684_v5, %v4356_v3  ;;  %v4302_v3 = vld [vmem:[#allocation10 + $0x158] sm:$0xf0] }
 0xd43   :  { %v4305_v5 = vor.u32 %v4667_v33, %v4302_v3  ;;  %v4697_v33 = vld [vmem:[#allocation13 + $0x138] sm:$0xff] }
 0xd44   :  { %3051 = vmatpush.bf16.msrb.mxu1 %v4357_v9  ;;  %v4664_v9 = vld [vmem:[#allocation10 + $0x12c] sm:$0xf0]  ;;  %v4721_v3 = vld [vmem:[#allocation13 + $0x1f8] sm:$0xff] }
 0xd48   :  { %3052 = vmatpush.bf16.msrb.mxu1 %v4341_v23 }
 0xd4d   :  { %v2545_v28 = vpop.f32.mrf.mxu0 }
 0xd51   :  { %v2678_v11 = vpop.f32.mrf.mxu3 }
 0xd52   :  { %v4774_v14 = vpack.i.bf16 %v2678_v11, %v2602_v7  ;;  %v4381_v7 = vor.u32 %v4689_v54, %v4380_v19  ;;  %v4364_v11 = vld [vmem:[#allocation10 + $0x1c8] sm:$0xf]  ;;  %v4293_v19 = vor.u32 %v4668_v48, %v4292_v57  ;;  %v4294_v54 = vld [vmem:[#allocation10 + $0x150] sm:$0xf0]  ;;  %v4934_v57 = vld [vmem:[%s5989_s3 + $0x4] sm:$0xf] }
 0xd53   :  { %v4297_v2 = vor.u32 %v4666_v1, %v4294_v54  ;;  %v2842_v48 = vperm.slane %v4934_v57, 3 }
 0xd54   :  { %4775 = vrot.lane.b32.xlu1 %v4774_v14, %s5184_s19  ;;  %3078 = vmatpush.bf16.msra.mxu3 %v4381_v7  ;;  %v4685_v14 = vld [vmem:[#allocation10 + $0x1d4] sm:$0xf0] }
 0xd55   :  { %v2547_v39 = vpop.f32.mrf.mxu0  ;;  %v4669_v7 = vld [vmem:[#allocation10 + $0x154] sm:$0xf0] }
 0xd56   :  { %v4301_v15 = vor.u32 %v4669_v7, %v4300_v59 }
 0xd59   :  { %v2680_v18 = vpop.f32.mrf.mxu3 }
 0xd5a   :  { %v4365_v18 = vor.u32 %v4685_v14, %v4364_v11 }
 0xd5c   :  { %3079 = vmatpush.bf16.msra.mxu3 %v4365_v18  ;;  %v4284_v18 = vld [vmem:[#allocation10 + $0x128] sm:$0xf] }
 0xd7b   :  { %v2621_v20 = vpop.f32.mrf.mxu0 }
 0xd83   :  { %v2623_v41 = vpop.f32.mrf.mxu0 }
 0xd84   :  { %v4366_v41 = vld [vmem:[#allocation10 + $0x1d8] sm:$0xf0] }
 0xdac   :  { %v4766_v26 = vpop.permute.xlu1 %4765 }
 0xdad   :  { %v4768_v29 = vunpack.i.h.bf16 %v4766_v26  ;;  %v4767_v24 = vunpack.i.l.bf16 %v4766_v26  ;;  %v4345_v26 = vor.u32 %v4678_v22, %v4342_v30  ;;  %v4286_v22 = vld [vmem:[#allocation10 + $0x138] sm:$0xf0] }
 0xdae   :  { %v4289_v23 = vor.u32 %v4663_v21, %v4286_v22 }
 0xdaf   :  { %v2709_v37 = vsel %vm620_vm10, %v2621_v20, %v4768_v29  ;;  %v2694_v38 = vsel %vm620_vm10, %v2545_v28, %v4767_v24  ;;  %v4358_v28 = vld [vmem:[#allocation10 + $0x1d0] sm:$0xf0]  ;;  %v4683_v20 = vld [vmem:[#allocation10 + $0x1cc] sm:$0xf]  ;;  %v4350_v24 = vld [vmem:[#allocation10 + $0x1b8] sm:$0xf0] }
 0xdb0   :  { %v4361_v39 = vor.u32 %v4682_v13, %v4358_v28  ;;  %v4369_v10 = vor.u32 %v4683_v20, %v4366_v41  ;;  %v4679_v29 = vld [vmem:[#allocation10 + $0x1ac] sm:$0xf]  ;;  %v4276_v13 = vld [vmem:[#allocation10 + $0x120] sm:$0xf]  ;;  %v4662_v28 = vld [vmem:[#allocation10 + $0x124] sm:$0xf] }
 0xdb1   :  { %v4277_v14 = vor.u32 %v4664_v9, %v4276_v13  ;;  %v4665_v20 = vld [vmem:[#allocation10 + $0x134] sm:$0xf0] }
 0xdb2   :  { %3065 = vmatpush.bf16.msra.mxu2 %v4361_v39  ;;  %3093 = vmatpush.bf16.msra.mxu0 %v4369_v10  ;;  %v4278_v39 = vld [vmem:[#allocation10 + $0x130] sm:$0xf0]  ;;  %v4285_v56 = vor.u32 %v4665_v20, %v4284_v18 }
 0xdb3   :  { %v4281_v10 = vor.u32 %v4662_v28, %v4278_v39  ;;  %v4720_v39 = vld [vmem:[#allocation13 + $0x1f0] sm:$0xff] }
 0xdb4   :  { %v4771_v34 = vpop.permute.xlu1 %4770 }
 0xdb5   :  { %v4773_v31 = vunpack.i.h.bf16 %v4771_v34  ;;  %v4772_v4 = vunpack.i.l.bf16 %v4771_v34  ;;  %v4349_v34 = vor.u32 %v4681_v62, %v4348_v25  ;;  %v4260_v25 = vld [vmem:[#allocation10 + $0x100] sm:$0xf]  ;;  %v4660_v62 = vld [vmem:[#allocation10 + $0x10c] sm:$0xf0] }
 0xdb6   :  { %3066 = vmatpush.bf16.msra.mxu2 %v4345_v26  ;;  %v4261_v26 = vor.u32 %v4660_v62, %v4260_v25  ;;  %v4695_v25 = vld [vmem:[#allocation13 + $0x128] sm:$0xff] }
 0xdb7   :  { %v2695_v40 = vsel %vm1036_vm14, %v2694_v38, %v4772_v4  ;;  %v2710_v42 = vsel %vm1036_vm14, %v2709_v37, %v4773_v31  ;;  %v4353_v31 = vor.u32 %v4679_v29, %v4350_v24  ;;  %3080 = vmatpush.bf16.msra.mxu3 %v4349_v34  ;;  %v4324_v4 = vld [vmem:[#allocation10 + $0x180] sm:$0xf]  ;;  %v4674_v37 = vld [vmem:[#allocation10 + $0x184] sm:$0xf]  ;;  %v4262_v29 = vld [vmem:[#allocation10 + $0x110] sm:$0xf0] }
 0xdb8   :  { %v4658_v34 = vld [vmem:[#allocation10 + $0x104] sm:$0xf]  ;;  %v4268_v24 = vld [vmem:[#allocation10 + $0x108] sm:$0xf]  ;;  %v4719_v62 = vld [vmem:[#allocation13 + $0x1e8] sm:$0xff] }
 0xdb9   :  { %3094 = vmatpush.bf16.msra.mxu0 %v4353_v31  ;;  %v4265_v31 = vor.u32 %v4658_v34, %v4262_v29 }
 0xdc6   :  { %v4776_v35 = vpop.permute.xlu1 %4775 }
 0xdc7   :  { %v4778_v43 = vunpack.i.h.bf16 %v4776_v35  ;;  %v4777_v17 = vunpack.i.l.bf16 %v4776_v35  ;;  %v4676_v35 = vld [vmem:[#allocation10 + $0x18c] sm:$0xf0] }
 0xdc8   :  { %v4325_v38 = vor.u32 %v4676_v35, %v4324_v4  ;;  %v4661_v4 = vld [vmem:[#allocation10 + $0x114] sm:$0xf0]  ;;  %v4659_v35 = vld [vmem:[#allocation10 + $0x10c] sm:$0xf] }
 0xdc9   :  { %v2696_v8 = vsel %vm1038_vm15, %v2695_v40, %v4777_v17  ;;  %v2711_v44 = vsel %vm1038_vm15, %v2710_v42, %v4778_v43  ;;  %v4326_v43 = vld [vmem:[#allocation10 + $0x190] sm:$0xf0]  ;;  %v4332_v17 = vld [vmem:[#allocation10 + $0x188] sm:$0xf]  ;;  %v4677_v40 = vld [vmem:[#allocation10 + $0x194] sm:$0xf0] }
 0xdca   :  { %v2712_v6 = vpack.c.bf16 %v2711_v44, %v2696_v8  ;;  %v4329_v42 = vor.u32 %v4674_v37, %v4326_v43  ;;  %v4333_v8 = vor.u32 %v4677_v40, %v4332_v17  ;;  %v4675_v44 = vld [vmem:[#allocation10 + $0x18c] sm:$0xf]  ;;  %3053 = vmatpush.bf16.msrb.mxu1 %v4325_v38  ;;  %v4270_v37 = vld [vmem:[#allocation10 + $0x118] sm:$0xf0]  ;;  %v4269_v38 = vor.u32 %v4661_v4, %v4268_v24 }
 0xdcb   :  { %v4273_v43 = vor.u32 %v4659_v35, %v4270_v37  ;;  %v4704_v4 = vld [vmem:[#allocation13 + $0x170] sm:$0xff] }
 0xdcc   :  { %2791 = vmatmul.bf16.vlgmr.msrb.gmra.mxu0 %v2712_v6  ;;  %v4334_v6 = vld [vmem:[#allocation10 + $0x198] sm:$0xf0]  ;;  %3067 = vmatpush.bf16.msra.mxu2 %v4329_v42 }
 0xdcd   :  { %3081 = vmatpush.bf16.msra.mxu3 %v4333_v8  ;;  %v4712_v35 = vld [vmem:[#allocation13 + $0x1b0] sm:$0xff] }
 0xe49   :  { %v2792_v46 = vpop.f32.mrf.mxu0 }
 0xe4a   :  { %v2793_v49 = vadd.f32 %v4781_v45, %v2792_v46  ;;  %v4308_v46 = vld [vmem:[#allocation10 + $0x160] sm:$0xf] }
 0xe4c   :  { %v5787_v58 = vadd.f32 %v2793_v49, %v5648_v50  ;;  %v4672_v49 = vld [vmem:[#allocation10 + $0x16c] sm:$0xf0] }
 0xe4e   :  { %2799 = vadd.xlane.f32.xlu2 %v5787_v58 }
 0xe51   :  { %v2794_v51 = vpop.f32.mrf.mxu0 }
 0xe52   :  { %v2795_v16 = vadd.f32 %v4781_v45, %v2794_v51  ;;  %v4337_v45 = vor.u32 %v4675_v44, %v4334_v6  ;;  %v4670_v51 = vld [vmem:[#allocation10 + $0x164] sm:$0xf] }
 0xe54   :  { %v5791_v32 = vadd.f32 %v2795_v16, %v5652_v47  ;;  %3095 = vmatpush.bf16.msra.mxu0 %v4337_v45  ;;  %v4309_v16 = vor.u32 %v4672_v49, %v4308_v46 }
 0xe56   :  { %2801 = vadd.xlane.f32.xlu0 %v5791_v32  ;;  %3054 = vmatpush.bf16.msrb.mxu1 %v4309_v16 }
 0xe5a   :  { %3055 = vmatpush.bf16.msrb.mxu1 %v4293_v19 }
 0xe5e   :  { %3056 = vmatpush.bf16.msrb.mxu1 %v4277_v14  ;;  %v4696_v14 = vld [vmem:[#allocation13 + $0x130] sm:$0xff] }
 0xe62   :  { %3057 = vmatpush.bf16.msrb.mxu1 %v4261_v26 }
 0xe66   :  { %3540 = vmatpush.bf16.msra.mxu1 %v4697_v33 }
 0xe6a   :  { %3541 = vmatpush.bf16.msra.mxu1 %v4696_v14 }
 0xe6e   :  { %3542 = vmatpush.bf16.msra.mxu1 %v4695_v25  ;;  %v4690_v25 = vld [vmem:[#allocation13 + $0x100] sm:$0xff] }
 0xec1   :  { %v2800_v36 = vpop.xlane.xlu2 %2799 }
 0xec2   :  { %v2803_v52 = vmul.f32 %v2800_v36, %v5315_v27  ;;  %v4310_v36 = vld [vmem:[#allocation10 + $0x170] sm:$0xf0] }
 0xec4   :  { %v5796_v53 = vsub.f32 %v5787_v58, %v2803_v52  ;;  %v4316_v52 = vld [vmem:[#allocation10 + $0x168] sm:$0xf] }
 0xec6   :  { %v2807_v55 = vmul.f32 %v5796_v53, %v5796_v53 }
 0xec8   :  { %2809 = vadd.xlane.f32.xlu1 %v2807_v55  ;;  %v4673_v55 = vld [vmem:[#allocation10 + $0x174] sm:$0xf0] }
 0xec9   :  { %v2802_v50 = vpop.xlane.xlu0 %2801 }
 0xeca   :  { %v2804_v60 = vmul.f32 %v2802_v50, %v5315_v27  ;;  %v4313_v50 = vor.u32 %v4670_v51, %v4310_v36 }
 0xecc   :  { %v5802_v61 = vsub.f32 %v5791_v32, %v2804_v60  ;;  %v4317_v60 = vor.u32 %v4673_v55, %v4316_v52  ;;  %3068 = vmatpush.bf16.msra.mxu2 %v4313_v50 }
 0xece   :  { %v2808_v47 = vmul.f32 %v5802_v61, %v5802_v61  ;;  %3082 = vmatpush.bf16.msra.mxu3 %v4317_v60  ;;  %v2839_v60 = vperm.slane %v5672_v12, 2  ;;  %v5814_v12 = vld [vmem:[#allocation11 + $0x4] sm:$0xf] }
 0xecf   :  { %v2884_v20 = vperm.slane %v5814_v12, 2 }
 0xed0   :  { %2811 = vadd.xlane.f32.xlu2 %v2808_v47  ;;  %v4671_v47 = vld [vmem:[#allocation10 + $0x16c] sm:$0xf]  ;;  %3069 = vmatpush.bf16.msra.mxu2 %v4297_v2 }
 0xed1   :  { %v4321_v0 = vor.u32 %v4671_v47, %v4318_v63 }
 0xed2   :  { %3083 = vmatpush.bf16.msra.mxu3 %v4301_v15  ;;  %v2885_v15 = vperm.slane %v5814_v12, 3 }
 0xed3   :  { %3096 = vmatpush.bf16.msra.mxu0 %v4321_v0 }
 0xed4   :  { %3070 = vmatpush.bf16.msra.mxu2 %v4281_v10  ;;  %v4705_v10 = vld [vmem:[#allocation13 + $0x178] sm:$0xff] }
 0xed6   :  { %3084 = vmatpush.bf16.msra.mxu3 %v4285_v56  ;;  %v4713_v56 = vld [vmem:[#allocation13 + $0x1b8] sm:$0xff] }
 0xed7   :  { %3097 = vmatpush.bf16.msra.mxu0 %v4305_v5 }
 0xed8   :  { %3071 = vmatpush.bf16.msra.mxu2 %v4265_v31 }
 0xeda   :  { %3085 = vmatpush.bf16.msra.mxu3 %v4269_v38 }
 0xedb   :  { %3098 = vmatpush.bf16.msra.mxu0 %v4289_v23 }
 0xedc   :  { %3554 = vmatpush.bf16.msrb.mxu2 %v4705_v10  ;;  %v4700_v10 = vld [vmem:[#allocation13 + $0x150] sm:$0xff] }
 0xede   :  { %3568 = vmatpush.bf16.msrb.mxu3 %v4713_v56 }
 0xedf   :  { %3099 = vmatpush.bf16.msra.mxu0 %v4273_v43 }
 0xee0   :  { %3555 = vmatpush.bf16.msrb.mxu2 %v4704_v4 }
 0xee2   :  { %3569 = vmatpush.bf16.msrb.mxu3 %v4712_v35  ;;  %v4699_v35 = vld [vmem:[#allocation13 + $0x148] sm:$0xff] }
 0xee3   :  { %3582 = vmatpush.bf16.msrb.mxu0 %v4721_v3 }
 0xee7   :  { %3583 = vmatpush.bf16.msrb.mxu0 %v4720_v39 }
 0xeeb   :  { %3584 = vmatpush.bf16.msrb.mxu0 %v4719_v62  ;;  %v4714_v62 = vld [vmem:[#allocation13 + $0x1c0] sm:$0xff] }
 0xf3b   :  { %v2810_v11 = vpop.xlane.xlu1 %2809 }
 0xf3c   :  { %v2813_v41 = vmul.f32 %v2810_v11, %v5315_v27  ;;  %v2883_v11 = vperm.slane %v5814_v12, 1 }
 0xf3e   :  { %v2815_v30 = vadd.f32 1e-05, %v2813_v41 }
 0xf40   :  { %4893 = vrsqrt.f32 %v2815_v30  ;;  %vm2823_vm11 = vweird.f32 %v2815_v30 }
 0xf43   :  { %v2812_v17 = vpop.xlane.xlu2 %2811 }
 0xf44   :  { %v2814_v40 = vmul.f32 %v2812_v17, %v5315_v27 }
 0xf46   :  { %v4894_v42 = vpop.eup %4893  ;;  %v2816_v8 = vadd.f32 1e-05, %v2814_v40  ;;  %v4694_v40 = vld [vmem:[#allocation13 + $0x120] sm:$0xff] }
 0xf47   :  { %v2818_v44 = vmul.f32 %v4894_v42, %v2815_v30  ;;  %vm2824_vm10 = vweird.f32 %v4894_v42  ;;  %3543 = vmatpush.bf16.msra.mxu1 %v4694_v40 }
 0xf48   :  { %4895 = vrsqrt.f32 %v2816_v8  ;;  %vm2825_vm13 = vmor %vm2823_vm11, %vm2824_vm10  ;;  %vm2833_vm15 = vweird.f32 %v2816_v8 }
 0xf49   :  { %v2819_v6 = vmul.f32 %v4894_v42, %v2818_v44 }
 0xf4b   :  { %v2820_v45 = vmul.f32 0.5, %v2819_v6 }
 0xf4d   :  { %v2821_v46 = vsub.f32 1.5, %v2820_v45  ;;  %v4703_v45 = vld [vmem:[#allocation13 + $0x168] sm:$0xff] }
 0xf4e   :  { %v4896_v49 = vpop.eup %4895  ;;  %3556 = vmatpush.bf16.msrb.mxu2 %v4703_v45 }
 0xf4f   :  { %v2822_v51 = vmul.f32 %v4894_v42, %v2821_v46  ;;  %v2828_v16 = vmul.f32 %v4896_v49, %v2816_v8  ;;  %vm2834_vm14 = vweird.f32 %v4896_v49  ;;  %v4711_v46 = vld [vmem:[#allocation13 + $0x1a8] sm:$0xff] }
 0xf50   :  { %vm2835_vm0 = vmor %vm2833_vm15, %vm2834_vm14  ;;  %3570 = vmatpush.bf16.msrb.mxu3 %v4711_v46  ;;  %v4698_v46 = vld [vmem:[#allocation13 + $0x140] sm:$0xff] }
 0xf51   :  { %v2829_v36 = vmul.f32 %v4896_v49, %v2828_v16  ;;  %v2826_v52 = vsel %vm2825_vm13, %v4894_v42, %v2822_v51  ;;  %v4718_v42 = vld [vmem:[#allocation13 + $0x1e0] sm:$0xff] }
 0xf52   :  { %v2837_v47 = vmul.f32 %v2826_v52, %v5796_v53  ;;  %v2882_v53 = vperm.slane %v5814_v12, 0  ;;  %3585 = vmatpush.bf16.msrb.mxu0 %v4718_v42 }
 0xf53   :  { %v2830_v55 = vmul.f32 0.5, %v2829_v36 }
 0xf54   :  { %v2840_v1 = vmul.f32 %v2839_v60, %v2837_v47  ;;  %v4717_v47 = vld [vmem:[#allocation13 + $0x1d8] sm:$0xff] }
 0xf55   :  { %v2831_v50 = vsub.f32 1.5, %v2830_v55 }
 0xf56   :  { %v2843_v59 = vadd.f32 %v2842_v48, %v2840_v1  ;;  %3586 = vmatpush.bf16.msrb.mxu0 %v4717_v47  ;;  %v4692_v1 = vld [vmem:[#allocation13 + $0x110] sm:$0xff] }
 0xf57   :  { %v2832_v63 = vmul.f32 %v4896_v49, %v2831_v50 }
 0xf59   :  { %v2836_v0 = vsel %vm2835_vm0, %v4896_v49, %v2832_v63  ;;  %v4702_v63 = vld [vmem:[#allocation13 + $0x160] sm:$0xff] }
 0xf5a   :  { %v2838_v19 = vmul.f32 %v2836_v0, %v5802_v61  ;;  %v4710_v0 = vld [vmem:[#allocation13 + $0x1a0] sm:$0xff]  ;;  %3557 = vmatpush.bf16.msrb.mxu2 %v4702_v63 }
 0xf5b   :  { %3571 = vmatpush.bf16.msrb.mxu3 %v4710_v0 }
 0xf5c   :  { %v2841_v54 = vmul.f32 %v2839_v60, %v2838_v19  ;;  %v4693_v60 = vld [vmem:[#allocation13 + $0x118] sm:$0xff]  ;;  %v4716_v19 = vld [vmem:[#allocation13 + $0x1d0] sm:$0xff] }
 0xf5d   :  { %3544 = vmatpush.bf16.msra.mxu1 %v4693_v60  ;;  %3587 = vmatpush.bf16.msrb.mxu0 %v4716_v19 }
 0xf5e   :  { %v2844_v7 = vadd.f32 %v2842_v48, %v2841_v54 }
 0xf60   :  { %v2845_v2 = vpack.c.bf16 %v2844_v7, %v2843_v59  ;;  %v4701_v7 = vld [vmem:[#allocation13 + $0x158] sm:$0xff] }
 0xf61   :  { %3545 = vmatpush.bf16.msra.mxu1 %v4692_v1  ;;  %3558 = vmatpush.bf16.msrb.mxu2 %v4701_v7 }
 0xf62   :  { %3058 = vmatmul.bf16.vlgmr.msrb.gmra.mxu1 %v2845_v2  ;;  %3072 = vmatmul.bf16.vlgmr.msra.gmra.mxu2 %v2845_v2 }
 0xf63   :  { %3086 = vmatmul.bf16.vlgmr.msra.gmra.mxu3 %v2845_v2  ;;  %3100 = vmatmul.bf16.vlgmr.msra.gmra.mxu0 %v2845_v2  ;;  %v4709_v2 = vld [vmem:[#allocation13 + $0x198] sm:$0xff] }
 0xf64   :  { %3572 = vmatpush.bf16.msrb.mxu3 %v4709_v2 }
 0xf65   :  { %3559 = vmatpush.bf16.msrb.mxu2 %v4700_v10 }
 0xf69   :  { %3560 = vmatpush.bf16.msrb.mxu2 %v4699_v35 }
 0xf6d   :  { %3561 = vmatpush.bf16.msrb.mxu2 %v4698_v46 }
 0xfdf   :  { %v3059_v5 = vpop.f32.mrf.mxu1 }
 0xfe0   :  { %v5818_v13 = vadd.f32 %v3059_v5, %v2882_v53  ;;  %v3101_v61 = vpop.f32.mrf.mxu0  ;;  %v4691_v5 = vld [vmem:[#allocation13 + $0x108] sm:$0xff] }
 0xfe1   :  { %v5820_v9 = vadd.f32 %v3101_v61, %v2885_v15  ;;  %v4715_v61 = vld [vmem:[#allocation13 + $0x1c8] sm:$0xff]  ;;  %3546 = vmatpush.bf16.msra.mxu1 %v4691_v5 }
 0xfe2   :  { %v4386_v28 = vmul.f32 -1.702, %v5818_v13  ;;  %3588 = vmatpush.bf16.msrb.mxu0 %v4715_v61 }
 0xfe3   :  { %v4389_v18 = vmul.f32 -1.702, %v5820_v9 }
 0xfe4   :  { %v3122_v41 = vmul.f32 1.442695, %v4386_v28 }
 0xfe5   :  { %v3128_v21 = vmul.f32 1.442695, %v4389_v18  ;;  %v3073_v22 = vpop.f32.mrf.mxu2  ;;  %3547 = vmatpush.bf16.msra.mxu1 %v4690_v25 }
 0xfe6   :  { %4897 = vpow2.f32 %v3122_v41  ;;  %v5826_v23 = vadd.f32 %v3073_v22, %v2883_v11  ;;  %v3087_v30 = vpop.f32.mrf.mxu3  ;;  %3589 = vmatpush.bf16.msrb.mxu0 %v4714_v62 }
 0xfe7   :  { %4899 = vpow2.f32 %v3128_v21  ;;  %v5830_v26 = vadd.f32 %v3087_v30, %v2884_v20  ;;  %v3061_v34 = vpop.f32.mrf.mxu1  ;;  %v4708_v21 = vld [vmem:[#allocation13 + $0x190] sm:$0xff] }
 0xfe8   :  { %v4387_v29 = vmul.f32 -1.702, %v5826_v23  ;;  %v5833_v24 = vadd.f32 %v3061_v34, %v2882_v53  ;;  %v3103_v31 = vpop.f32.mrf.mxu0  ;;  %3573 = vmatpush.bf16.msrb.mxu3 %v4708_v21 }
 0xfe9   :  { %v4388_v37 = vmul.f32 -1.702, %v5830_v26  ;;  %v5836_v38 = vadd.f32 %v3103_v31, %v2885_v15 }
 0xfea   :  { %v3124_v43 = vmul.f32 1.442695, %v4387_v29  ;;  %v4390_v17 = vmul.f32 -1.702, %v5833_v24 }
 0xfeb   :  { %v4393_v8 = vmul.f32 -1.702, %v5836_v38  ;;  %v3126_v55 = vmul.f32 1.442695, %v4388_v37  ;;  %v4707_v37 = vld [vmem:[#allocation13 + $0x188] sm:$0xff] }
 0xfec   :  { %v4898_v44 = vpop.eup %4897  ;;  %4901 = vpow2.f32 %v3124_v43  ;;  %v3130_v6 = vmul.f32 1.442695, %v4390_v17  ;;  %3574 = vmatpush.bf16.msrb.mxu3 %v4707_v37 }
 0xfed   :  { %v4900_v49 = vpop.eup %4899  ;;  %v5840_v51 = vadd.f32 1.0, %v4898_v44  ;;  %v3136_v16 = vmul.f32 1.442695, %v4393_v8  ;;  %v3075_v36 = vpop.f32.mrf.mxu2 }
 0xfee   :  { %v5842_v52 = vadd.f32 1.0, %v4900_v49  ;;  %4903 = vpow2.f32 %v3130_v6  ;;  %v5844_v50 = vadd.f32 %v3075_v36, %v2883_v11  ;;  %v3089_v41 = vpop.f32.mrf.mxu3  ;;  %v4706_v49 = vld [vmem:[#allocation13 + $0x180] sm:$0xff] }
 0xfef   :  { %4905 = vrcp.f32 %v5840_v51  ;;  %v5872_v31 = vadd.f32 %v3089_v41, %v2884_v20  ;;  %v3155_v4 = vand.u32 2147483647, %v5840_v51  ;;  %v3157_v43 = vand.u32 2147483648, %v5840_v51 }
 0xff0   :  { %4907 = vrcp.f32 %v5842_v52  ;;  %v4391_v57 = vmul.f32 -1.702, %v5844_v50  ;;  %v3200_v17 = vand.u32 2147483647, %v5842_v52  ;;  %v3202_v8 = vand.u32 2147483648, %v5842_v52  ;;  %3575 = vmatpush.bf16.msrb.mxu3 %v4706_v49 }
 0xff1   :  { %4909 = vpow2.f32 %v3136_v16  ;;  %v4392_v44 = vmul.f32 -1.702, %v5872_v31  ;;  %vm3151_vm1 = vweird.f32 %v5840_v51  ;;  %vm5887_vm3 = vcmp.eq.f32.partialorder %v3155_v4, 8.507059e+37 }
 0xff2   :  { %v4902_v48 = vpop.eup %4901  ;;  %4911 = vpow2.f32 %v3126_v55  ;;  %v3132_v15 = vmul.f32 1.442695, %v4391_v57  ;;  %vm3196_vm4 = vweird.f32 %v5842_v52  ;;  %v3158_v36 = vor.u32 1.1754944e-38, %v3157_v43 }
 0xff3   :  { %v5849_v54 = vadd.f32 1.0, %v4902_v48  ;;  %vm5899_vm7 = vcmp.eq.f32.partialorder %v3200_v17, 8.507059e+37  ;;  %v3203_v48 = vor.u32 1.1754944e-38, %v3202_v8 }
 0xff4   :  { %v4904_v59 = vpop.eup %4903 }
 0xff5   :  { %v5851_v53 = vpop.eup %4905  ;;  %4913 = vrcp.f32 %v5849_v54  ;;  %v5860_v18 = vadd.f32 1.0, %v4904_v59  ;;  %v3134_v59 = vmul.f32 1.442695, %v4392_v44  ;;  %v3172_v17 = vand.u32 2147483648, %v5849_v54 }
 0xff6   :  { %v5854_v33 = vpop.eup %4907  ;;  %v3147_v3 = vmul.f32 %v5851_v53, %v5840_v51  ;;  %4915 = vpow2.f32 %v3132_v15  ;;  %vm3152_vm2 = vweird.f32 %v5851_v53 }
 0xff7   :  { %v4910_v28 = vpop.eup %4909  ;;  %v3192_v11 = vmul.f32 %v5854_v33, %v5842_v52  ;;  %4917 = vrcp.f32 %v5860_v18  ;;  %vm5894_vm5 = vmor %vm3151_vm1, %vm3152_vm2  ;;  %vm3197_vm6 = vweird.f32 %v5854_v33  ;;  %vm3211_vm8 = vweird.f32 %v5860_v18 }
 0xff8   :  { %v4912_v14 = vpop.eup %4911  ;;  %v3148_v39 = vsub.f32 1.0, %v3147_v3  ;;  %v5862_v56 = vadd.f32 1.0, %v4910_v28  ;;  %v3215_v7 = vand.u32 2147483647, %v5860_v18  ;;  %v3217_v2 = vand.u32 2147483648, %v5860_v18  ;;  %vm5923_vm9 = vmor %vm3196_vm4, %vm3197_vm6 }
 0xff9   :  { %v3193_v30 = vsub.f32 1.0, %v3192_v11  ;;  %v5868_v29 = vadd.f32 1.0, %v4912_v14  ;;  %vm3166_vm1 = vweird.f32 %v5849_v54 }
 0xffa   :  { %v3149_v22 = vmul.f32 %v5851_v53, %v3148_v39  ;;  %4919 = vrcp.f32 %v5862_v56  ;;  %v3260_v14 = vand.u32 2147483647, %v5862_v56  ;;  %v3262_v39 = vand.u32 2147483648, %v5862_v56 }
 0xffb   :  { %v5866_v34 = vpop.eup %4913  ;;  %v3194_v12 = vmul.f32 %v5854_v33, %v3193_v30  ;;  %4921 = vrcp.f32 %v5868_v29  ;;  %vm3216_vm14 = vcmp.eq.f32.partialorder %v3215_v7, 8.507059e+37  ;;  %vm3256_vm15 = vweird.f32 %v5862_v56 }
 0xffc   :  { %v3150_v40 = vadd.f32 %v5851_v53, %v3149_v22  ;;  %v3162_v20 = vmul.f32 %v5866_v34, %v5849_v54  ;;  %v4916_v42 = vpop.eup %4915  ;;  %vm3167_vm11 = vweird.f32 %v5866_v34  ;;  %v3263_v37 = vor.u32 1.1754944e-38, %v3262_v39 }
 0xffd   :  { %v4918_v6 = vpop.eup %4917  ;;  %v3195_v63 = vadd.f32 %v5854_v33, %v3194_v12  ;;  %v5908_v57 = vadd.f32 1.0, %v4916_v42  ;;  %vm3261_vm2 = vcmp.eq.f32.partialorder %v3260_v14, 8.507059e+37  ;;  %v3185_v7 = vand.u32 2147483647, %v5868_v29 }
 0xffe   :  { %v3207_v51 = vmul.f32 %v4918_v6, %v5860_v18  ;;  %v3154_v47 = vsel %vm5894_vm5, %v5851_v53, %v3150_v40  ;;  %v3163_v0 = vsub.f32 1.0, %v3162_v20  ;;  %vm3212_vm12 = vweird.f32 %v4918_v6 }
 0xfff   :  { %4923 = vrcp.f32 %v5908_v57  ;;  %v3159_v15 = vsel %vm5887_vm3, %v3158_v36, %v3154_v47  ;;  %v3199_v28 = vsel %vm5923_vm9, %v5854_v33, %v3195_v63  ;;  %vm3213_vm13 = vmor %vm3211_vm8, %vm3212_vm12  ;;  %v3218_v33 = vor.u32 1.1754944e-38, %v3217_v2 }
0x1000   :  { %v4920_v60 = vpop.eup %4919  ;;  %v3208_v1 = vsub.f32 1.0, %v3207_v51  ;;  %v3164_v11 = vmul.f32 %v5866_v34, %v3163_v0  ;;  %4925 = vpow2.f32 %v3134_v59  ;;  %v3266_v21 = vmul.f32 %v3159_v15, %v5818_v13  ;;  %vm5952_vm3 = vmor %vm3166_vm1, %vm3167_vm11 }
0x1001   :  { %v3252_v19 = vmul.f32 %v4920_v60, %v5862_v56  ;;  %v5915_v53 = vpop.eup %4921  ;;  %vm3257_vm10 = vweird.f32 %v4920_v60  ;;  %v3204_v62 = vsel %vm5899_vm7, %v3203_v48, %v3199_v28  ;;  %v3170_v56 = vand.u32 2147483647, %v5849_v54 }
0x1002   :  { %v3209_v5 = vmul.f32 %v4918_v6, %v3208_v1  ;;  %v3177_v52 = vmul.f32 %v5915_v53, %v5868_v29  ;;  %v3165_v4 = vadd.f32 %v5866_v34, %v3164_v11  ;;  %vm3258_vm0 = vmor %vm3256_vm15, %vm3257_vm10  ;;  %v3269_v20 = vmul.f32 %v3204_v62, %v5820_v9 }
0x1003   :  { %v3253_v61 = vsub.f32 1.0, %v3252_v19  ;;  %v3232_v54 = vand.u32 2147483648, %v5908_v57  ;;  %v3230_v16 = vand.u32 2147483647, %v5908_v57  ;;  %v3173_v36 = vor.u32 1.1754944e-38, %v3172_v17 }
0x1004   :  { %v3210_v41 = vadd.f32 %v4918_v6, %v3209_v5  ;;  %v3178_v45 = vsub.f32 1.0, %v3177_v52  ;;  %vm3171_vm5 = vcmp.eq.f32.partialorder %v3170_v56, 8.507059e+37  ;;  %vm3226_vm6 = vweird.f32 %v5908_v57  ;;  %v4782_v52 = vld [vmem:[#allocation14 + $0x1] ss:$0 sm:$0xff] }
0x1005   :  { %v3254_v10 = vmul.f32 %v4920_v60, %v3253_v61  ;;  %v4924_v25 = vpop.eup %4923  ;;  %vm3231_vm8 = vcmp.eq.f32.partialorder %v3230_v16, 8.507059e+37  ;;  %vm3182_vm9 = vweird.f32 %v5915_v53  ;;  %v3187_v59 = vand.u32 2147483648, %v5868_v29 }
0x1006   :  { %v3214_v22 = vsel %vm3213_vm13, %v4918_v6, %v3210_v41  ;;  %v3222_v13 = vmul.f32 %v4924_v25, %v5908_v57  ;;  %v4926_v12 = vpop.eup %4925  ;;  %v3169_v6 = vsel %vm5952_vm3, %v5866_v34, %v3165_v4  ;;  %vm3227_vm4 = vweird.f32 %v4924_v25 }
0x1007   :  { %v3255_v30 = vadd.f32 %v4920_v60, %v3254_v10  ;;  %v3219_v35 = vsel %vm3216_vm14, %v3218_v33, %v3214_v22  ;;  %v3144_v46 = vadd.f32 1.0, %v4926_v12  ;;  %vm3228_vm7 = vmor %vm3226_vm6, %vm3227_vm4  ;;  %v3233_v34 = vor.u32 1.1754944e-38, %v3232_v54 }
0x1008   :  { %v3270_v18 = vmul.f32 %v3219_v35, %v5833_v24  ;;  %v3223_v44 = vsub.f32 1.0, %v3222_v13  ;;  %v3179_v51 = vmul.f32 %v5915_v53, %v3178_v45  ;;  %vm3181_vm12 = vweird.f32 %v5868_v29 }
0x1009   :  { %v3259_v43 = vsel %vm3258_vm0, %v4920_v60, %v3255_v30  ;;  %4927 = vrcp.f32 %v3144_v46  ;;  %vm3183_vm10 = vmor %vm3181_vm12, %vm3182_vm9  ;;  %v3247_v15 = vand.u32 2147483648, %v3144_v46  ;;  %v3245_v3 = vand.u32 2147483647, %v3144_v46 }
0x100a   :  { %v3264_v40 = vsel %vm3261_vm2, %v3263_v37, %v3259_v43  ;;  %v3274_v24 = vpack.c.bf16 %v3270_v18, %v3266_v21  ;;  %v3224_v9 = vmul.f32 %v4924_v25, %v3223_v44  ;;  %v3180_v1 = vadd.f32 %v5915_v53, %v3179_v51 }
0x100b   :  { %v3273_v8 = vmul.f32 %v3264_v40, %v5836_v38  ;;  %v3174_v38 = vsel %vm3171_vm5, %v3173_v36, %v3169_v6  ;;  %v3188_v5 = vor.u32 1.1754944e-38, %v3187_v59  ;;  %vm3186_vm13 = vcmp.eq.f32.partialorder %v3185_v7, 8.507059e+37 }
0x100c   :  { %3548 = vmatmul.bf16.vlgmr.msra.gmra.mxu1 %v3274_v24  ;;  %v3225_v55 = vadd.f32 %v4924_v25, %v3224_v9  ;;  %v3267_v63 = vmul.f32 %v3174_v38, %v5826_v23  ;;  %v3184_v23 = vsel %vm3183_vm10, %v5915_v53, %v3180_v1  ;;  %vm3241_vm14 = vweird.f32 %v3144_v46 }
0x100d   :  { %v3277_v49 = vpack.c.bf16 %v3273_v8, %v3269_v20  ;;  %v3189_v28 = vsel %vm3186_vm13, %v3188_v5, %v3184_v23  ;;  %v3248_v11 = vor.u32 1.1754944e-38, %v3247_v15  ;;  %vm3246_vm0 = vcmp.eq.f32.partialorder %v3245_v3, 8.507059e+37 }
0x100e   :  { %v3229_v60 = vsel %vm3228_vm7, %v4924_v25, %v3225_v55  ;;  %v3268_v29 = vmul.f32 %v3189_v28, %v5830_v26 }
0x100f   :  { %3590 = vmatmul.bf16.vlgmr.msrb.gmra.mxu0 %v3277_v49  ;;  %v3234_v47 = vsel %vm3231_vm8, %v3233_v34, %v3229_v60  ;;  %v4928_v48 = vpop.eup %4927  ;;  %v3598_v34 = vld [vmem:[%s5998_s12] sm:$0x3]  ;;  %s5186_s12 = smov [#allocation16]  }
0x1010   :  { %v3271_v0 = vmul.f32 %v3234_v47, %v5844_v50  ;;  %v3237_v57 = vmul.f32 %v4928_v48, %v3144_v46  ;;  %vm3242_vm11 = vweird.f32 %v4928_v48  ;;  %s3651_s9 = sshll.u32 %s5186_s12, 4  ;;  %s3652_s9 = int_to_ptr.vmem [resolvable:$true] %s3651_s9 }
0x1011   :  { %vm3243_vm15 = vmor %vm3241_vm14, %vm3242_vm11 }
0x1012   :  { %v3275_v19 = vpack.c.bf16 %v3271_v0, %v3267_v63  ;;  %v3238_v2 = vsub.f32 1.0, %v3237_v57  ;;  %v3639_v0 = vperm.slane %v3598_v34, 0 }
0x1014   :  { %3562 = vmatmul.bf16.vlgmr.msrb.gmra.mxu2 %v3275_v19  ;;  %v3239_v50 = vmul.f32 %v4928_v48, %v3238_v2  ;;  %v3642_v19 = vperm.slane %v3598_v34, 1 }
0x1016   :  { %v3240_v61 = vadd.f32 %v4928_v48, %v3239_v50 }
0x1018   :  { %v3244_v14 = vsel %vm3243_vm15, %v4928_v48, %v3240_v61 }
0x1019   :  { %v3249_v39 = vsel %vm3246_vm0, %v3248_v11, %v3244_v14 }
0x101a   :  { %v3272_v41 = vmul.f32 %v3249_v39, %v5872_v31 }
0x101c   :  { %v3276_v10 = vpack.c.bf16 %v3272_v41, %v3268_v29 }
0x101e   :  { %3576 = vmatmul.bf16.vlgmr.msrb.gmra.mxu3 %v3276_v10 }
0x1089   :  { %v3549_v53 = vpop.f32.mrf.mxu1 }
0x108a   :  { %v3550_v21 = vadd.f32 %v4782_v52, %v3549_v53 }
0x108c   :  { %v3591_v30 = vpop.f32.mrf.mxu0 }
0x1091   :  { %v3551_v25 = vpop.f32.mrf.mxu1 }
0x1092   :  { %v3552_v37 = vadd.f32 %v4782_v52, %v3551_v25 }
0x1094   :  { %v3593_v56 = vpop.f32.mrf.mxu0 }
0x1097   :  { %v3563_v33 = vpop.f32.mrf.mxu2 }
0x1098   :  { %v3564_v22 = vadd.f32 %v3563_v33, %v3550_v21 }
0x109f   :  { %v3565_v35 = vpop.f32.mrf.mxu2 }
0x10a0   :  { %v3566_v43 = vadd.f32 %v3565_v35, %v3552_v37 }
0x10a1   :  { %v3577_v62 = vpop.f32.mrf.mxu3 }
0x10a2   :  { %v3578_v4 = vadd.f32 %v3577_v62, %v3564_v22 }
0x10a4   :  { %v3592_v18 = vadd.f32 %v3591_v30, %v3578_v4 }
0x10a6   :  { %v3596_v13 = vadd.f32 %v3592_v18, %v5787_v58 }
0x10a8   :  { %3599 = vadd.xlane.f32.xlu0 %v3596_v13 }
0x10a9   :  { %v3579_v26 = vpop.f32.mrf.mxu3 }
0x10aa   :  { %v3580_v31 = vadd.f32 %v3579_v26, %v3566_v43 }
0x10ac   :  { %v3594_v17 = vadd.f32 %v3593_v56, %v3580_v31 }
0x10ae   :  { %v3597_v40 = vadd.f32 %v3594_v17, %v5791_v32 }
0x10b0   :  { %3601 = vadd.xlane.f32.xlu2 %v3597_v40 }
0x111b   :  { %v3600_v12 = vpop.xlane.xlu0 %3599 }
0x111c   :  { %v3603_v20 = vmul.f32 %v3600_v12, %v5315_v27 }
0x111e   :  { %v3605_v42 = vsub.f32 %v3596_v13, %v3603_v20 }
0x1120   :  { %v3607_v24 = vmul.f32 %v3605_v42, %v3605_v42 }
0x1122   :  { %3609 = vadd.xlane.f32.xlu0 %v3607_v24 }
0x1123   :  { %v3602_v8 = vpop.xlane.xlu2 %3601 }
0x1124   :  { %v3604_v44 = vmul.f32 %v3602_v8, %v5315_v27 }
0x1126   :  { %v3606_v6 = vsub.f32 %v3597_v40, %v3604_v44 }
0x1128   :  { %v3608_v45 = vmul.f32 %v3606_v6, %v3606_v6 }
0x112a   :  { %3611 = vadd.xlane.f32.xlu2 %v3608_v45 }
0x1195   :  { %v3610_v58 = vpop.xlane.xlu0 %3609 }
0x1196   :  { %v3613_v54 = vmul.f32 %v3610_v58, %v5315_v27 }
0x1198   :  { %v3615_v46 = vadd.f32 1e-05, %v3613_v54 }
0x119a   :  { %4929 = vrsqrt.f32 %v3615_v46  ;;  %vm3623_vm1 = vweird.f32 %v3615_v46 }
0x119d   :  { %v3612_v49 = vpop.xlane.xlu2 %3611 }
0x119e   :  { %v3614_v32 = vmul.f32 %v3612_v49, %v5315_v27 }
0x11a0   :  { %v4930_v9 = vpop.eup %4929  ;;  %v3616_v16 = vadd.f32 1e-05, %v3614_v32 }
0x11a1   :  { %v3618_v36 = vmul.f32 %v4930_v9, %v3615_v46  ;;  %vm3624_vm2 = vweird.f32 %v4930_v9 }
0x11a2   :  { %4931 = vrsqrt.f32 %v3616_v16  ;;  %vm3625_vm3 = vmor %vm3623_vm1, %vm3624_vm2  ;;  %vm3633_vm5 = vweird.f32 %v3616_v16 }
0x11a3   :  { %v3619_v55 = vmul.f32 %v4930_v9, %v3618_v36 }
0x11a5   :  { %v3620_v38 = vmul.f32 0.5, %v3619_v55 }
0x11a7   :  { %v3621_v51 = vsub.f32 1.5, %v3620_v38 }
0x11a8   :  { %v4932_v60 = vpop.eup %4931 }
0x11a9   :  { %v3622_v47 = vmul.f32 %v4930_v9, %v3621_v51  ;;  %v3628_v63 = vmul.f32 %v4932_v60, %v3616_v16  ;;  %vm3634_vm4 = vweird.f32 %v4932_v60 }
0x11aa   :  { %vm3635_vm6 = vmor %vm3633_vm5, %vm3634_vm4 }
0x11ab   :  { %v3626_v48 = vsel %vm3625_vm3, %v4930_v9, %v3622_v47  ;;  %v3629_v27 = vmul.f32 %v4932_v60, %v3628_v63 }
0x11ac   :  { %v3637_v1 = vmul.f32 %v3626_v48, %v3605_v42 }
0x11ad   :  { %v3630_v57 = vmul.f32 0.5, %v3629_v27 }
0x11ae   :  { %v3640_v59 = vmul.f32 %v3639_v0, %v3637_v1 }
0x11af   :  { %v3631_v7 = vsub.f32 1.5, %v3630_v57 }
0x11b0   :  { %v3643_v2 = vadd.f32 %v3642_v19, %v3640_v59 }
0x11b1   :  { %v3632_v15 = vmul.f32 %v4932_v60, %v3631_v7 }
0x11b2   :  { %3645 = vst [vmem:[#allocation16] sm:$0xff] %v3643_v2 }
0x11b3   :  { %v3636_v23 = vsel %vm3635_vm6, %v4932_v60, %v3632_v15 }
0x11b4   :  { %v3638_v50 = vmul.f32 %v3636_v23, %v3606_v6 }
0x11b6   :  { %v3641_v3 = vmul.f32 %v3639_v0, %v3638_v50 }
0x11b8   :  { %v3644_v5 = vadd.f32 %v3642_v19, %v3641_v3 }
0x11ba   :  { %3646 = vst [vmem:[#allocation16 + $0x8] sm:$0xff] %v3644_v5 }
0x11bb   :  { %3659 = dma.vmem_to_hbm [thread:$0]  %s3652_s9, 256, %s3654_s29, [#allocation4], %s5187_s30, %s5187_s30, %s5188_s14  }
0x11bc   :  { %5161 = dma.done.wait [#allocation4], 256  }
0x11bd   :  { %5162 = vsyncadd [#allocation4], 4294967040 }
0x11be   :  { %3664 = vsyncpa [#allocation3], 1 }
0x11bf   :  { %3665 = vsyncpa [#allocation6], 1 }
0x11c0   :  { %3666 = vsyncpa [#allocation9], 1 }
0x11c1   :  { %3667 = vsyncpa [#allocation12], 1 }
0x11c2   :  { %3668 = vsyncpa [#allocation15], 1 }
0x11c3   :  { %3669 = vsyncpa [#allocation4], 1 }

</bundles_post_ra>
